<compile_context>
chip_gen: v6e
topology: v6e:2x2x1
jax: 0.10.0
libtpu: 0.0.40
codegen_flags: <defaults>
</compile_context>

<pallas_src>
import numpy as np
import jax
import jax.numpy as jnp
from jax.experimental import pallas as pl
from jax.experimental.pallas import tpu as pltpu

LANE = 128   # padded lane width of every per-sample activation slab


# ----------------------------------------------------------------------------
# Model configuration / synthetic deterministic parameters
# ----------------------------------------------------------------------------
def make_conv_cfg(nz, ngf, nc=1):
    return [
        dict(ic=nc,      oc=ngf,     k=(5, 4), s=(2, 2), p=(0, 1), bias=False),
        dict(ic=ngf,     oc=ngf,     k=(3, 3), s=(1, 1), p=(1, 1), bias=True),
        dict(ic=ngf,     oc=ngf,     k=(3, 3), s=(1, 1), p=(1, 1), bias=True),
        dict(ic=ngf,     oc=2 * ngf, k=(5, 4), s=(2, 1), p=(1, 0), bias=False),
        dict(ic=2 * ngf, oc=2 * ngf, k=(3, 3), s=(1, 1), p=(1, 1), bias=True),
        dict(ic=2 * ngf, oc=2 * ngf, k=(3, 3), s=(1, 1), p=(1, 1), bias=True),
        dict(ic=2 * ngf, oc=4 * ngf, k=(5, 4), s=(4, 1), p=(1, 1), bias=False),
        dict(ic=4 * ngf, oc=8 * ngf, k=(4, 4), s=(3, 1), p=(1, 1), bias=False),
        dict(ic=8 * ngf, oc=nz,      k=(3, 3), s=(1, 1), p=(0, 0), bias=False),
    ]


def init_params(key, nz, ngf, nc=1):
    cfg = make_conv_cfg(nz, ngf, nc)
    ln_shapes = [(ngf, 63, 8)] * 3 + [(2 * ngf, 31, 5)] * 3 + \
                [(4 * ngf, 8, 4), (8 * ngf, 3, 3)]
    convs, lns = [], []
    for c in cfg:
        key, kw_, kb_ = jax.random.split(key, 3)
        fan_in = c["ic"] * c["k"][0] * c["k"][1]
        w = jax.random.normal(kw_, (c["oc"], c["ic"], c["k"][0], c["k"][1]),
                              jnp.float32) / np.sqrt(fan_in)
        b = (0.05 * jax.random.normal(kb_, (c["oc"],), jnp.float32)
             if c["bias"] else None)
        convs.append(dict(w=w, b=b))
    for shp in ln_shapes:
        key, kg, kb = jax.random.split(key, 3)
        lns.append((1.0 + 0.1 * jax.random.normal(kg, shp, jnp.float32),
                    0.1 * jax.random.normal(kb, shp, jnp.float32)))
    key, k1, k2, k3, k4 = jax.random.split(key, 5)
    w1 = jax.random.normal(k1, (nz, 2 * nz), jnp.float32) / np.sqrt(nz)
    b1 = 0.05 * jax.random.normal(k2, (2 * nz,), jnp.float32)
    w2 = jax.random.normal(k3, (2 * nz, nz), jnp.float32) / np.sqrt(2 * nz)
    b2 = 0.05 * jax.random.normal(k4, (nz,), jnp.float32)
    return dict(cfg=cfg, convs=convs, lns=lns, mlp=(w1, b1, w2, b2))


# ----------------------------------------------------------------------------
# One-time host-side preparation of the kernel constants
# ----------------------------------------------------------------------------
def prepare_pallas_params(params, in_hw):
    """Per conv layer build:
         HSel_stack (bf16, (kh*OH_pad, H_in)) : stacked 0/1 height selection (shift/stride/pad)
         WR_cat     (bf16, (kh*LANE, LANE))   : width selection + channel mixing, lane-padded
         bias row / LN gamma,beta in kernel layout (f32, lane-padded with exact zeros)
       Activation layout: A[h, c*W + w] in a (H, 128) slab, zeros beyond the valid width.
    """
    cfg, convs, lns = params["cfg"], params["convs"], params["lns"]
    H, W = in_hw
    layers, flat = [], []
    for li, c in enumerate(cfg):
        kh, kw = c["k"]
        sh, sw = c["s"]
        ph, pw = c["p"]
        ic, oc = c["ic"], c["oc"]
        oh = (H + 2 * ph - kh) // sh + 1
        ow = (W + 2 * pw - kw) // sw + 1
        oh_pad = ((oh + 7) // 8) * 8
        w = np.asarray(convs[li]["w"], np.float32)            # (oc, ic, kh, kw)

        hsel = np.zeros((kh * oh_pad, H), np.float32)
        for i in range(kh):
            for o in range(oh):
                h = o * sh + i - ph
                if 0 <= h < H:
                    hsel[i * oh_pad + o, h] = 1.0

        wr = np.zeros((kh * LANE, LANE), np.float32)
        for i in range(kh):
            for j in range(kw):
                for o in range(ow):
                    wi = o * sw + j - pw
                    if 0 <= wi < W:
                        rows = i * LANE + np.arange(ic) * W + wi     # (ic,)
                        cols = np.arange(oc) * ow + o                # (oc,)
                        wr[rows[:, None], cols[None, :]] += w[:, :, i, j].T

        args = [jnp.asarray(hsel, jnp.bfloat16), jnp.asarray(wr, jnp.bfloat16)]
        if c["bias"]:
            brow = np.zeros((1, LANE), np.float32)
            brow[0, :oc * ow] = np.repeat(np.asarray(convs[li]["b"], np.float32), ow)
            args.append(jnp.asarray(brow))
        has_ln = li < len(lns)
        if has_ln:
            g, bt = lns[li]
            g2 = np.zeros((oh, LANE), np.float32)
            b2 = np.zeros((oh, LANE), np.float32)
            g2[:, :oc * ow] = np.transpose(np.asarray(g, np.float32),
                                           (1, 0, 2)).reshape(oh, oc * ow)
            b2[:, :oc * ow] = np.transpose(np.asarray(bt, np.float32),
                                           (1, 0, 2)).reshape(oh, oc * ow)
            args += [jnp.asarray(g2), jnp.asarray(b2)]

        layers.append(dict(kh=kh, oh=oh, oh_pad=oh_pad,
                           has_bias=bool(c["bias"]), has_ln=has_ln,
                           inv_n=1.0 / float(oh * oc * ow)))
        flat += args
        H, W = oh, ow

    # MLP head constants, laid out for VPU broadcast-multiply + reductions.
    w1, b1, w2, b2 = params["mlp"]
    nz = int(w1.shape[0])
    w1t = np.zeros((int(w1.shape[1]), LANE), np.float32)       # (2nz, LANE)
    w1t[:, :nz] = np.asarray(w1, np.float32).T
    flat += [jnp.asarray(w1t),
             jnp.asarray(np.asarray(b1, np.float32).reshape(-1, 1)),   # (2nz, 1)
             jnp.asarray(np.asarray(w2, np.float32)),                   # (2nz, nz)
             jnp.asarray(np.asarray(b2, np.float32).reshape(1, -1))]    # (1, nz)
    return layers, flat


# ----------------------------------------------------------------------------
# The single fused Pallas kernel
# ----------------------------------------------------------------------------
def make_kernel(layers):
    def kernel(*refs):
        x_ref, out_ref = refs[0], refs[-1]
        consts = refs[1:-1]

        a = x_ref[0]                         # (129, 128) f32, zero-padded lanes
        idx = 0
        saved = None
        for li, e in enumerate(layers):
            kh, oh, oh_pad = e["kh"], e["oh"], e["oh_pad"]
            hsel = consts[idx][...]          # bf16 (kh*oh_pad, H_in)
            wrc = consts[idx + 1][...]       # bf16 (kh*LANE, LANE)
            pos = idx + 2

            # stage 1: one stacked height-selection matmul (bf16 operands, f32 acc)
            s = jnp.dot(hsel, a.astype(jnp.bfloat16),
                        preferred_element_type=jnp.float32)     # (kh*oh_pad, LANE)
            # stage 2: 128-lane-aligned concat of the kh blocks + ONE matmul with WR_cat
            tcat = jnp.concatenate(
                [s[i * oh_pad: i * oh_pad + oh, :] for i in range(kh)], axis=1)
            acc = jnp.dot(tcat.astype(jnp.bfloat16), wrc,
                          preferred_element_type=jnp.float32)   # (oh, LANE), f32

            if e["has_bias"]:
                acc = acc + consts[pos][...]
                pos += 1

            if e["has_ln"]:
                g = consts[pos][...]
                bt = consts[pos + 1][...]
                pos += 2
                # one-pass LayerNorm stats over the true (C,H,W) elements (pad lanes are 0),
                # all in f32, eps = 1e-5
                inv_n = e["inv_n"]
                ssum = jnp.sum(acc, axis=(0, 1), keepdims=True)
                ssq = jnp.sum(acc * acc, axis=(0, 1), keepdims=True)
                m = ssum * inv_n
                v = ssq * inv_n - m * m
                y = jnp.maximum((acc - m) * jax.lax.rsqrt(v + 1e-5) * g + bt, 0.0)
            else:
                y = jnp.maximum(acc, 0.0)    # conv8: ReLU only
            idx = pos

            # residual wiring matching the PyTorch forward
            if li in (0, 3):
                saved = y
                a = y
            elif li in (2, 5):
                a = saved + y                # x = x + h
            else:
                a = y

        # head on the VPU/XLU: Linear -> ReLU -> Linear (no MXU round trips)
        w1t = consts[-4][...]                # (2nz, LANE)  f32, zero-padded cols
        b1c = consts[-3][...]                # (2nz, 1)
        w2 = consts[-2][...]                 # (2nz, nz)
        b2r = consts[-1][...]                # (1, nz)
        h = jnp.maximum(jnp.sum(a * w1t, axis=1, keepdims=True) + b1c, 0.0)  # (2nz,1)
        out = jnp.sum(h * w2, axis=0, keepdims=True) + b2r                   # (1, nz)
        out_ref[...] = out[None]             # (1, 1, nz)
    return kernel


def _const_index_map(ndim):
    return lambda n: (0,) * ndim


def build_forward(layers, flat_inputs, nz, N, H0, W0):
    kernel = make_kernel(layers)
    in_specs = [pl.BlockSpec((1, H0, LANE), lambda n: (n, 0, 0))]
    for arr in flat_inputs:
        in_specs.append(pl.BlockSpec(arr.shape, _const_index_map(arr.ndim)))
    call = pl.pallas_call(
        kernel,
        out_shape=jax.ShapeDtypeStruct((N, 1, nz), jnp.float32),
        grid=(N,),
        in_specs=in_specs,
        out_specs=pl.BlockSpec((1, 1, nz), lambda n: (n, 0, 0)),
        compiler_params=pltpu.CompilerParams(dimension_semantics=("parallel",)),
    )
    consts = tuple(flat_inputs)

    def fwd(x):
        x2 = x.reshape(N, H0, W0)                       # nc == 1, free reshape
        x2 = jnp.pad(x2, ((0, 0), (0, 0), (0, LANE - W0)))   # lane-pad to 128 (outside kernel)
        return call(x2, *consts).reshape(N, nz)

    return jax.jit(fwd)


# ----------------------------------------------------------------------------
# Pure-JAX f32 reference reproducing the PyTorch forward exactly
# ----------------------------------------------------------------------------
def reference_forward(x, params):
    cfg, convs, lns = params["cfg"], params["convs"], params["lns"]

    def conv(x, i):
        c, p = cfg[i], convs[i]
        y = jax.lax.conv_general_dilated(
            x, p["w"], window_strides=c["s"],
            padding=[(c["p"][0], c["p"][0]), (c["p"][1], c["p"][1])],
            dimension_numbers=("NCHW", "OIHW", "NCHW"))
        if p["b"] is not None:
            y = y + p["b"][None, :, None, None]
        return y

    def ln(x, i):
        g, bt = lns[i]
        m = jnp.mean(x, axis=(1, 2, 3), keepdims=True)
        v = jnp.mean((x - m) ** 2, axis=(1, 2, 3), keepdims=True)
        return (x - m) / jnp.sqrt(v + 1e-5) * g[None] + bt[None]

    relu = lambda t: jnp.maximum(t, 0.0)
    x = relu(ln(conv(x, 0), 0))
    h = relu(ln(conv(x, 1), 1))
    h = relu(ln(conv(h, 2), 2))
    x = x + h
    x = relu(ln(conv(x, 3), 3))
    h = relu(ln(conv(x, 4), 4))
    h = relu(ln(conv(h, 5), 5))
    x = x + h
    x = relu(ln(conv(x, 6), 6))
    x = relu(ln(conv(x, 7), 7))
    x = relu(conv(x, 8))
    x = x.reshape(x.shape[0], -1)
    w1, b1, w2, b2 = params["mlp"]
    h = relu(x @ w1 + b1)
    return h @ w2 + b2


# ----------------------------------------------------------------------------
if __name__ == "__main__":
    nz, ngf, nc = 8, 4, 1
    batch = 2
    # Spatial size (129, 16) is dictated by the module's LayerNorm shapes.
    key = jax.random.PRNGKey(0)
    key, kx = jax.random.split(key)
    x = jax.random.normal(kx, (batch, nc, 129, 16), jnp.float32)

    params = init_params(key, nz, ngf, nc)
    layers, flat_inputs = prepare_pallas_params(params, in_hw=(129, 16))
    fwd = build_forward(layers, flat_inputs, nz=nz, N=batch, H0=129, W0=16)

    out = jax.block_until_ready(fwd(x))
    ref = jax.block_until_ready(reference_forward(x, params))

    # Tolerance accounts for bf16 MXU operands (f32 accumulation, f32 LN/ReLU math).
    np.testing.assert_allclose(np.asarray(out), np.asarray(ref),
                               rtol=5e-2, atol=5e-2)
    assert out.shape == (batch, nz)
    print("KERNEL_OK")
</pallas_src>

<mosaic_0001>
module attributes {stable_mosaic.version = 11 : i64} {
  func.func @kernel(%arg0: i32, %arg1: memref<1x129x128xf32, #tpu.memory_space<vmem>>, %arg2: memref<320x129xbf16, #tpu.memory_space<vmem>>, %arg3: memref<640x128xbf16, #tpu.memory_space<vmem>>, %arg4: memref<63x128xf32, #tpu.memory_space<vmem>>, %arg5: memref<63x128xf32, #tpu.memory_space<vmem>>, %arg6: memref<192x63xbf16, #tpu.memory_space<vmem>>, %arg7: memref<384x128xbf16, #tpu.memory_space<vmem>>, %arg8: memref<1x128xf32, #tpu.memory_space<vmem>>, %arg9: memref<63x128xf32, #tpu.memory_space<vmem>>, %arg10: memref<63x128xf32, #tpu.memory_space<vmem>>, %arg11: memref<192x63xbf16, #tpu.memory_space<vmem>>, %arg12: memref<384x128xbf16, #tpu.memory_space<vmem>>, %arg13: memref<1x128xf32, #tpu.memory_space<vmem>>, %arg14: memref<63x128xf32, #tpu.memory_space<vmem>>, %arg15: memref<63x128xf32, #tpu.memory_space<vmem>>, %arg16: memref<160x63xbf16, #tpu.memory_space<vmem>>, %arg17: memref<640x128xbf16, #tpu.memory_space<vmem>>, %arg18: memref<31x128xf32, #tpu.memory_space<vmem>>, %arg19: memref<31x128xf32, #tpu.memory_space<vmem>>, %arg20: memref<96x31xbf16, #tpu.memory_space<vmem>>, %arg21: memref<384x128xbf16, #tpu.memory_space<vmem>>, %arg22: memref<1x128xf32, #tpu.memory_space<vmem>>, %arg23: memref<31x128xf32, #tpu.memory_space<vmem>>, %arg24: memref<31x128xf32, #tpu.memory_space<vmem>>, %arg25: memref<96x31xbf16, #tpu.memory_space<vmem>>, %arg26: memref<384x128xbf16, #tpu.memory_space<vmem>>, %arg27: memref<1x128xf32, #tpu.memory_space<vmem>>, %arg28: memref<31x128xf32, #tpu.memory_space<vmem>>, %arg29: memref<31x128xf32, #tpu.memory_space<vmem>>, %arg30: memref<40x31xbf16, #tpu.memory_space<vmem>>, %arg31: memref<640x128xbf16, #tpu.memory_space<vmem>>, %arg32: memref<8x128xf32, #tpu.memory_space<vmem>>, %arg33: memref<8x128xf32, #tpu.memory_space<vmem>>, %arg34: memref<32x8xbf16, #tpu.memory_space<vmem>>, %arg35: memref<512x128xbf16, #tpu.memory_space<vmem>>, %arg36: memref<3x128xf32, #tpu.memory_space<vmem>>, %arg37: memref<3x128xf32, #tpu.memory_space<vmem>>, %arg38: memref<24x3xbf16, #tpu.memory_space<vmem>>, %arg39: memref<384x128xbf16, #tpu.memory_space<vmem>>, %arg40: memref<16x128xf32, #tpu.memory_space<vmem>>, %arg41: memref<16x1xf32, #tpu.memory_space<vmem>>, %arg42: memref<16x8xf32, #tpu.memory_space<vmem>>, %arg43: memref<1x8xf32, #tpu.memory_space<vmem>>, %arg44: memref<1x1x8xf32, #tpu.memory_space<vmem>>) attributes {dimension_semantics = [#tpu.dimension_semantics<parallel>], iteration_bounds = array<i64: 2>, scalar_prefetch = 0 : i64, scratch_operands = 0 : i64, tpu.core_type = #tpu.core_type<tc>, window_params = [{transform_indices = @transform_0, window_bounds = array<i64: 1, 129, 128>}, {pipeline_mode = #tpu.pipeline_mode<synchronous>, transform_indices = @transform_1, window_bounds = array<i64: 320, 129>}, {pipeline_mode = #tpu.pipeline_mode<synchronous>, transform_indices = @transform_2, window_bounds = array<i64: 640, 128>}, {pipeline_mode = #tpu.pipeline_mode<synchronous>, transform_indices = @transform_3, window_bounds = array<i64: 63, 128>}, {pipeline_mode = #tpu.pipeline_mode<synchronous>, transform_indices = @transform_4, window_bounds = array<i64: 63, 128>}, {pipeline_mode = #tpu.pipeline_mode<synchronous>, transform_indices = @transform_5, window_bounds = array<i64: 192, 63>}, {pipeline_mode = #tpu.pipeline_mode<synchronous>, transform_indices = @transform_6, window_bounds = array<i64: 384, 128>}, {pipeline_mode = #tpu.pipeline_mode<synchronous>, transform_indices = @transform_7, window_bounds = array<i64: 1, 128>}, {pipeline_mode = #tpu.pipeline_mode<synchronous>, transform_indices = @transform_8, window_bounds = array<i64: 63, 128>}, {pipeline_mode = #tpu.pipeline_mode<synchronous>, transform_indices = @transform_9, window_bounds = array<i64: 63, 128>}, {pipeline_mode = #tpu.pipeline_mode<synchronous>, transform_indices = @transform_10, window_bounds = array<i64: 192, 63>}, {pipeline_mode = #tpu.pipeline_mode<synchronous>, transform_indices = @transform_11, window_bounds = array<i64: 384, 128>}, {pipeline_mode = #tpu.pipeline_mode<synchronous>, transform_indices = @transform_12, window_bounds = array<i64: 1, 128>}, {pipeline_mode = #tpu.pipeline_mode<synchronous>, transform_indices = @transform_13, window_bounds = array<i64: 63, 128>}, {pipeline_mode = #tpu.pipeline_mode<synchronous>, transform_indices = @transform_14, window_bounds = array<i64: 63, 128>}, {pipeline_mode = #tpu.pipeline_mode<synchronous>, transform_indices = @transform_15, window_bounds = array<i64: 160, 63>}, {pipeline_mode = #tpu.pipeline_mode<synchronous>, transform_indices = @transform_16, window_bounds = array<i64: 640, 128>}, {pipeline_mode = #tpu.pipeline_mode<synchronous>, transform_indices = @transform_17, window_bounds = array<i64: 31, 128>}, {pipeline_mode = #tpu.pipeline_mode<synchronous>, transform_indices = @transform_18, window_bounds = array<i64: 31, 128>}, {pipeline_mode = #tpu.pipeline_mode<synchronous>, transform_indices = @transform_19, window_bounds = array<i64: 96, 31>}, {pipeline_mode = #tpu.pipeline_mode<synchronous>, transform_indices = @transform_20, window_bounds = array<i64: 384, 128>}, {pipeline_mode = #tpu.pipeline_mode<synchronous>, transform_indices = @transform_21, window_bounds = array<i64: 1, 128>}, {pipeline_mode = #tpu.pipeline_mode<synchronous>, transform_indices = @transform_22, window_bounds = array<i64: 31, 128>}, {pipeline_mode = #tpu.pipeline_mode<synchronous>, transform_indices = @transform_23, window_bounds = array<i64: 31, 128>}, {pipeline_mode = #tpu.pipeline_mode<synchronous>, transform_indices = @transform_24, window_bounds = array<i64: 96, 31>}, {pipeline_mode = #tpu.pipeline_mode<synchronous>, transform_indices = @transform_25, window_bounds = array<i64: 384, 128>}, {pipeline_mode = #tpu.pipeline_mode<synchronous>, transform_indices = @transform_26, window_bounds = array<i64: 1, 128>}, {pipeline_mode = #tpu.pipeline_mode<synchronous>, transform_indices = @transform_27, window_bounds = array<i64: 31, 128>}, {pipeline_mode = #tpu.pipeline_mode<synchronous>, transform_indices = @transform_28, window_bounds = array<i64: 31, 128>}, {pipeline_mode = #tpu.pipeline_mode<synchronous>, transform_indices = @transform_29, window_bounds = array<i64: 40, 31>}, {pipeline_mode = #tpu.pipeline_mode<synchronous>, transform_indices = @transform_30, window_bounds = array<i64: 640, 128>}, {pipeline_mode = #tpu.pipeline_mode<synchronous>, transform_indices = @transform_31, window_bounds = array<i64: 8, 128>}, {pipeline_mode = #tpu.pipeline_mode<synchronous>, transform_indices = @transform_32, window_bounds = array<i64: 8, 128>}, {pipeline_mode = #tpu.pipeline_mode<synchronous>, transform_indices = @transform_33, window_bounds = array<i64: 32, 8>}, {pipeline_mode = #tpu.pipeline_mode<synchronous>, transform_indices = @transform_34, window_bounds = array<i64: 512, 128>}, {pipeline_mode = #tpu.pipeline_mode<synchronous>, transform_indices = @transform_35, window_bounds = array<i64: 3, 128>}, {pipeline_mode = #tpu.pipeline_mode<synchronous>, transform_indices = @transform_36, window_bounds = array<i64: 3, 128>}, {pipeline_mode = #tpu.pipeline_mode<synchronous>, transform_indices = @transform_37, window_bounds = array<i64: 24, 3>}, {pipeline_mode = #tpu.pipeline_mode<synchronous>, transform_indices = @transform_38, window_bounds = array<i64: 384, 128>}, {pipeline_mode = #tpu.pipeline_mode<synchronous>, transform_indices = @transform_39, window_bounds = array<i64: 16, 128>}, {pipeline_mode = #tpu.pipeline_mode<synchronous>, transform_indices = @transform_40, window_bounds = array<i64: 16, 1>}, {pipeline_mode = #tpu.pipeline_mode<synchronous>, transform_indices = @transform_41, window_bounds = array<i64: 16, 8>}, {pipeline_mode = #tpu.pipeline_mode<synchronous>, transform_indices = @transform_42, window_bounds = array<i64: 1, 8>}, {transform_indices = @transform_43, window_bounds = array<i64: 1, 1, 8>}]} {
    %c0 = arith.constant 0 : index
    %c0_0 = arith.constant 0 : index
    %c0_1 = arith.constant 0 : index
    %0 = vector.load %arg1[%c0, %c0_0, %c0_1] : memref<1x129x128xf32, #tpu.memory_space<vmem>>, vector<1x129x128xf32>
    %1 = vector.shape_cast %0 : vector<1x129x128xf32> to vector<129x128xf32>
    %c0_2 = arith.constant 0 : index
    %c0_3 = arith.constant 0 : index
    %2 = vector.load %arg2[%c0_2, %c0_3] : memref<320x129xbf16, #tpu.memory_space<vmem>>, vector<320x129xbf16>
    %c0_4 = arith.constant 0 : index
    %c0_5 = arith.constant 0 : index
    %3 = vector.load %arg3[%c0_4, %c0_5] : memref<640x128xbf16, #tpu.memory_space<vmem>>, vector<640x128xbf16>
    %4 = arith.truncf %1 : vector<129x128xf32> to vector<129x128xbf16>
    %cst = arith.constant dense<0.000000e+00> : vector<320x128xf32>
    %5 = tpu.matmul %2, %4, %cst {dimension_numbers = #tpu.dot_dimension_numbers<[1], [0], [0], [1], [0, 0, 1, 1], [], []>} : vector<320x129xbf16>, vector<129x128xbf16>, vector<320x128xf32> -> vector<320x128xf32>
    %6 = vector.extract_strided_slice %5 {offsets = [0, 0], sizes = [63, 128], strides = [1, 1]} : vector<320x128xf32> to vector<63x128xf32>
    %7 = vector.extract_strided_slice %5 {offsets = [64, 0], sizes = [63, 128], strides = [1, 1]} : vector<320x128xf32> to vector<63x128xf32>
    %8 = vector.extract_strided_slice %5 {offsets = [128, 0], sizes = [63, 128], strides = [1, 1]} : vector<320x128xf32> to vector<63x128xf32>
    %9 = vector.extract_strided_slice %5 {offsets = [192, 0], sizes = [63, 128], strides = [1, 1]} : vector<320x128xf32> to vector<63x128xf32>
    %10 = vector.extract_strided_slice %5 {offsets = [256, 0], sizes = [63, 128], strides = [1, 1]} : vector<320x128xf32> to vector<63x128xf32>
    %11 = tpu.concatenate %6, %7, %8, %9, %10 in 1 : vector<63x128xf32>, vector<63x128xf32>, vector<63x128xf32>, vector<63x128xf32>, vector<63x128xf32> -> vector<63x640xf32>
    %12 = arith.truncf %11 : vector<63x640xf32> to vector<63x640xbf16>
    %cst_6 = arith.constant dense<0.000000e+00> : vector<63x128xf32>
    %13 = tpu.matmul %12, %3, %cst_6 {dimension_numbers = #tpu.dot_dimension_numbers<[1], [0], [0], [1], [0, 0, 1, 1], [], []>} : vector<63x640xbf16>, vector<640x128xbf16>, vector<63x128xf32> -> vector<63x128xf32>
    %c0_7 = arith.constant 0 : index
    %c0_8 = arith.constant 0 : index
    %14 = vector.load %arg4[%c0_7, %c0_8] : memref<63x128xf32, #tpu.memory_space<vmem>>, vector<63x128xf32>
    %c0_9 = arith.constant 0 : index
    %c0_10 = arith.constant 0 : index
    %15 = vector.load %arg5[%c0_9, %c0_10] : memref<63x128xf32, #tpu.memory_space<vmem>>, vector<63x128xf32>
    %16 = vector.shape_cast %13 : vector<63x128xf32> to vector<1x63x128xf32>
    %cst_11 = arith.constant dense<0.000000e+00> : vector<1xf32>
    %17 = vector.multi_reduction <add>, %16, %cst_11 [1, 2] : vector<1x63x128xf32> to vector<1xf32>
    %18 = vector.shape_cast %17 : vector<1xf32> to vector<1x1x1xf32>
    %19 = vector.extract %18[0, 0, 0] : f32 from vector<1x1x1xf32>
    %20 = vector.broadcast %19 : f32 to vector<1x1xf32>
    %21 = arith.mulf %13, %13 : vector<63x128xf32>
    %22 = vector.shape_cast %21 : vector<63x128xf32> to vector<1x63x128xf32>
    %cst_12 = arith.constant dense<0.000000e+00> : vector<1xf32>
    %23 = vector.multi_reduction <add>, %22, %cst_12 [1, 2] : vector<1x63x128xf32> to vector<1xf32>
    %24 = vector.shape_cast %23 : vector<1xf32> to vector<1x1x1xf32>
    %25 = vector.extract %24[0, 0, 0] : f32 from vector<1x1x1xf32>
    %26 = vector.broadcast %25 : f32 to vector<1x1xf32>
    %cst_13 = arith.constant 4.96031775E-4 : f32
    %27 = vector.broadcast %cst_13 : f32 to vector<1x1xf32>
    %28 = arith.mulf %20, %27 : vector<1x1xf32>
    %cst_14 = arith.constant 4.96031775E-4 : f32
    %29 = vector.broadcast %cst_14 : f32 to vector<1x1xf32>
    %30 = arith.mulf %26, %29 : vector<1x1xf32>
    %31 = arith.mulf %28, %28 : vector<1x1xf32>
    %32 = arith.subf %30, %31 : vector<1x1xf32>
    %33 = vector.broadcast %28 : vector<1x1xf32> to vector<63x128xf32>
    %34 = arith.subf %13, %33 : vector<63x128xf32>
    %cst_15 = arith.constant 9.99999974E-6 : f32
    %35 = vector.broadcast %cst_15 : f32 to vector<1x1xf32>
    %36 = arith.addf %32, %35 : vector<1x1xf32>
    %37 = math.rsqrt %36 : vector<1x1xf32>
    %38 = vector.broadcast %37 : vector<1x1xf32> to vector<63x128xf32>
    %39 = arith.mulf %34, %38 : vector<63x128xf32>
    %40 = arith.mulf %39, %14 : vector<63x128xf32>
    %41 = arith.addf %40, %15 : vector<63x128xf32>
    %cst_16 = arith.constant 0.000000e+00 : f32
    %42 = vector.broadcast %cst_16 : f32 to vector<63x128xf32>
    %43 = arith.maximumf %41, %42 : vector<63x128xf32>
    %c0_17 = arith.constant 0 : index
    %c0_18 = arith.constant 0 : index
    %44 = vector.load %arg6[%c0_17, %c0_18] : memref<192x63xbf16, #tpu.memory_space<vmem>>, vector<192x63xbf16>
    %c0_19 = arith.constant 0 : index
    %c0_20 = arith.constant 0 : index
    %45 = vector.load %arg7[%c0_19, %c0_20] : memref<384x128xbf16, #tpu.memory_space<vmem>>, vector<384x128xbf16>
    %46 = arith.truncf %43 : vector<63x128xf32> to vector<63x128xbf16>
    %cst_21 = arith.constant dense<0.000000e+00> : vector<192x128xf32>
    %47 = tpu.matmul %44, %46, %cst_21 {dimension_numbers = #tpu.dot_dimension_numbers<[1], [0], [0], [1], [0, 0, 1, 1], [], []>} : vector<192x63xbf16>, vector<63x128xbf16>, vector<192x128xf32> -> vector<192x128xf32>
    %48 = vector.extract_strided_slice %47 {offsets = [0, 0], sizes = [63, 128], strides = [1, 1]} : vector<192x128xf32> to vector<63x128xf32>
    %49 = vector.extract_strided_slice %47 {offsets = [64, 0], sizes = [63, 128], strides = [1, 1]} : vector<192x128xf32> to vector<63x128xf32>
    %50 = vector.extract_strided_slice %47 {offsets = [128, 0], sizes = [63, 128], strides = [1, 1]} : vector<192x128xf32> to vector<63x128xf32>
    %51 = tpu.concatenate %48, %49, %50 in 1 : vector<63x128xf32>, vector<63x128xf32>, vector<63x128xf32> -> vector<63x384xf32>
    %52 = arith.truncf %51 : vector<63x384xf32> to vector<63x384xbf16>
    %cst_22 = arith.constant dense<0.000000e+00> : vector<63x128xf32>
    %53 = tpu.matmul %52, %45, %cst_22 {dimension_numbers = #tpu.dot_dimension_numbers<[1], [0], [0], [1], [0, 0, 1, 1], [], []>} : vector<63x384xbf16>, vector<384x128xbf16>, vector<63x128xf32> -> vector<63x128xf32>
    %c0_23 = arith.constant 0 : index
    %c0_24 = arith.constant 0 : index
    %54 = vector.load %arg8[%c0_23, %c0_24] : memref<1x128xf32, #tpu.memory_space<vmem>>, vector<1x128xf32>
    %55 = vector.broadcast %54 : vector<1x128xf32> to vector<63x128xf32>
    %56 = arith.addf %53, %55 : vector<63x128xf32>
    %c0_25 = arith.constant 0 : index
    %c0_26 = arith.constant 0 : index
    %57 = vector.load %arg9[%c0_25, %c0_26] : memref<63x128xf32, #tpu.memory_space<vmem>>, vector<63x128xf32>
    %c0_27 = arith.constant 0 : index
    %c0_28 = arith.constant 0 : index
    %58 = vector.load %arg10[%c0_27, %c0_28] : memref<63x128xf32, #tpu.memory_space<vmem>>, vector<63x128xf32>
    %59 = vector.shape_cast %56 : vector<63x128xf32> to vector<1x63x128xf32>
    %cst_29 = arith.constant dense<0.000000e+00> : vector<1xf32>
    %60 = vector.multi_reduction <add>, %59, %cst_29 [1, 2] : vector<1x63x128xf32> to vector<1xf32>
    %61 = vector.shape_cast %60 : vector<1xf32> to vector<1x1x1xf32>
    %62 = vector.extract %61[0, 0, 0] : f32 from vector<1x1x1xf32>
    %63 = vector.broadcast %62 : f32 to vector<1x1xf32>
    %64 = arith.mulf %56, %56 : vector<63x128xf32>
    %65 = vector.shape_cast %64 : vector<63x128xf32> to vector<1x63x128xf32>
    %cst_30 = arith.constant dense<0.000000e+00> : vector<1xf32>
    %66 = vector.multi_reduction <add>, %65, %cst_30 [1, 2] : vector<1x63x128xf32> to vector<1xf32>
    %67 = vector.shape_cast %66 : vector<1xf32> to vector<1x1x1xf32>
    %68 = vector.extract %67[0, 0, 0] : f32 from vector<1x1x1xf32>
    %69 = vector.broadcast %68 : f32 to vector<1x1xf32>
    %cst_31 = arith.constant 4.96031775E-4 : f32
    %70 = vector.broadcast %cst_31 : f32 to vector<1x1xf32>
    %71 = arith.mulf %63, %70 : vector<1x1xf32>
    %cst_32 = arith.constant 4.96031775E-4 : f32
    %72 = vector.broadcast %cst_32 : f32 to vector<1x1xf32>
    %73 = arith.mulf %69, %72 : vector<1x1xf32>
    %74 = arith.mulf %71, %71 : vector<1x1xf32>
    %75 = arith.subf %73, %74 : vector<1x1xf32>
    %76 = vector.broadcast %71 : vector<1x1xf32> to vector<63x128xf32>
    %77 = arith.subf %56, %76 : vector<63x128xf32>
    %cst_33 = arith.constant 9.99999974E-6 : f32
    %78 = vector.broadcast %cst_33 : f32 to vector<1x1xf32>
    %79 = arith.addf %75, %78 : vector<1x1xf32>
    %80 = math.rsqrt %79 : vector<1x1xf32>
    %81 = vector.broadcast %80 : vector<1x1xf32> to vector<63x128xf32>
    %82 = arith.mulf %77, %81 : vector<63x128xf32>
    %83 = arith.mulf %82, %57 : vector<63x128xf32>
    %84 = arith.addf %83, %58 : vector<63x128xf32>
    %cst_34 = arith.constant 0.000000e+00 : f32
    %85 = vector.broadcast %cst_34 : f32 to vector<63x128xf32>
    %86 = arith.maximumf %84, %85 : vector<63x128xf32>
    %c0_35 = arith.constant 0 : index
    %c0_36 = arith.constant 0 : index
    %87 = vector.load %arg11[%c0_35, %c0_36] : memref<192x63xbf16, #tpu.memory_space<vmem>>, vector<192x63xbf16>
    %c0_37 = arith.constant 0 : index
    %c0_38 = arith.constant 0 : index
    %88 = vector.load %arg12[%c0_37, %c0_38] : memref<384x128xbf16, #tpu.memory_space<vmem>>, vector<384x128xbf16>
    %89 = arith.truncf %86 : vector<63x128xf32> to vector<63x128xbf16>
    %cst_39 = arith.constant dense<0.000000e+00> : vector<192x128xf32>
    %90 = tpu.matmul %87, %89, %cst_39 {dimension_numbers = #tpu.dot_dimension_numbers<[1], [0], [0], [1], [0, 0, 1, 1], [], []>} : vector<192x63xbf16>, vector<63x128xbf16>, vector<192x128xf32> -> vector<192x128xf32>
    %91 = vector.extract_strided_slice %90 {offsets = [0, 0], sizes = [63, 128], strides = [1, 1]} : vector<192x128xf32> to vector<63x128xf32>
    %92 = vector.extract_strided_slice %90 {offsets = [64, 0], sizes = [63, 128], strides = [1, 1]} : vector<192x128xf32> to vector<63x128xf32>
    %93 = vector.extract_strided_slice %90 {offsets = [128, 0], sizes = [63, 128], strides = [1, 1]} : vector<192x128xf32> to vector<63x128xf32>
    %94 = tpu.concatenate %91, %92, %93 in 1 : vector<63x128xf32>, vector<63x128xf32>, vector<63x128xf32> -> vector<63x384xf32>
    %95 = arith.truncf %94 : vector<63x384xf32> to vector<63x384xbf16>
    %cst_40 = arith.constant dense<0.000000e+00> : vector<63x128xf32>
    %96 = tpu.matmul %95, %88, %cst_40 {dimension_numbers = #tpu.dot_dimension_numbers<[1], [0], [0], [1], [0, 0, 1, 1], [], []>} : vector<63x384xbf16>, vector<384x128xbf16>, vector<63x128xf32> -> vector<63x128xf32>
    %c0_41 = arith.constant 0 : index
    %c0_42 = arith.constant 0 : index
    %97 = vector.load %arg13[%c0_41, %c0_42] : memref<1x128xf32, #tpu.memory_space<vmem>>, vector<1x128xf32>
    %98 = vector.broadcast %97 : vector<1x128xf32> to vector<63x128xf32>
    %99 = arith.addf %96, %98 : vector<63x128xf32>
    %c0_43 = arith.constant 0 : index
    %c0_44 = arith.constant 0 : index
    %100 = vector.load %arg14[%c0_43, %c0_44] : memref<63x128xf32, #tpu.memory_space<vmem>>, vector<63x128xf32>
    %c0_45 = arith.constant 0 : index
    %c0_46 = arith.constant 0 : index
    %101 = vector.load %arg15[%c0_45, %c0_46] : memref<63x128xf32, #tpu.memory_space<vmem>>, vector<63x128xf32>
    %102 = vector.shape_cast %99 : vector<63x128xf32> to vector<1x63x128xf32>
    %cst_47 = arith.constant dense<0.000000e+00> : vector<1xf32>
    %103 = vector.multi_reduction <add>, %102, %cst_47 [1, 2] : vector<1x63x128xf32> to vector<1xf32>
    %104 = vector.shape_cast %103 : vector<1xf32> to vector<1x1x1xf32>
    %105 = vector.extract %104[0, 0, 0] : f32 from vector<1x1x1xf32>
    %106 = vector.broadcast %105 : f32 to vector<1x1xf32>
    %107 = arith.mulf %99, %99 : vector<63x128xf32>
    %108 = vector.shape_cast %107 : vector<63x128xf32> to vector<1x63x128xf32>
    %cst_48 = arith.constant dense<0.000000e+00> : vector<1xf32>
    %109 = vector.multi_reduction <add>, %108, %cst_48 [1, 2] : vector<1x63x128xf32> to vector<1xf32>
    %110 = vector.shape_cast %109 : vector<1xf32> to vector<1x1x1xf32>
    %111 = vector.extract %110[0, 0, 0] : f32 from vector<1x1x1xf32>
    %112 = vector.broadcast %111 : f32 to vector<1x1xf32>
    %cst_49 = arith.constant 4.96031775E-4 : f32
    %113 = vector.broadcast %cst_49 : f32 to vector<1x1xf32>
    %114 = arith.mulf %106, %113 : vector<1x1xf32>
    %cst_50 = arith.constant 4.96031775E-4 : f32
    %115 = vector.broadcast %cst_50 : f32 to vector<1x1xf32>
    %116 = arith.mulf %112, %115 : vector<1x1xf32>
    %117 = arith.mulf %114, %114 : vector<1x1xf32>
    %118 = arith.subf %116, %117 : vector<1x1xf32>
    %119 = vector.broadcast %114 : vector<1x1xf32> to vector<63x128xf32>
    %120 = arith.subf %99, %119 : vector<63x128xf32>
    %cst_51 = arith.constant 9.99999974E-6 : f32
    %121 = vector.broadcast %cst_51 : f32 to vector<1x1xf32>
    %122 = arith.addf %118, %121 : vector<1x1xf32>
    %123 = math.rsqrt %122 : vector<1x1xf32>
    %124 = vector.broadcast %123 : vector<1x1xf32> to vector<63x128xf32>
    %125 = arith.mulf %120, %124 : vector<63x128xf32>
    %126 = arith.mulf %125, %100 : vector<63x128xf32>
    %127 = arith.addf %126, %101 : vector<63x128xf32>
    %cst_52 = arith.constant 0.000000e+00 : f32
    %128 = vector.broadcast %cst_52 : f32 to vector<63x128xf32>
    %129 = arith.maximumf %127, %128 : vector<63x128xf32>
    %130 = arith.addf %43, %129 : vector<63x128xf32>
    %c0_53 = arith.constant 0 : index
    %c0_54 = arith.constant 0 : index
    %131 = vector.load %arg16[%c0_53, %c0_54] : memref<160x63xbf16, #tpu.memory_space<vmem>>, vector<160x63xbf16>
    %c0_55 = arith.constant 0 : index
    %c0_56 = arith.constant 0 : index
    %132 = vector.load %arg17[%c0_55, %c0_56] : memref<640x128xbf16, #tpu.memory_space<vmem>>, vector<640x128xbf16>
    %133 = arith.truncf %130 : vector<63x128xf32> to vector<63x128xbf16>
    %cst_57 = arith.constant dense<0.000000e+00> : vector<160x128xf32>
    %134 = tpu.matmul %131, %133, %cst_57 {dimension_numbers = #tpu.dot_dimension_numbers<[1], [0], [0], [1], [0, 0, 1, 1], [], []>} : vector<160x63xbf16>, vector<63x128xbf16>, vector<160x128xf32> -> vector<160x128xf32>
    %135 = vector.extract_strided_slice %134 {offsets = [0, 0], sizes = [31, 128], strides = [1, 1]} : vector<160x128xf32> to vector<31x128xf32>
    %136 = vector.extract_strided_slice %134 {offsets = [32, 0], sizes = [31, 128], strides = [1, 1]} : vector<160x128xf32> to vector<31x128xf32>
    %137 = vector.extract_strided_slice %134 {offsets = [64, 0], sizes = [31, 128], strides = [1, 1]} : vector<160x128xf32> to vector<31x128xf32>
    %138 = vector.extract_strided_slice %134 {offsets = [96, 0], sizes = [31, 128], strides = [1, 1]} : vector<160x128xf32> to vector<31x128xf32>
    %139 = vector.extract_strided_slice %134 {offsets = [128, 0], sizes = [31, 128], strides = [1, 1]} : vector<160x128xf32> to vector<31x128xf32>
    %140 = tpu.concatenate %135, %136, %137, %138, %139 in 1 : vector<31x128xf32>, vector<31x128xf32>, vector<31x128xf32>, vector<31x128xf32>, vector<31x128xf32> -> vector<31x640xf32>
    %141 = arith.truncf %140 : vector<31x640xf32> to vector<31x640xbf16>
    %cst_58 = arith.constant dense<0.000000e+00> : vector<31x128xf32>
    %142 = tpu.matmul %141, %132, %cst_58 {dimension_numbers = #tpu.dot_dimension_numbers<[1], [0], [0], [1], [0, 0, 1, 1], [], []>} : vector<31x640xbf16>, vector<640x128xbf16>, vector<31x128xf32> -> vector<31x128xf32>
    %c0_59 = arith.constant 0 : index
    %c0_60 = arith.constant 0 : index
    %143 = vector.load %arg18[%c0_59, %c0_60] : memref<31x128xf32, #tpu.memory_space<vmem>>, vector<31x128xf32>
    %c0_61 = arith.constant 0 : index
    %c0_62 = arith.constant 0 : index
    %144 = vector.load %arg19[%c0_61, %c0_62] : memref<31x128xf32, #tpu.memory_space<vmem>>, vector<31x128xf32>
    %145 = vector.shape_cast %142 : vector<31x128xf32> to vector<1x31x128xf32>
    %cst_63 = arith.constant dense<0.000000e+00> : vector<1xf32>
    %146 = vector.multi_reduction <add>, %145, %cst_63 [1, 2] : vector<1x31x128xf32> to vector<1xf32>
    %147 = vector.shape_cast %146 : vector<1xf32> to vector<1x1x1xf32>
    %148 = vector.extract %147[0, 0, 0] : f32 from vector<1x1x1xf32>
    %149 = vector.broadcast %148 : f32 to vector<1x1xf32>
    %150 = arith.mulf %142, %142 : vector<31x128xf32>
    %151 = vector.shape_cast %150 : vector<31x128xf32> to vector<1x31x128xf32>
    %cst_64 = arith.constant dense<0.000000e+00> : vector<1xf32>
    %152 = vector.multi_reduction <add>, %151, %cst_64 [1, 2] : vector<1x31x128xf32> to vector<1xf32>
    %153 = vector.shape_cast %152 : vector<1xf32> to vector<1x1x1xf32>
    %154 = vector.extract %153[0, 0, 0] : f32 from vector<1x1x1xf32>
    %155 = vector.broadcast %154 : f32 to vector<1x1xf32>
    %cst_65 = arith.constant 8.06451601E-4 : f32
    %156 = vector.broadcast %cst_65 : f32 to vector<1x1xf32>
    %157 = arith.mulf %149, %156 : vector<1x1xf32>
    %cst_66 = arith.constant 8.06451601E-4 : f32
    %158 = vector.broadcast %cst_66 : f32 to vector<1x1xf32>
    %159 = arith.mulf %155, %158 : vector<1x1xf32>
    %160 = arith.mulf %157, %157 : vector<1x1xf32>
    %161 = arith.subf %159, %160 : vector<1x1xf32>
    %162 = vector.broadcast %157 : vector<1x1xf32> to vector<31x128xf32>
    %163 = arith.subf %142, %162 : vector<31x128xf32>
    %cst_67 = arith.constant 9.99999974E-6 : f32
    %164 = vector.broadcast %cst_67 : f32 to vector<1x1xf32>
    %165 = arith.addf %161, %164 : vector<1x1xf32>
    %166 = math.rsqrt %165 : vector<1x1xf32>
    %167 = vector.broadcast %166 : vector<1x1xf32> to vector<31x128xf32>
    %168 = arith.mulf %163, %167 : vector<31x128xf32>
    %169 = arith.mulf %168, %143 : vector<31x128xf32>
    %170 = arith.addf %169, %144 : vector<31x128xf32>
    %cst_68 = arith.constant 0.000000e+00 : f32
    %171 = vector.broadcast %cst_68 : f32 to vector<31x128xf32>
    %172 = arith.maximumf %170, %171 : vector<31x128xf32>
    %c0_69 = arith.constant 0 : index
    %c0_70 = arith.constant 0 : index
    %173 = vector.load %arg20[%c0_69, %c0_70] : memref<96x31xbf16, #tpu.memory_space<vmem>>, vector<96x31xbf16>
    %c0_71 = arith.constant 0 : index
    %c0_72 = arith.constant 0 : index
    %174 = vector.load %arg21[%c0_71, %c0_72] : memref<384x128xbf16, #tpu.memory_space<vmem>>, vector<384x128xbf16>
    %175 = arith.truncf %172 : vector<31x128xf32> to vector<31x128xbf16>
    %cst_73 = arith.constant dense<0.000000e+00> : vector<96x128xf32>
    %176 = tpu.matmul %173, %175, %cst_73 {dimension_numbers = #tpu.dot_dimension_numbers<[1], [0], [0], [1], [0, 0, 1, 1], [], []>} : vector<96x31xbf16>, vector<31x128xbf16>, vector<96x128xf32> -> vector<96x128xf32>
    %177 = vector.extract_strided_slice %176 {offsets = [0, 0], sizes = [31, 128], strides = [1, 1]} : vector<96x128xf32> to vector<31x128xf32>
    %178 = vector.extract_strided_slice %176 {offsets = [32, 0], sizes = [31, 128], strides = [1, 1]} : vector<96x128xf32> to vector<31x128xf32>
    %179 = vector.extract_strided_slice %176 {offsets = [64, 0], sizes = [31, 128], strides = [1, 1]} : vector<96x128xf32> to vector<31x128xf32>
    %180 = tpu.concatenate %177, %178, %179 in 1 : vector<31x128xf32>, vector<31x128xf32>, vector<31x128xf32> -> vector<31x384xf32>
    %181 = arith.truncf %180 : vector<31x384xf32> to vector<31x384xbf16>
    %cst_74 = arith.constant dense<0.000000e+00> : vector<31x128xf32>
    %182 = tpu.matmul %181, %174, %cst_74 {dimension_numbers = #tpu.dot_dimension_numbers<[1], [0], [0], [1], [0, 0, 1, 1], [], []>} : vector<31x384xbf16>, vector<384x128xbf16>, vector<31x128xf32> -> vector<31x128xf32>
    %c0_75 = arith.constant 0 : index
    %c0_76 = arith.constant 0 : index
    %183 = vector.load %arg22[%c0_75, %c0_76] : memref<1x128xf32, #tpu.memory_space<vmem>>, vector<1x128xf32>
    %184 = vector.broadcast %183 : vector<1x128xf32> to vector<31x128xf32>
    %185 = arith.addf %182, %184 : vector<31x128xf32>
    %c0_77 = arith.constant 0 : index
    %c0_78 = arith.constant 0 : index
    %186 = vector.load %arg23[%c0_77, %c0_78] : memref<31x128xf32, #tpu.memory_space<vmem>>, vector<31x128xf32>
    %c0_79 = arith.constant 0 : index
    %c0_80 = arith.constant 0 : index
    %187 = vector.load %arg24[%c0_79, %c0_80] : memref<31x128xf32, #tpu.memory_space<vmem>>, vector<31x128xf32>
    %188 = vector.shape_cast %185 : vector<31x128xf32> to vector<1x31x128xf32>
    %cst_81 = arith.constant dense<0.000000e+00> : vector<1xf32>
    %189 = vector.multi_reduction <add>, %188, %cst_81 [1, 2] : vector<1x31x128xf32> to vector<1xf32>
    %190 = vector.shape_cast %189 : vector<1xf32> to vector<1x1x1xf32>
    %191 = vector.extract %190[0, 0, 0] : f32 from vector<1x1x1xf32>
    %192 = vector.broadcast %191 : f32 to vector<1x1xf32>
    %193 = arith.mulf %185, %185 : vector<31x128xf32>
    %194 = vector.shape_cast %193 : vector<31x128xf32> to vector<1x31x128xf32>
    %cst_82 = arith.constant dense<0.000000e+00> : vector<1xf32>
    %195 = vector.multi_reduction <add>, %194, %cst_82 [1, 2] : vector<1x31x128xf32> to vector<1xf32>
    %196 = vector.shape_cast %195 : vector<1xf32> to vector<1x1x1xf32>
    %197 = vector.extract %196[0, 0, 0] : f32 from vector<1x1x1xf32>
    %198 = vector.broadcast %197 : f32 to vector<1x1xf32>
    %cst_83 = arith.constant 8.06451601E-4 : f32
    %199 = vector.broadcast %cst_83 : f32 to vector<1x1xf32>
    %200 = arith.mulf %192, %199 : vector<1x1xf32>
    %cst_84 = arith.constant 8.06451601E-4 : f32
    %201 = vector.broadcast %cst_84 : f32 to vector<1x1xf32>
    %202 = arith.mulf %198, %201 : vector<1x1xf32>
    %203 = arith.mulf %200, %200 : vector<1x1xf32>
    %204 = arith.subf %202, %203 : vector<1x1xf32>
    %205 = vector.broadcast %200 : vector<1x1xf32> to vector<31x128xf32>
    %206 = arith.subf %185, %205 : vector<31x128xf32>
    %cst_85 = arith.constant 9.99999974E-6 : f32
    %207 = vector.broadcast %cst_85 : f32 to vector<1x1xf32>
    %208 = arith.addf %204, %207 : vector<1x1xf32>
    %209 = math.rsqrt %208 : vector<1x1xf32>
    %210 = vector.broadcast %209 : vector<1x1xf32> to vector<31x128xf32>
    %211 = arith.mulf %206, %210 : vector<31x128xf32>
    %212 = arith.mulf %211, %186 : vector<31x128xf32>
    %213 = arith.addf %212, %187 : vector<31x128xf32>
    %cst_86 = arith.constant 0.000000e+00 : f32
    %214 = vector.broadcast %cst_86 : f32 to vector<31x128xf32>
    %215 = arith.maximumf %213, %214 : vector<31x128xf32>
    %c0_87 = arith.constant 0 : index
    %c0_88 = arith.constant 0 : index
    %216 = vector.load %arg25[%c0_87, %c0_88] : memref<96x31xbf16, #tpu.memory_space<vmem>>, vector<96x31xbf16>
    %c0_89 = arith.constant 0 : index
    %c0_90 = arith.constant 0 : index
    %217 = vector.load %arg26[%c0_89, %c0_90] : memref<384x128xbf16, #tpu.memory_space<vmem>>, vector<384x128xbf16>
    %218 = arith.truncf %215 : vector<31x128xf32> to vector<31x128xbf16>
    %cst_91 = arith.constant dense<0.000000e+00> : vector<96x128xf32>
    %219 = tpu.matmul %216, %218, %cst_91 {dimension_numbers = #tpu.dot_dimension_numbers<[1], [0], [0], [1], [0, 0, 1, 1], [], []>} : vector<96x31xbf16>, vector<31x128xbf16>, vector<96x128xf32> -> vector<96x128xf32>
    %220 = vector.extract_strided_slice %219 {offsets = [0, 0], sizes = [31, 128], strides = [1, 1]} : vector<96x128xf32> to vector<31x128xf32>
    %221 = vector.extract_strided_slice %219 {offsets = [32, 0], sizes = [31, 128], strides = [1, 1]} : vector<96x128xf32> to vector<31x128xf32>
    %222 = vector.extract_strided_slice %219 {offsets = [64, 0], sizes = [31, 128], strides = [1, 1]} : vector<96x128xf32> to vector<31x128xf32>
    %223 = tpu.concatenate %220, %221, %222 in 1 : vector<31x128xf32>, vector<31x128xf32>, vector<31x128xf32> -> vector<31x384xf32>
    %224 = arith.truncf %223 : vector<31x384xf32> to vector<31x384xbf16>
    %cst_92 = arith.constant dense<0.000000e+00> : vector<31x128xf32>
    %225 = tpu.matmul %224, %217, %cst_92 {dimension_numbers = #tpu.dot_dimension_numbers<[1], [0], [0], [1], [0, 0, 1, 1], [], []>} : vector<31x384xbf16>, vector<384x128xbf16>, vector<31x128xf32> -> vector<31x128xf32>
    %c0_93 = arith.constant 0 : index
    %c0_94 = arith.constant 0 : index
    %226 = vector.load %arg27[%c0_93, %c0_94] : memref<1x128xf32, #tpu.memory_space<vmem>>, vector<1x128xf32>
    %227 = vector.broadcast %226 : vector<1x128xf32> to vector<31x128xf32>
    %228 = arith.addf %225, %227 : vector<31x128xf32>
    %c0_95 = arith.constant 0 : index
    %c0_96 = arith.constant 0 : index
    %229 = vector.load %arg28[%c0_95, %c0_96] : memref<31x128xf32, #tpu.memory_space<vmem>>, vector<31x128xf32>
    %c0_97 = arith.constant 0 : index
    %c0_98 = arith.constant 0 : index
    %230 = vector.load %arg29[%c0_97, %c0_98] : memref<31x128xf32, #tpu.memory_space<vmem>>, vector<31x128xf32>
    %231 = vector.shape_cast %228 : vector<31x128xf32> to vector<1x31x128xf32>
    %cst_99 = arith.constant dense<0.000000e+00> : vector<1xf32>
    %232 = vector.multi_reduction <add>, %231, %cst_99 [1, 2] : vector<1x31x128xf32> to vector<1xf32>
    %233 = vector.shape_cast %232 : vector<1xf32> to vector<1x1x1xf32>
    %234 = vector.extract %233[0, 0, 0] : f32 from vector<1x1x1xf32>
    %235 = vector.broadcast %234 : f32 to vector<1x1xf32>
    %236 = arith.mulf %228, %228 : vector<31x128xf32>
    %237 = vector.shape_cast %236 : vector<31x128xf32> to vector<1x31x128xf32>
    %cst_100 = arith.constant dense<0.000000e+00> : vector<1xf32>
    %238 = vector.multi_reduction <add>, %237, %cst_100 [1, 2] : vector<1x31x128xf32> to vector<1xf32>
    %239 = vector.shape_cast %238 : vector<1xf32> to vector<1x1x1xf32>
    %240 = vector.extract %239[0, 0, 0] : f32 from vector<1x1x1xf32>
    %241 = vector.broadcast %240 : f32 to vector<1x1xf32>
    %cst_101 = arith.constant 8.06451601E-4 : f32
    %242 = vector.broadcast %cst_101 : f32 to vector<1x1xf32>
    %243 = arith.mulf %235, %242 : vector<1x1xf32>
    %cst_102 = arith.constant 8.06451601E-4 : f32
    %244 = vector.broadcast %cst_102 : f32 to vector<1x1xf32>
    %245 = arith.mulf %241, %244 : vector<1x1xf32>
    %246 = arith.mulf %243, %243 : vector<1x1xf32>
    %247 = arith.subf %245, %246 : vector<1x1xf32>
    %248 = vector.broadcast %243 : vector<1x1xf32> to vector<31x128xf32>
    %249 = arith.subf %228, %248 : vector<31x128xf32>
    %cst_103 = arith.constant 9.99999974E-6 : f32
    %250 = vector.broadcast %cst_103 : f32 to vector<1x1xf32>
    %251 = arith.addf %247, %250 : vector<1x1xf32>
    %252 = math.rsqrt %251 : vector<1x1xf32>
    %253 = vector.broadcast %252 : vector<1x1xf32> to vector<31x128xf32>
    %254 = arith.mulf %249, %253 : vector<31x128xf32>
    %255 = arith.mulf %254, %229 : vector<31x128xf32>
    %256 = arith.addf %255, %230 : vector<31x128xf32>
    %cst_104 = arith.constant 0.000000e+00 : f32
    %257 = vector.broadcast %cst_104 : f32 to vector<31x128xf32>
    %258 = arith.maximumf %256, %257 : vector<31x128xf32>
    %259 = arith.addf %172, %258 : vector<31x128xf32>
    %c0_105 = arith.constant 0 : index
    %c0_106 = arith.constant 0 : index
    %260 = vector.load %arg30[%c0_105, %c0_106] : memref<40x31xbf16, #tpu.memory_space<vmem>>, vector<40x31xbf16>
    %c0_107 = arith.constant 0 : index
    %c0_108 = arith.constant 0 : index
    %261 = vector.load %arg31[%c0_107, %c0_108] : memref<640x128xbf16, #tpu.memory_space<vmem>>, vector<640x128xbf16>
    %262 = arith.truncf %259 : vector<31x128xf32> to vector<31x128xbf16>
    %cst_109 = arith.constant dense<0.000000e+00> : vector<40x128xf32>
    %263 = tpu.matmul %260, %262, %cst_109 {dimension_numbers = #tpu.dot_dimension_numbers<[1], [0], [0], [1], [0, 0, 1, 1], [], []>} : vector<40x31xbf16>, vector<31x128xbf16>, vector<40x128xf32> -> vector<40x128xf32>
    %264 = vector.extract_strided_slice %263 {offsets = [0, 0], sizes = [8, 128], strides = [1, 1]} : vector<40x128xf32> to vector<8x128xf32>
    %265 = vector.extract_strided_slice %263 {offsets = [8, 0], sizes = [8, 128], strides = [1, 1]} : vector<40x128xf32> to vector<8x128xf32>
    %266 = vector.extract_strided_slice %263 {offsets = [16, 0], sizes = [8, 128], strides = [1, 1]} : vector<40x128xf32> to vector<8x128xf32>
    %267 = vector.extract_strided_slice %263 {offsets = [24, 0], sizes = [8, 128], strides = [1, 1]} : vector<40x128xf32> to vector<8x128xf32>
    %268 = vector.extract_strided_slice %263 {offsets = [32, 0], sizes = [8, 128], strides = [1, 1]} : vector<40x128xf32> to vector<8x128xf32>
    %269 = tpu.concatenate %264, %265, %266, %267, %268 in 1 : vector<8x128xf32>, vector<8x128xf32>, vector<8x128xf32>, vector<8x128xf32>, vector<8x128xf32> -> vector<8x640xf32>
    %270 = arith.truncf %269 : vector<8x640xf32> to vector<8x640xbf16>
    %cst_110 = arith.constant dense<0.000000e+00> : vector<8x128xf32>
    %271 = tpu.matmul %270, %261, %cst_110 {dimension_numbers = #tpu.dot_dimension_numbers<[1], [0], [0], [1], [0, 0, 1, 1], [], []>} : vector<8x640xbf16>, vector<640x128xbf16>, vector<8x128xf32> -> vector<8x128xf32>
    %c0_111 = arith.constant 0 : index
    %c0_112 = arith.constant 0 : index
    %272 = vector.load %arg32[%c0_111, %c0_112] : memref<8x128xf32, #tpu.memory_space<vmem>>, vector<8x128xf32>
    %c0_113 = arith.constant 0 : index
    %c0_114 = arith.constant 0 : index
    %273 = vector.load %arg33[%c0_113, %c0_114] : memref<8x128xf32, #tpu.memory_space<vmem>>, vector<8x128xf32>
    %274 = vector.shape_cast %271 : vector<8x128xf32> to vector<1x8x128xf32>
    %cst_115 = arith.constant dense<0.000000e+00> : vector<1xf32>
    %275 = vector.multi_reduction <add>, %274, %cst_115 [1, 2] : vector<1x8x128xf32> to vector<1xf32>
    %276 = vector.shape_cast %275 : vector<1xf32> to vector<1x1x1xf32>
    %277 = vector.extract %276[0, 0, 0] : f32 from vector<1x1x1xf32>
    %278 = vector.broadcast %277 : f32 to vector<1x1xf32>
    %279 = arith.mulf %271, %271 : vector<8x128xf32>
    %280 = vector.shape_cast %279 : vector<8x128xf32> to vector<1x8x128xf32>
    %cst_116 = arith.constant dense<0.000000e+00> : vector<1xf32>
    %281 = vector.multi_reduction <add>, %280, %cst_116 [1, 2] : vector<1x8x128xf32> to vector<1xf32>
    %282 = vector.shape_cast %281 : vector<1xf32> to vector<1x1x1xf32>
    %283 = vector.extract %282[0, 0, 0] : f32 from vector<1x1x1xf32>
    %284 = vector.broadcast %283 : f32 to vector<1x1xf32>
    %cst_117 = arith.constant 0.001953125 : f32
    %285 = vector.broadcast %cst_117 : f32 to vector<1x1xf32>
    %286 = arith.mulf %278, %285 : vector<1x1xf32>
    %cst_118 = arith.constant 0.001953125 : f32
    %287 = vector.broadcast %cst_118 : f32 to vector<1x1xf32>
    %288 = arith.mulf %284, %287 : vector<1x1xf32>
    %289 = arith.mulf %286, %286 : vector<1x1xf32>
    %290 = arith.subf %288, %289 : vector<1x1xf32>
    %291 = vector.broadcast %286 : vector<1x1xf32> to vector<8x128xf32>
    %292 = arith.subf %271, %291 : vector<8x128xf32>
    %cst_119 = arith.constant 9.99999974E-6 : f32
    %293 = vector.broadcast %cst_119 : f32 to vector<1x1xf32>
    %294 = arith.addf %290, %293 : vector<1x1xf32>
    %295 = math.rsqrt %294 : vector<1x1xf32>
    %296 = vector.broadcast %295 : vector<1x1xf32> to vector<8x128xf32>
    %297 = arith.mulf %292, %296 : vector<8x128xf32>
    %298 = arith.mulf %297, %272 : vector<8x128xf32>
    %299 = arith.addf %298, %273 : vector<8x128xf32>
    %cst_120 = arith.constant 0.000000e+00 : f32
    %300 = vector.broadcast %cst_120 : f32 to vector<8x128xf32>
    %301 = arith.maximumf %299, %300 : vector<8x128xf32>
    %c0_121 = arith.constant 0 : index
    %c0_122 = arith.constant 0 : index
    %302 = vector.load %arg34[%c0_121, %c0_122] : memref<32x8xbf16, #tpu.memory_space<vmem>>, vector<32x8xbf16>
    %c0_123 = arith.constant 0 : index
    %c0_124 = arith.constant 0 : index
    %303 = vector.load %arg35[%c0_123, %c0_124] : memref<512x128xbf16, #tpu.memory_space<vmem>>, vector<512x128xbf16>
    %304 = arith.truncf %301 : vector<8x128xf32> to vector<8x128xbf16>
    %cst_125 = arith.constant dense<0.000000e+00> : vector<32x128xf32>
    %305 = tpu.matmul %302, %304, %cst_125 {dimension_numbers = #tpu.dot_dimension_numbers<[1], [0], [0], [1], [0, 0, 1, 1], [], []>} : vector<32x8xbf16>, vector<8x128xbf16>, vector<32x128xf32> -> vector<32x128xf32>
    %306 = vector.extract_strided_slice %305 {offsets = [0, 0], sizes = [3, 128], strides = [1, 1]} : vector<32x128xf32> to vector<3x128xf32>
    %307 = vector.extract_strided_slice %305 {offsets = [8, 0], sizes = [3, 128], strides = [1, 1]} : vector<32x128xf32> to vector<3x128xf32>
    %308 = vector.extract_strided_slice %305 {offsets = [16, 0], sizes = [3, 128], strides = [1, 1]} : vector<32x128xf32> to vector<3x128xf32>
    %309 = vector.extract_strided_slice %305 {offsets = [24, 0], sizes = [3, 128], strides = [1, 1]} : vector<32x128xf32> to vector<3x128xf32>
    %310 = tpu.concatenate %306, %307, %308, %309 in 1 : vector<3x128xf32>, vector<3x128xf32>, vector<3x128xf32>, vector<3x128xf32> -> vector<3x512xf32>
    %311 = arith.truncf %310 : vector<3x512xf32> to vector<3x512xbf16>
    %cst_126 = arith.constant dense<0.000000e+00> : vector<3x128xf32>
    %312 = tpu.matmul %311, %303, %cst_126 {dimension_numbers = #tpu.dot_dimension_numbers<[1], [0], [0], [1], [0, 0, 1, 1], [], []>} : vector<3x512xbf16>, vector<512x128xbf16>, vector<3x128xf32> -> vector<3x128xf32>
    %c0_127 = arith.constant 0 : index
    %c0_128 = arith.constant 0 : index
    %313 = vector.load %arg36[%c0_127, %c0_128] : memref<3x128xf32, #tpu.memory_space<vmem>>, vector<3x128xf32>
    %c0_129 = arith.constant 0 : index
    %c0_130 = arith.constant 0 : index
    %314 = vector.load %arg37[%c0_129, %c0_130] : memref<3x128xf32, #tpu.memory_space<vmem>>, vector<3x128xf32>
    %315 = vector.shape_cast %312 : vector<3x128xf32> to vector<1x3x128xf32>
    %cst_131 = arith.constant dense<0.000000e+00> : vector<1xf32>
    %316 = vector.multi_reduction <add>, %315, %cst_131 [1, 2] : vector<1x3x128xf32> to vector<1xf32>
    %317 = vector.shape_cast %316 : vector<1xf32> to vector<1x1x1xf32>
    %318 = vector.extract %317[0, 0, 0] : f32 from vector<1x1x1xf32>
    %319 = vector.broadcast %318 : f32 to vector<1x1xf32>
    %320 = arith.mulf %312, %312 : vector<3x128xf32>
    %321 = vector.shape_cast %320 : vector<3x128xf32> to vector<1x3x128xf32>
    %cst_132 = arith.constant dense<0.000000e+00> : vector<1xf32>
    %322 = vector.multi_reduction <add>, %321, %cst_132 [1, 2] : vector<1x3x128xf32> to vector<1xf32>
    %323 = vector.shape_cast %322 : vector<1xf32> to vector<1x1x1xf32>
    %324 = vector.extract %323[0, 0, 0] : f32 from vector<1x1x1xf32>
    %325 = vector.broadcast %324 : f32 to vector<1x1xf32>
    %cst_133 = arith.constant 0.00347222225 : f32
    %326 = vector.broadcast %cst_133 : f32 to vector<1x1xf32>
    %327 = arith.mulf %319, %326 : vector<1x1xf32>
    %cst_134 = arith.constant 0.00347222225 : f32
    %328 = vector.broadcast %cst_134 : f32 to vector<1x1xf32>
    %329 = arith.mulf %325, %328 : vector<1x1xf32>
    %330 = arith.mulf %327, %327 : vector<1x1xf32>
    %331 = arith.subf %329, %330 : vector<1x1xf32>
    %332 = vector.broadcast %327 : vector<1x1xf32> to vector<3x128xf32>
    %333 = arith.subf %312, %332 : vector<3x128xf32>
    %cst_135 = arith.constant 9.99999974E-6 : f32
    %334 = vector.broadcast %cst_135 : f32 to vector<1x1xf32>
    %335 = arith.addf %331, %334 : vector<1x1xf32>
    %336 = math.rsqrt %335 : vector<1x1xf32>
    %337 = vector.broadcast %336 : vector<1x1xf32> to vector<3x128xf32>
    %338 = arith.mulf %333, %337 : vector<3x128xf32>
    %339 = arith.mulf %338, %313 : vector<3x128xf32>
    %340 = arith.addf %339, %314 : vector<3x128xf32>
    %cst_136 = arith.constant 0.000000e+00 : f32
    %341 = vector.broadcast %cst_136 : f32 to vector<3x128xf32>
    %342 = arith.maximumf %340, %341 : vector<3x128xf32>
    %c0_137 = arith.constant 0 : index
    %c0_138 = arith.constant 0 : index
    %343 = vector.load %arg38[%c0_137, %c0_138] : memref<24x3xbf16, #tpu.memory_space<vmem>>, vector<24x3xbf16>
    %c0_139 = arith.constant 0 : index
    %c0_140 = arith.constant 0 : index
    %344 = vector.load %arg39[%c0_139, %c0_140] : memref<384x128xbf16, #tpu.memory_space<vmem>>, vector<384x128xbf16>
    %345 = arith.truncf %342 : vector<3x128xf32> to vector<3x128xbf16>
    %cst_141 = arith.constant dense<0.000000e+00> : vector<24x128xf32>
    %346 = tpu.matmul %343, %345, %cst_141 {dimension_numbers = #tpu.dot_dimension_numbers<[1], [0], [0], [1], [0, 0, 1, 1], [], []>} : vector<24x3xbf16>, vector<3x128xbf16>, vector<24x128xf32> -> vector<24x128xf32>
    %347 = vector.extract_strided_slice %346 {offsets = [0, 0], sizes = [1, 128], strides = [1, 1]} : vector<24x128xf32> to vector<1x128xf32>
    %348 = vector.extract_strided_slice %346 {offsets = [8, 0], sizes = [1, 128], strides = [1, 1]} : vector<24x128xf32> to vector<1x128xf32>
    %349 = vector.extract_strided_slice %346 {offsets = [16, 0], sizes = [1, 128], strides = [1, 1]} : vector<24x128xf32> to vector<1x128xf32>
    %350 = tpu.concatenate %347, %348, %349 in 1 : vector<1x128xf32>, vector<1x128xf32>, vector<1x128xf32> -> vector<1x384xf32>
    %351 = arith.truncf %350 : vector<1x384xf32> to vector<1x384xbf16>
    %cst_142 = arith.constant dense<0.000000e+00> : vector<1x128xf32>
    %352 = tpu.matmul %351, %344, %cst_142 {dimension_numbers = #tpu.dot_dimension_numbers<[1], [0], [0], [1], [0, 0, 1, 1], [], []>} : vector<1x384xbf16>, vector<384x128xbf16>, vector<1x128xf32> -> vector<1x128xf32>
    %cst_143 = arith.constant 0.000000e+00 : f32
    %353 = vector.broadcast %cst_143 : f32 to vector<1x128xf32>
    %354 = arith.maximumf %352, %353 : vector<1x128xf32>
    %c0_144 = arith.constant 0 : index
    %c0_145 = arith.constant 0 : index
    %355 = vector.load %arg40[%c0_144, %c0_145] : memref<16x128xf32, #tpu.memory_space<vmem>>, vector<16x128xf32>
    %c0_146 = arith.constant 0 : index
    %c0_147 = arith.constant 0 : index
    %356 = vector.load %arg41[%c0_146, %c0_147] : memref<16x1xf32, #tpu.memory_space<vmem>>, vector<16x1xf32>
    %c0_148 = arith.constant 0 : index
    %c0_149 = arith.constant 0 : index
    %357 = vector.load %arg42[%c0_148, %c0_149] : memref<16x8xf32, #tpu.memory_space<vmem>>, vector<16x8xf32>
    %c0_150 = arith.constant 0 : index
    %c0_151 = arith.constant 0 : index
    %358 = vector.load %arg43[%c0_150, %c0_151] : memref<1x8xf32, #tpu.memory_space<vmem>>, vector<1x8xf32>
    %359 = vector.broadcast %354 : vector<1x128xf32> to vector<16x128xf32>
    %360 = arith.mulf %359, %355 : vector<16x128xf32>
    %cst_152 = arith.constant dense<0.000000e+00> : vector<16xf32>
    %361 = vector.multi_reduction <add>, %360, %cst_152 [1] : vector<16x128xf32> to vector<16xf32>
    %362 = vector.shape_cast %361 : vector<16xf32> to vector<16x1xf32>
    %363 = arith.addf %362, %356 : vector<16x1xf32>
    %cst_153 = arith.constant 0.000000e+00 : f32
    %364 = vector.broadcast %cst_153 : f32 to vector<16x1xf32>
    %365 = arith.maximumf %363, %364 : vector<16x1xf32>
    %366 = vector.broadcast %365 : vector<16x1xf32> to vector<16x8xf32>
    %367 = arith.mulf %366, %357 : vector<16x8xf32>
    %cst_154 = arith.constant dense<0.000000e+00> : vector<8xf32>
    %368 = vector.multi_reduction <add>, %367, %cst_154 [0] : vector<16x8xf32> to vector<8xf32>
    %369 = vector.shape_cast %368 : vector<8xf32> to vector<1x8xf32>
    %370 = arith.addf %369, %358 : vector<1x8xf32>
    %371 = vector.shape_cast %370 : vector<1x8xf32> to vector<1x1x8xf32>
    %c0_155 = arith.constant 0 : index
    %c0_156 = arith.constant 0 : index
    %c0_157 = arith.constant 0 : index
    %372 = vector.load %arg44[%c0_155, %c0_156, %c0_157] : memref<1x1x8xf32, #tpu.memory_space<vmem>>, vector<1x1x8xf32>
    tpu.vector_store %arg44[%c0_155, %c0_156, %c0_157], %371 {strides = array<i32>} : memref<1x1x8xf32, #tpu.memory_space<vmem>>, vector<1x1x8xf32>,
    return
  }
  func.func @transform_0(%arg0: i32) -> (i32, i32, i32) {
    %c0_i32 = arith.constant 0 : i32
    %c0_i32_0 = arith.constant 0 : i32
    %c0_i32_1 = arith.constant 0 : i32
    return %arg0, %c0_i32, %c0_i32_0 : i32, i32, i32
  }
  func.func @transform_1(%arg0: i32) -> (i32, i32) {
    %c0_i32 = arith.constant 0 : i32
    %c0_i32_0 = arith.constant 0 : i32
    %c0_i32_1 = arith.constant 0 : i32
    return %c0_i32, %c0_i32_0 : i32, i32
  }
  func.func @transform_2(%arg0: i32) -> (i32, i32) {
    %c0_i32 = arith.constant 0 : i32
    %c0_i32_0 = arith.constant 0 : i32
    %c0_i32_1 = arith.constant 0 : i32
    return %c0_i32, %c0_i32_0 : i32, i32
  }
  func.func @transform_3(%arg0: i32) -> (i32, i32) {
    %c0_i32 = arith.constant 0 : i32
    %c0_i32_0 = arith.constant 0 : i32
    %c0_i32_1 = arith.constant 0 : i32
    return %c0_i32, %c0_i32_0 : i32, i32
  }
  func.func @transform_4(%arg0: i32) -> (i32, i32) {
    %c0_i32 = arith.constant 0 : i32
    %c0_i32_0 = arith.constant 0 : i32
    %c0_i32_1 = arith.constant 0 : i32
    return %c0_i32, %c0_i32_0 : i32, i32
  }
  func.func @transform_5(%arg0: i32) -> (i32, i32) {
    %c0_i32 = arith.constant 0 : i32
    %c0_i32_0 = arith.constant 0 : i32
    %c0_i32_1 = arith.constant 0 : i32
    return %c0_i32, %c0_i32_0 : i32, i32
  }
  func.func @transform_6(%arg0: i32) -> (i32, i32) {
    %c0_i32 = arith.constant 0 : i32
    %c0_i32_0 = arith.constant 0 : i32
    %c0_i32_1 = arith.constant 0 : i32
    return %c0_i32, %c0_i32_0 : i32, i32
  }
  func.func @transform_7(%arg0: i32) -> (i32, i32) {
    %c0_i32 = arith.constant 0 : i32
    %c0_i32_0 = arith.constant 0 : i32
    %c0_i32_1 = arith.constant 0 : i32
    return %c0_i32, %c0_i32_0 : i32, i32
  }
  func.func @transform_8(%arg0: i32) -> (i32, i32) {
    %c0_i32 = arith.constant 0 : i32
    %c0_i32_0 = arith.constant 0 : i32
    %c0_i32_1 = arith.constant 0 : i32
    return %c0_i32, %c0_i32_0 : i32, i32
  }
  func.func @transform_9(%arg0: i32) -> (i32, i32) {
    %c0_i32 = arith.constant 0 : i32
    %c0_i32_0 = arith.constant 0 : i32
    %c0_i32_1 = arith.constant 0 : i32
    return %c0_i32, %c0_i32_0 : i32, i32
  }
  func.func @transform_10(%arg0: i32) -> (i32, i32) {
    %c0_i32 = arith.constant 0 : i32
    %c0_i32_0 = arith.constant 0 : i32
    %c0_i32_1 = arith.constant 0 : i32
    return %c0_i32, %c0_i32_0 : i32, i32
  }
  func.func @transform_11(%arg0: i32) -> (i32, i32) {
    %c0_i32 = arith.constant 0 : i32
    %c0_i32_0 = arith.constant 0 : i32
    %c0_i32_1 = arith.constant 0 : i32
    return %c0_i32, %c0_i32_0 : i32, i32
  }
  func.func @transform_12(%arg0: i32) -> (i32, i32) {
    %c0_i32 = arith.constant 0 : i32
    %c0_i32_0 = arith.constant 0 : i32
    %c0_i32_1 = arith.constant 0 : i32
    return %c0_i32, %c0_i32_0 : i32, i32
  }
  func.func @transform_13(%arg0: i32) -> (i32, i32) {
    %c0_i32 = arith.constant 0 : i32
    %c0_i32_0 = arith.constant 0 : i32
    %c0_i32_1 = arith.constant 0 : i32
    return %c0_i32, %c0_i32_0 : i32, i32
  }
  func.func @transform_14(%arg0: i32) -> (i32, i32) {
    %c0_i32 = arith.constant 0 : i32
    %c0_i32_0 = arith.constant 0 : i32
    %c0_i32_1 = arith.constant 0 : i32
    return %c0_i32, %c0_i32_0 : i32, i32
  }
  func.func @transform_15(%arg0: i32) -> (i32, i32) {
    %c0_i32 = arith.constant 0 : i32
    %c0_i32_0 = arith.constant 0 : i32
    %c0_i32_1 = arith.constant 0 : i32
    return %c0_i32, %c0_i32_0 : i32, i32
  }
  func.func @transform_16(%arg0: i32) -> (i32, i32) {
    %c0_i32 = arith.constant 0 : i32
    %c0_i32_0 = arith.constant 0 : i32
    %c0_i32_1 = arith.constant 0 : i32
    return %c0_i32, %c0_i32_0 : i32, i32
  }
  func.func @transform_17(%arg0: i32) -> (i32, i32) {
    %c0_i32 = arith.constant 0 : i32
    %c0_i32_0 = arith.constant 0 : i32
    %c0_i32_1 = arith.constant 0 : i32
    return %c0_i32, %c0_i32_0 : i32, i32
  }
  func.func @transform_18(%arg0: i32) -> (i32, i32) {
    %c0_i32 = arith.constant 0 : i32
    %c0_i32_0 = arith.constant 0 : i32
    %c0_i32_1 = arith.constant 0 : i32
    return %c0_i32, %c0_i32_0 : i32, i32
  }
  func.func @transform_19(%arg0: i32) -> (i32, i32) {
    %c0_i32 = arith.constant 0 : i32
    %c0_i32_0 = arith.constant 0 : i32
    %c0_i32_1 = arith.constant 0 : i32
    return %c0_i32, %c0_i32_0 : i32, i32
  }
  func.func @transform_20(%arg0: i32) -> (i32, i32) {
    %c0_i32 = arith.constant 0 : i32
    %c0_i32_0 = arith.constant 0 : i32
    %c0_i32_1 = arith.constant 0 : i32
    return %c0_i32, %c0_i32_0 : i32, i32
  }
  func.func @transform_21(%arg0: i32) -> (i32, i32) {
    %c0_i32 = arith.constant 0 : i32
    %c0_i32_0 = arith.constant 0 : i32
    %c0_i32_1 = arith.constant 0 : i32
    return %c0_i32, %c0_i32_0 : i32, i32
  }
  func.func @transform_22(%arg0: i32) -> (i32, i32) {
    %c0_i32 = arith.constant 0 : i32
    %c0_i32_0 = arith.constant 0 : i32
    %c0_i32_1 = arith.constant 0 : i32
    return %c0_i32, %c0_i32_0 : i32, i32
  }
  func.func @transform_23(%arg0: i32) -> (i32, i32) {
    %c0_i32 = arith.constant 0 : i32
    %c0_i32_0 = arith.constant 0 : i32
    %c0_i32_1 = arith.constant 0 : i32
    return %c0_i32, %c0_i32_0 : i32, i32
  }
  func.func @transform_24(%arg0: i32) -> (i32, i32) {
    %c0_i32 = arith.constant 0 : i32
    %c0_i32_0 = arith.constant 0 : i32
    %c0_i32_1 = arith.constant 0 : i32
    return %c0_i32, %c0_i32_0 : i32, i32
  }
  func.func @transform_25(%arg0: i32) -> (i32, i32) {
    %c0_i32 = arith.constant 0 : i32
    %c0_i32_0 = arith.constant 0 : i32
    %c0_i32_1 = arith.constant 0 : i32
    return %c0_i32, %c0_i32_0 : i32, i32
  }
  func.func @transform_26(%arg0: i32) -> (i32, i32) {
    %c0_i32 = arith.constant 0 : i32
    %c0_i32_0 = arith.constant 0 : i32
    %c0_i32_1 = arith.constant 0 : i32
    return %c0_i32, %c0_i32_0 : i32, i32
  }
  func.func @transform_27(%arg0: i32) -> (i32, i32) {
    %c0_i32 = arith.constant 0 : i32
    %c0_i32_0 = arith.constant 0 : i32
    %c0_i32_1 = arith.constant 0 : i32
    return %c0_i32, %c0_i32_0 : i32, i32
  }
  func.func @transform_28(%arg0: i32) -> (i32, i32) {
    %c0_i32 = arith.constant 0 : i32
    %c0_i32_0 = arith.constant 0 : i32
    %c0_i32_1 = arith.constant 0 : i32
    return %c0_i32, %c0_i32_0 : i32, i32
  }
  func.func @transform_29(%arg0: i32) -> (i32, i32) {
    %c0_i32 = arith.constant 0 : i32
    %c0_i32_0 = arith.constant 0 : i32
    %c0_i32_1 = arith.constant 0 : i32
    return %c0_i32, %c0_i32_0 : i32, i32
  }
  func.func @transform_30(%arg0: i32) -> (i32, i32) {
    %c0_i32 = arith.constant 0 : i32
    %c0_i32_0 = arith.constant 0 : i32
    %c0_i32_1 = arith.constant 0 : i32
    return %c0_i32, %c0_i32_0 : i32, i32
  }
  func.func @transform_31(%arg0: i32) -> (i32, i32) {
    %c0_i32 = arith.constant 0 : i32
    %c0_i32_0 = arith.constant 0 : i32
    %c0_i32_1 = arith.constant 0 : i32
    return %c0_i32, %c0_i32_0 : i32, i32
  }
  func.func @transform_32(%arg0: i32) -> (i32, i32) {
    %c0_i32 = arith.constant 0 : i32
    %c0_i32_0 = arith.constant 0 : i32
    %c0_i32_1 = arith.constant 0 : i32
    return %c0_i32, %c0_i32_0 : i32, i32
  }
  func.func @transform_33(%arg0: i32) -> (i32, i32) {
    %c0_i32 = arith.constant 0 : i32
    %c0_i32_0 = arith.constant 0 : i32
    %c0_i32_1 = arith.constant 0 : i32
    return %c0_i32, %c0_i32_0 : i32, i32
  }
  func.func @transform_34(%arg0: i32) -> (i32, i32) {
    %c0_i32 = arith.constant 0 : i32
    %c0_i32_0 = arith.constant 0 : i32
    %c0_i32_1 = arith.constant 0 : i32
    return %c0_i32, %c0_i32_0 : i32, i32
  }
  func.func @transform_35(%arg0: i32) -> (i32, i32) {
    %c0_i32 = arith.constant 0 : i32
    %c0_i32_0 = arith.constant 0 : i32
    %c0_i32_1 = arith.constant 0 : i32
    return %c0_i32, %c0_i32_0 : i32, i32
  }
  func.func @transform_36(%arg0: i32) -> (i32, i32) {
    %c0_i32 = arith.constant 0 : i32
    %c0_i32_0 = arith.constant 0 : i32
    %c0_i32_1 = arith.constant 0 : i32
    return %c0_i32, %c0_i32_0 : i32, i32
  }
  func.func @transform_37(%arg0: i32) -> (i32, i32) {
    %c0_i32 = arith.constant 0 : i32
    %c0_i32_0 = arith.constant 0 : i32
    %c0_i32_1 = arith.constant 0 : i32
    return %c0_i32, %c0_i32_0 : i32, i32
  }
  func.func @transform_38(%arg0: i32) -> (i32, i32) {
    %c0_i32 = arith.constant 0 : i32
    %c0_i32_0 = arith.constant 0 : i32
    %c0_i32_1 = arith.constant 0 : i32
    return %c0_i32, %c0_i32_0 : i32, i32
  }
  func.func @transform_39(%arg0: i32) -> (i32, i32) {
    %c0_i32 = arith.constant 0 : i32
    %c0_i32_0 = arith.constant 0 : i32
    %c0_i32_1 = arith.constant 0 : i32
    return %c0_i32, %c0_i32_0 : i32, i32
  }
  func.func @transform_40(%arg0: i32) -> (i32, i32) {
    %c0_i32 = arith.constant 0 : i32
    %c0_i32_0 = arith.constant 0 : i32
    %c0_i32_1 = arith.constant 0 : i32
    return %c0_i32, %c0_i32_0 : i32, i32
  }
  func.func @transform_41(%arg0: i32) -> (i32, i32) {
    %c0_i32 = arith.constant 0 : i32
    %c0_i32_0 = arith.constant 0 : i32
    %c0_i32_1 = arith.constant 0 : i32
    return %c0_i32, %c0_i32_0 : i32, i32
  }
  func.func @transform_42(%arg0: i32) -> (i32, i32) {
    %c0_i32 = arith.constant 0 : i32
    %c0_i32_0 = arith.constant 0 : i32
    %c0_i32_1 = arith.constant 0 : i32
    return %c0_i32, %c0_i32_0 : i32, i32
  }
  func.func @transform_43(%arg0: i32) -> (i32, i32, i32) {
    %c0_i32 = arith.constant 0 : i32
    %c0_i32_0 = arith.constant 0 : i32
    %c0_i32_1 = arith.constant 0 : i32
    return %arg0, %c0_i32, %c0_i32_0 : i32, i32, i32
  }
}

</mosaic_0001>

<bundles_post_ra>
// kernel: fwd.1
= control target key start
LH: loop header
LB: loop body
LE: loop exit
PB: predicated region body
PF: predicated region fallthrough
CT: control target
= control target key end

     0   :  { %s11137_s6 = smov 1   ;;  %s11138_s10 = smov 2   ;;  %s12421_s0 = inlined_call_operand.smem [shape: u32[44], index: -1, kind: input, shape index: {}] }
   0x1   :  { %s11232_s5 = sld [smem:[%s12421_s0]]   ;;  %s11139_s14 = smov 3  }
   0x2   :  { %s11237_s9 = sld [smem:[%s12421_s0 + %s11137_s6]]   ;;  %s11140_s18 = smov 4  }
   0x3   :  { %s11242_s13 = sld [smem:[%s12421_s0 + %s11138_s10]]   ;;  %s11141_s22 = smov 5  }
   0x4   :  { %s11247_s17 = sld [smem:[%s12421_s0 + %s11139_s14]]   ;;  %s11142_s26 = smov 6  }
   0x5   :  { %s11252_s21 = sld [smem:[%s12421_s0 + %s11140_s18]]   ;;  %s11143_s30 = smov 7  }
   0x6   :  { %s11257_s25 = sld [smem:[%s12421_s0 + %s11141_s22]]   ;;  %s11144_s4 = smov 8  }
   0x7   :  { %12444 = sst [smem:[#allocation76_spill]] %s11232_s5  ;;  %s11145_s10 = smov 9  }
   0x8   :  { %12445 = sst [smem:[#allocation77_spill]] %s11237_s9  ;;  %s11146_s15 = smov 10  }
   0x9   :  { %s11262_s29 = sld [smem:[%s12421_s0 + %s11142_s26]]   ;;  %s11147_s20 = smov 11  }
   0xa   :  { %12446 = sst [smem:[#allocation78_spill]] %s11247_s17  ;;  %s11148_s26 = smov 12  }
   0xb   :  { %s11267_s3 = sld [smem:[%s12421_s0 + %s11143_s30]]   ;;  %s11149_s1 = smov 13  }
   0xc   :  { %12447 = sst [smem:[#allocation79_spill]] %s11257_s25  ;;  %s11150_s7 = smov 14  }
   0xd   :  { %s11272_s8 = sld [smem:[%s12421_s0 + %s11144_s4]]   ;;  %s11152_s22 = smov 16  }
   0xe   :  { %s11277_s14 = sld [smem:[%s12421_s0 + %s11145_s10]]   ;;  %s11153_s28 = smov 17  }
   0xf   :  { %12448 = sst [smem:[#allocation80_spill]] %s11262_s29 }
  0x10   :  { %s11282_s19 = sld [smem:[%s12421_s0 + %s11146_s15]]   ;;  %s11151_s15 = smov 15  }
  0x11   :  { %12449 = sst [smem:[#allocation81_spill]] %s11267_s3 }
  0x12   :  { %s11287_s24 = sld [smem:[%s12421_s0 + %s11147_s20]]  }
  0x13   :  { %12450 = sst [smem:[#allocation82_spill]] %s11272_s8 }
  0x14   :  { %s11292_s30 = sld [smem:[%s12421_s0 + %s11148_s26]]  }
  0x15   :  { %s11297_s6 = sld [smem:[%s12421_s0 + %s11149_s1]]  }
  0x16   :  { %12451 = sst [smem:[#allocation83_spill]] %s11282_s19 }
  0x17   :  { %s11302_s12 = sld [smem:[%s12421_s0 + %s11150_s7]]   ;;  %s11154_s7 = smov 18  }
  0x18   :  { %12452 = sst [smem:[#allocation84_spill]] %s11287_s24 }
  0x19   :  { %s11307_s20 = sld [smem:[%s12421_s0 + %s11151_s15]]   ;;  %s11155_s15 = smov 19  }
  0x1a   :  { %s11312_s27 = sld [smem:[%s12421_s0 + %s11152_s22]]   ;;  %s11156_s22 = smov 20  }
  0x1b   :  { %12453 = sst [smem:[#allocation85_spill]] %s11297_s6 }
  0x1c   :  { %s11317_s4 = sld [smem:[%s12421_s0 + %s11153_s28]]   ;;  %s11157_s28 = smov 21  }
  0x1d   :  { %12454 = sst [smem:[#allocation86_spill]] %s11302_s12 }
  0x1e   :  { %s11322_s19 = sld [smem:[%s12421_s0 + %s11154_s7]]   ;;  %s11158_s7 = smov 22  }
  0x1f   :  { %12455 = sst [smem:[#allocation87_spill]] %s11307_s20 }
  0x20   :  { %12456 = sst [smem:[#allocation88_spill]] %s11312_s27 }
  0x21   :  { %s11327_s25 = sld [smem:[%s12421_s0 + %s11155_s15]]   ;;  %s11159_s15 = smov 23  }
  0x22   :  { %12457 = sst [smem:[#allocation89_spill]] %s11317_s4 }
  0x23   :  { %s11332_s27 = sld [smem:[%s12421_s0 + %s11156_s22]]   ;;  %s11160_s22 = smov 24  }
  0x24   :  { %12458 = sst [smem:[#allocation90_spill]] %s11322_s19 }
  0x25   :  { %s11337_s5 = sld [smem:[%s12421_s0 + %s11157_s28]]   ;;  %s11161_s28 = smov 25  }
  0x26   :  { %s11342_s19 = sld [smem:[%s12421_s0 + %s11158_s7]]   ;;  %s11162_s7 = smov 26  }
  0x27   :  { %s11347_s20 = sld [smem:[%s12421_s0 + %s11159_s15]]   ;;  %s11163_s15 = smov 27  }
  0x28   :  { %s11357_s6 = sld [smem:[%s12421_s0 + %s11161_s28]]   ;;  %s11165_s28 = smov 29  }
  0x29   :  { %12459 = sst [smem:[#allocation91_spill]] %s11332_s27 }
  0x2a   :  { %s11352_s27 = sld [smem:[%s12421_s0 + %s11160_s22]]   ;;  %s11164_s22 = smov 28  }
  0x2b   :  { %12460 = sst [smem:[#allocation92_spill]] %s11337_s5 }
  0x2c   :  { %12461 = sst [smem:[#allocation93_spill]] %s11342_s19 }
  0x2d   :  { %s11362_s19 = sld [smem:[%s12421_s0 + %s11162_s7]]   ;;  %s11166_s7 = smov 30  }
  0x2e   :  { %s11367_s24 = sld [smem:[%s12421_s0 + %s11163_s15]]   ;;  %s11167_s15 = smov 31  }
  0x2f   :  { %s11377_s8 = sld [smem:[%s12421_s0 + %s11165_s28]]   ;;  %s11169_s28 = smov 33  }
  0x30   :  { %12462 = sst [smem:[#allocation94_spill]] %s11352_s27 }
  0x31   :  { %s11372_s27 = sld [smem:[%s12421_s0 + %s11164_s22]]   ;;  %s11168_s22 = smov 32  }
  0x32   :  { %s11387_s29 = sld [smem:[%s12421_s0 + %s11167_s15]]   ;;  %s11171_s15 = smov 35  }
  0x33   :  { %12463 = sst [smem:[#allocation95_spill]] %s11362_s19 }
  0x34   :  { %s11382_s19 = sld [smem:[%s12421_s0 + %s11166_s7]]   ;;  %s11170_s7 = smov 34  }
  0x35   :  { %s11397_s17 = sld [smem:[%s12421_s0 + %s11169_s28]]   ;;  %s11173_s28 = smov 37  }
  0x37   :  { %12464 = sst [smem:[#allocation96_spill]] %s11372_s27 }
  0x38   :  { %12466 = sst [smem:[#allocation98_spill]] %s11387_s29 }
  0x39   :  { %s11392_s27 = sld [smem:[%s12421_s0 + %s11168_s22]]   ;;  %s11172_s22 = smov 36  }
  0x3a   :  { %12465 = sst [smem:[#allocation97_spill]] %s11382_s19 }
  0x3b   :  { %12467 = sst [smem:[#allocation99_spill]] %s11397_s17 }
  0x3c   :  { %s11402_s19 = sld [smem:[%s12421_s0 + %s11170_s7]]   ;;  %s11174_s7 = smov 38  }
  0x3d   :  { %s11407_s29 = sld [smem:[%s12421_s0 + %s11171_s15]]   ;;  %s11175_s15 = smov 39  }
  0x3e   :  { %s11412_s9 = sld [smem:[%s12421_s0 + %s11172_s22]]   ;;  %s11176_s22 = smov 40  }
  0x3f   :  { %s11417_s17 = sld [smem:[%s12421_s0 + %s11173_s28]]   ;;  %s11177_s28 = smov 41  }
  0x42   :  { %12468 = sst [smem:[#allocation100_spill]] %s11402_s19 }
  0x43   :  { %12469 = sst [smem:[#allocation101_spill]] %s11407_s29 }
  0x44   :  { %12470 = sst [smem:[#allocation102_spill]] %s11412_s9 }
  0x45   :  { %12471 = sst [smem:[#allocation103_spill]] %s11417_s17 }
  0x46   :  { %s11422_s19 = sld [smem:[%s12421_s0 + %s11174_s7]]   ;;  %s11178_s7 = smov 42  }
  0x47   :  { %s11427_s29 = sld [smem:[%s12421_s0 + %s11175_s15]]   ;;  %s11179_s15 = smov 43  }
  0x48   :  { %s11432_s9 = sld [smem:[%s12421_s0 + %s11176_s22]]  }
  0x49   :  { %s11437_s17 = sld [smem:[%s12421_s0 + %s11177_s28]]  }
  0x4c   :  { %12472 = sst [smem:[#allocation104_spill]] %s11422_s19 }
  0x4d   :  { %12473 = sst [smem:[#allocation105_spill]] %s11427_s29 }
  0x4e   :  { %s11442_s19 = sld [smem:[%s12421_s0 + %s11178_s7]]  }
  0x4f   :  { %s11447_s29 = sld [smem:[%s12421_s0 + %s11179_s15]]  }
  0x50   :  { %92 = vsyncpa [#allocation3], 0 }
  0x51   :  { %93 = vsyncpa [#allocation6], 0 }
  0x52   :  { %94 = vsyncpa [#allocation9], 0 }
  0x53   :  { %95 = vsyncpa [#allocation12], 0 }
  0x54   :  { %96 = vsyncpa [#allocation15], 0 }
  0x55   :  { %97 = vsyncpa [#allocation18], 0 }
  0x56   :  { %98 = vsyncpa [#allocation21], 0 }
  0x57   :  { %99 = vsyncpa [#allocation24], 0 }
  0x58   :  { %100 = vsyncpa [#allocation27], 0 }
  0x59   :  { %101 = vsyncpa [#allocation30], 0 }
  0x5a   :  { %102 = vsyncpa [#allocation33], 0 }
  0x5b   :  { %103 = vsyncpa [#allocation36], 0 }
  0x5c   :  { %104 = vsyncpa [#allocation39], 0 }
  0x5d   :  { %105 = vsyncpa [#allocation42], 0 }
  0x5e   :  { %106 = vsyncpa [#allocation45], 0 }
  0x5f   :  { %107 = vsyncpa [#allocation48], 0 }
  0x60   :  { %108 = vsyncpa [#allocation51], 0 }
  0x61   :  { %109 = vsyncpa [#allocation54], 0 }
  0x62   :  { %110 = vsyncpa [#allocation4], 0 }
  0x63   :  { %112 = vsyncpa [#allocation4 + $0x1], 0  ;;  %s11449_s0 = smov 0   ;;  %s11451_s22 = smov 0  }
  0x64   :  { %s11453_s23 = smov 0   ;;  %s11455_s26 = smov 0  }
  0x65 LB: > { %12474 = sst [smem:[#allocation106_spill]] %s11123_s0  ;;  %s11470_s28 = sadd.s32 4294967295, %s11135_s26   ;;  %s11135_s26 = sphi %s11455_s26, %s12524_s26   ;;  %s11131_s23 = sphi %s11453_s23, %s12526_s23   ;;  %s11127_s22 = sphi %s11451_s22, %s12528_s22   ;;  %s11123_s0 = sphi %s11449_s0, %s12527_s0  }
  0x66   : > { %12475 = sst [smem:[#allocation107_spill]] %s11131_s23  ;;  %s8008_s1 = sadd.s32 4294967294, %s11135_s26  }
  0x67   : > { %12476 = sst [smem:[#allocation108_spill]] %s11135_s26  ;;  %s11474_s2 = sadd.s32 1, %s11135_s26  }
  0x68   : > { %12477 = sst [smem:[#allocation109_spill]] %s11474_s2  ;;  %s1033_s7 = sadd.s32 1, %s11131_s23 }
  0x69   : > { %s1030_s10 = ssub.s32 %s11135_s26, %s11474_s2  ;;  %p1043_p0 = scmp.ne.s32.totalorder %s11131_s23, %s11127_s22 }
  0x6a   : > { %p1031_p1 = scmp.eq.s32.totalorder %s1030_s10, 0  ;;  %p1044_p2 = scmp.eq.s32.totalorder %s11470_s28, 1 }
  0x6b   : > { %p1049_p3 = scmp.ne.s32.totalorder %s11127_s22, %s11123_s0  ;;  %p1050_p4 = scmp.eq.s32.totalorder %s8008_s1, 1 }
  0x6c   : > { %s11485_s11 = scalar_select %p1031_p1, %s11131_s23, %s1033_s7  }
  0x6d   : > { %p11487_p5 = por %p1044_p2, %p1043_p0  ;;  %p11491_p6 = por %p1050_p4, %p1049_p3 }
  0x6e   : > { %12478 = sst [smem:[#allocation110_spill]] %s11485_s11  ;;  %p8009_p7 = scmp.ge.s32.totalorder %s11135_s26, 1 }
  0x6f   : > { %s12479_s15 = scalar_select %p11487_p5, 1, 0 }
  0x70   : > { %s12480_s16 = scalar_select %p11491_p6, 1, 0 }
  0x71   : > { %p1057_p8 = scmp.lt.s32.totalorder %s11135_s26, 3 }
  0x72   : > { %12481 = sst [smem:[#allocation111_spill]] %s12480_s16 }
  0x73   : > { %p11497_p9 = pnand %p8009_p7, %p1057_p8 }
  0x74   : > { %p9571_p10 = scmp.eq.s32.totalorder (!%p11497_p9), %s11470_s28, 0  ;;  %s11180_s1 = smov (!%p11497_p9), [#allocation5]  }
  0x75   : > { %s12482_s18 = scalar_select %p11497_p9, 1, 0 }
  0x76   : > { %1061 = sbr.rel (%p11497_p9) target bundleno = 520 (0x208), region = 12  ;;  %s1082_s7 = sshll.u32 (!%p11497_p9), %s11180_s1, 4  ;;  %s1083_s7 = int_to_ptr.vmem [resolvable:$true] %s1082_s7 }
  0x77   : > { %s10173_s10 = scalar_lea.vmem (!%p11497_p9), %s1083_s7, 5120  ;;  %p10180_p0 = scmp.lt.s32.totalorder (!%p11497_p9), %s1083_s7, %s1083_s7 }
  0x78   : > { %p10174_p11 = scmp.ne.s32.totalorder (!%p11497_p9), %s1083_s7, %s10173_s10  ;;  %p10181_p1 = scmp.lt.s32.totalorder (!%p11497_p9), %s10173_s10, %s10173_s10 }
  0x7a   : > { %p10175_p12 = pnand (!%p11497_p9), %p10174_p11, %p9571_p10  ;;  %p10182_p2 = por (!%p11497_p9), %p10181_p1, %p10180_p0 }
  0x7c   : > { %p10176_p13 = pneg %p10175_p12 }
  0x7e   : > { %p10183_p3 = pnand %p10182_p2, %p10176_p13 }
  0x80   : > { %10186 = shalt.err (!%p10183_p3)
}
  0x81   : > { %s12433_s11 = smov 64   ;;  %s12435_s23 = smov 4  }
  0x82   : > { %9428 = dma.hbm_to_vmem [thread:$0]  (%p9571_p10), %s11242_s13, 5120, %s1083_s7, [#allocation6], %s12433_s11, %s12433_s11, %s12435_s23  }
  0x83   : > { %s11183_s1 = smov [#allocation8]   ;;  %s11184_s16 = smov [#allocation11]  }
  0x84   : > { %s1108_s2 = sshll.u32 %s11183_s1, 4  ;;  %s1138_s0 = sshll.u32 %s11184_s16, 4  ;;  %s1109_s2 = int_to_ptr.vmem [resolvable:$true] %s1108_s2  ;;  %s1139_s0 = int_to_ptr.vmem [resolvable:$true] %s1138_s0 }
  0x85   : > { %s10197_s10 = scalar_lea.vmem %s1109_s2, 1024  ;;  %p10204_p11 = scmp.lt.s32.totalorder %s1109_s2, %s1109_s2 }
  0x86   : > { %p10198_p4 = scmp.ne.s32.totalorder %s1109_s2, %s10197_s10  ;;  %p10205_p12 = scmp.lt.s32.totalorder %s10197_s10, %s10197_s10 }
  0x88   : > { %p10199_p7 = pnand %p10198_p4, %p9571_p10  ;;  %p10206_p13 = por %p10205_p12, %p10204_p11 }
  0x8a   : > { %p10200_p8 = pneg %p10199_p7 }
  0x8c   : > { %p10207_p0 = pnand %p10206_p13, %p10200_p8 }
  0x8e   : > { %10210 = shalt.err (!%p10207_p0)
}
  0x8f   : > { %s12437_s26 = smov 128   ;;  %s12439_s7 = smov 8  }
  0x90   : > { %9432 = dma.hbm_to_vmem [thread:$0]  (%p9571_p10), %s11252_s21, 1024, %s1109_s2, [#allocation9], %s12437_s26, %s12437_s26, %s12439_s7  }
  0x91   : > { %s10221_s16 = scalar_lea.vmem %s1139_s0, 16  ;;  %s10227_s1 = scalar_lea.vmem %s1139_s0, 32 }
  0x92   : > { %p10222_p1 = scmp.ne.s32.totalorder %s1139_s0, %s10221_s16  ;;  %p10228_p4 = scmp.lt.s32.totalorder %s1139_s0, %s1139_s0 }
  0x93   : > { %p10229_p7 = scmp.lt.s32.totalorder %s10227_s1, %s10221_s16 }
  0x94   : > { %p10223_p2 = pnand %p10222_p1, %p9571_p10 }
  0x95   : > { %p10230_p8 = por %p10229_p7, %p10228_p4 }
  0x96   : > { %p10224_p3 = pneg %p10223_p2 }
  0x98   : > { %p10231_p11 = pnand %p10230_p8, %p10224_p3 }
  0x9a   : > { %10234 = shalt.err (!%p10231_p11)
}
  0x9b   : > { %s12483_s3 = sld [smem:[#allocation81_spill]]  ;;  %s11187_s10 = smov [#allocation14]  }
  0x9c   : > { %s1161_s11 = sshll.u32 %s11187_s10, 4  ;;  %s11188_s23 = smov [#allocation17]   ;;  %s1162_s11 = int_to_ptr.vmem [resolvable:$true] %s1161_s11 }
  0x9d   : > { %s1191_s2 = sshll.u32 %s11188_s23, 4  ;;  %s10245_s26 = scalar_lea.vmem %s1162_s11, 1024  ;;  %s1192_s2 = int_to_ptr.vmem [resolvable:$true] %s1191_s2 }
  0x9e   : > { %p10246_p12 = scmp.ne.s32.totalorder %s1162_s11, %s10245_s26  ;;  %p10252_p1 = scmp.lt.s32.totalorder %s1162_s11, %s1162_s11 }
  0x9f   : > { %p10253_p2 = scmp.lt.s32.totalorder %s10245_s26, %s10245_s26 }
  0xa0   : > { %p10247_p13 = pnand %p10246_p12, %p9571_p10 }
  0xa1   : > { %9436 = dma.hbm_to_vmem [thread:$0]  (%p9571_p10), %s12483_s3, 16, %s1139_s0, [#allocation12]  }
  0xa2   : > { %p10248_p0 = pneg %p10247_p13  ;;  %p10254_p3 = por %p10253_p2, %p10252_p1 }
  0xa4   : > { %p10255_p4 = pnand %p10254_p3, %p10248_p0 }
  0xa6   : > { %10258 = shalt.err (!%p10255_p4)
}
  0xa7   : > { %s12484_s0 = smov 128   ;;  %s10269_s23 = scalar_lea.vmem %s1192_s2, 16 }
  0xa8   : > { %9440 = dma.hbm_to_vmem [thread:$0]  (%p9571_p10), %s11277_s14, 1024, %s1162_s11, [#allocation15], %s12484_s0, %s12484_s0, %s12439_s7  }
  0xa9   : > { %p10270_p7 = scmp.ne.s32.totalorder %s1192_s2, %s10269_s23  ;;  %s10275_s16 = scalar_lea.vmem %s1192_s2, 32 }
  0xaa   : > { %p10276_p12 = scmp.lt.s32.totalorder %s1192_s2, %s1192_s2  ;;  %p10277_p13 = scmp.lt.s32.totalorder %s10275_s16, %s10269_s23 }
  0xab   : > { %p10271_p8 = pnand %p10270_p7, %p9571_p10 }
  0xac   : > { %p10278_p6 = por %p10277_p13, %p10276_p12 }
  0xad   : > { %p10272_p11 = pneg %p10271_p8 }
  0xaf   : > { %p10279_p1 = pnand %p10278_p6, %p10272_p11 }
  0xb1   : > { %10282 = shalt.err (!%p10279_p1)
}
  0xb2   : > { %9444 = dma.hbm_to_vmem [thread:$0]  (%p9571_p10), %s11292_s30, 16, %s1192_s2, [#allocation18]  }
  0xb3   : > { %s11189_s26 = smov [#allocation20]   ;;  %s11190_s10 = smov [#allocation23]  }
  0xb4   : > { %s1214_s1 = sshll.u32 %s11189_s26, 4  ;;  %s1243_s11 = sshll.u32 %s11190_s10, 4  ;;  %s1215_s1 = int_to_ptr.vmem [resolvable:$true] %s1214_s1  ;;  %s1244_s11 = int_to_ptr.vmem [resolvable:$true] %s1243_s11 }
  0xb5   : > { %s10293_s7 = scalar_lea.vmem %s1215_s1, 1024  ;;  %p10300_p4 = scmp.lt.s32.totalorder %s1215_s1, %s1215_s1 }
  0xb6   : > { %p10294_p0 = scmp.ne.s32.totalorder %s1215_s1, %s10293_s7  ;;  %p10301_p7 = scmp.lt.s32.totalorder %s10293_s7, %s10293_s7 }
  0xb8   : > { %p10295_p2 = pnand %p10294_p0, %p9571_p10  ;;  %p10302_p6 = por %p10301_p7, %p10300_p4 }
  0xba   : > { %p10296_p3 = pneg %p10295_p2 }
  0xbc   : > { %p10303_p8 = pnand %p10302_p6, %p10296_p3 }
  0xbe   : > { %10306 = shalt.err (!%p10303_p8)
}
  0xbf   : > { %s12485_s23 = smov 8   ;;  %s12486_s12 = sld [smem:[#allocation86_spill]] }
  0xc0   : > { %s10317_s2 = scalar_lea.vmem %s1244_s11, 512  ;;  %p10324_p1 = scmp.lt.s32.totalorder %s1244_s11, %s1244_s11 }
  0xc1   : > { %p10318_p11 = scmp.ne.s32.totalorder %s1244_s11, %s10317_s2  ;;  %p10325_p0 = scmp.lt.s32.totalorder %s10317_s2, %s10317_s2 }
  0xc3   : > { %p10319_p12 = pnand %p10318_p11, %p9571_p10  ;;  %p10326_p2 = por %p10325_p0, %p10324_p1 }
  0xc5   : > { %9448 = dma.hbm_to_vmem [thread:$0]  (%p9571_p10), %s12486_s12, 1024, %s1215_s1, [#allocation21], %s12484_s0, %s12484_s0, %s12485_s23  }
  0xc6   : > { %p10320_p13 = pneg %p10319_p12 }
  0xc8   : > { %p10327_p5 = pnand %p10326_p2, %p10320_p13 }
  0xca   : > { %10330 = shalt.err (!%p10327_p5)
}
  0xcb   : > { %s12487_s4 = sld [smem:[#allocation89_spill]]  ;;  %s11191_s7 = smov [#allocation26]  }
  0xcc   : > { %s1269_s16 = sshll.u32 %s11191_s7, 4  ;;  %s11192_s26 = smov [#allocation29]   ;;  %s1270_s16 = int_to_ptr.vmem [resolvable:$true] %s1269_s16 }
  0xcd   : > { %s1296_s1 = sshll.u32 %s11192_s26, 4  ;;  %s10341_s10 = scalar_lea.vmem %s1270_s16, 768  ;;  %s1297_s1 = int_to_ptr.vmem [resolvable:$true] %s1296_s1 }
  0xce   : > { %p10342_p3 = scmp.ne.s32.totalorder %s1270_s16, %s10341_s10  ;;  %p10348_p5 = scmp.lt.s32.totalorder %s1270_s16, %s1270_s16 }
  0xcf   : > { %p10349_p6 = scmp.lt.s32.totalorder %s10341_s10, %s10341_s10 }
  0xd0   : > { %p10343_p4 = pnand %p10342_p3, %p9571_p10 }
  0xd1   : > { %9452 = dma.hbm_to_vmem [thread:$0]  (%p9571_p10), %s12487_s4, 512, %s1244_s11, [#allocation24], %s12484_s0, %s12484_s0, %s12485_s23  }
  0xd2   : > { %p10344_p7 = pneg %p10343_p4  ;;  %p10350_p8 = por %p10349_p6, %p10348_p5 }
  0xd4   : > { %p10351_p11 = pnand %p10350_p8, %p10344_p7 }
  0xd6   : > { %10354 = shalt.err (!%p10351_p11)
}
  0xd7   : > { %s12488_s2 = smov 4   ;;  %s12489_s11 = smov 64  }
  0xd8   : > { %9456 = dma.hbm_to_vmem [thread:$0]  (%p9571_p10), %s11327_s25, 768, %s1270_s16, [#allocation27], %s12489_s11, %s12489_s11, %s12488_s2  }
  0xd9   : > { %s10365_s7 = scalar_lea.vmem %s1297_s1, 16  ;;  %s10371_s26 = scalar_lea.vmem %s1297_s1, 32 }
  0xda   : > { %p10366_p12 = scmp.ne.s32.totalorder %s1297_s1, %s10365_s7  ;;  %p10372_p0 = scmp.lt.s32.totalorder %s1297_s1, %s1297_s1 }
  0xdb   : > { %p10373_p2 = scmp.lt.s32.totalorder %s10371_s26, %s10365_s7 }
  0xdc   : > { %p10367_p13 = pnand %p10366_p12, %p9571_p10 }
  0xdd   : > { %p10374_p3 = por %p10373_p2, %p10372_p0 }
  0xde   : > { %p10368_p1 = pneg %p10367_p13 }
  0xe0   : > { %p10375_p4 = pnand %p10374_p3, %p10368_p1 }
  0xe2   : > { %10378 = shalt.err (!%p10375_p4)
}
  0xe3   : > { %s12490_s5 = sld [smem:[#allocation92_spill]]  ;;  %s11193_s10 = smov [#allocation32]  }
  0xe4   : > { %s1319_s3 = sshll.u32 %s11193_s10, 4  ;;  %s11194_s4 = smov [#allocation35]   ;;  %s1320_s3 = int_to_ptr.vmem [resolvable:$true] %s1319_s3 }
  0xe5   : > { %s1345_s16 = sshll.u32 %s11194_s4, 4  ;;  %s10389_s12 = scalar_lea.vmem %s1320_s3, 512  ;;  %s1346_s16 = int_to_ptr.vmem [resolvable:$true] %s1345_s16 }
  0xe6   : > { %p10390_p7 = scmp.ne.s32.totalorder %s1320_s3, %s10389_s12  ;;  %p10396_p8 = scmp.lt.s32.totalorder %s1320_s3, %s1320_s3 }
  0xe7   : > { %p10397_p11 = scmp.lt.s32.totalorder %s10389_s12, %s10389_s12 }
  0xe8   : > { %p10391_p5 = pnand %p10390_p7, %p9571_p10 }
  0xe9   : > { %9460 = dma.hbm_to_vmem [thread:$0]  (%p9571_p10), %s12490_s5, 16, %s1297_s1, [#allocation30]  }
  0xea   : > { %p10392_p6 = pneg %p10391_p5  ;;  %p10398_p12 = por %p10397_p11, %p10396_p8 }
  0xec   : > { %p10399_p13 = pnand %p10398_p12, %p10392_p6 }
  0xee   : > { %10402 = shalt.err (!%p10399_p13)
}
  0xef   : > { %9464 = dma.hbm_to_vmem [thread:$0]  (%p9571_p10), %s11347_s20, 512, %s1320_s3, [#allocation33], %s12484_s0, %s12484_s0, %s12485_s23  }
  0xf0   : > { %s10413_s4 = scalar_lea.vmem %s1346_s16, 3072  ;;  %p10420_p3 = scmp.lt.s32.totalorder %s1346_s16, %s1346_s16 }
  0xf1   : > { %p10414_p1 = scmp.ne.s32.totalorder %s1346_s16, %s10413_s4  ;;  %p10421_p4 = scmp.lt.s32.totalorder %s10413_s4, %s10413_s4 }
  0xf3   : > { %p10415_p0 = pnand %p10414_p1, %p9571_p10  ;;  %p10422_p7 = por %p10421_p4, %p10420_p3 }
  0xf5   : > { %p10416_p2 = pneg %p10415_p0 }
  0xf7   : > { %p10423_p5 = pnand %p10422_p7, %p10416_p2 }
  0xf9   : > { %10426 = shalt.err (!%p10423_p5)
}
  0xfa   : > { %9468 = dma.hbm_to_vmem [thread:$0]  (%p9571_p10), %s11357_s6, 3072, %s1346_s16, [#allocation36], %s12489_s11, %s12489_s11, %s12488_s2  }
  0xfb   : > { %s11195_s12 = smov [#allocation38]   ;;  %s11196_s1 = smov [#allocation41]  }
  0xfc   : > { %s1369_s3 = sshll.u32 %s11195_s12, 4  ;;  %s1395_s7 = sshll.u32 %s11196_s1, 4  ;;  %s1370_s3 = int_to_ptr.vmem [resolvable:$true] %s1369_s3  ;;  %s1396_s7 = int_to_ptr.vmem [resolvable:$true] %s1395_s7 }
  0xfd   : > { %s10437_s26 = scalar_lea.vmem %s1370_s3, 512  ;;  %p10444_p12 = scmp.lt.s32.totalorder %s1370_s3, %s1370_s3 }
  0xfe   : > { %p10438_p6 = scmp.ne.s32.totalorder %s1370_s3, %s10437_s26  ;;  %p10445_p13 = scmp.lt.s32.totalorder %s10437_s26, %s10437_s26 }
 0x100   : > { %p10439_p8 = pnand %p10438_p6, %p9571_p10  ;;  %p10446_p1 = por %p10445_p13, %p10444_p12 }
 0x102   : > { %p10440_p11 = pneg %p10439_p8 }
 0x104   : > { %p10447_p0 = pnand %p10446_p1, %p10440_p11 }
 0x106   : > { %10450 = shalt.err (!%p10447_p0)
}
 0x107   : > { %9472 = dma.hbm_to_vmem [thread:$0]  (%p9571_p10), %s11367_s24, 512, %s1370_s3, [#allocation39], %s12484_s0, %s12484_s0, %s12485_s23  }
 0x108   : > { %s10461_s10 = scalar_lea.vmem %s1396_s7, 320  ;;  %p10468_p7 = scmp.lt.s32.totalorder %s1396_s7, %s1396_s7 }
 0x109   : > { %p10462_p2 = scmp.ne.s32.totalorder %s1396_s7, %s10461_s10  ;;  %p10469_p5 = scmp.lt.s32.totalorder %s10461_s10, %s10461_s10 }
 0x10b   : > { %p10463_p3 = pnand %p10462_p2, %p9571_p10  ;;  %p10470_p6 = por %p10469_p5, %p10468_p7 }
 0x10d   : > { %p10464_p4 = pneg %p10463_p3 }
 0x10f   : > { %p10471_p8 = pnand %p10470_p6, %p10464_p4 }
 0x111   : > { %10474 = shalt.err (!%p10471_p8)
}
 0x112   : > { %9476 = dma.hbm_to_vmem [thread:$0]  (%p9571_p10), %s11377_s8, 320, %s1396_s7, [#allocation42], %s12489_s11, %s12489_s11, %s12488_s2  }
 0x113   : > { %s11197_s16 = smov [#allocation44]   ;;  %s11198_s12 = smov [#allocation47]  }
 0x114   : > { %s1423_s4 = sshll.u32 %s11197_s16, 4  ;;  %s1446_s3 = sshll.u32 %s11198_s12, 4  ;;  %s1424_s4 = int_to_ptr.vmem [resolvable:$true] %s1423_s4  ;;  %s1447_s3 = int_to_ptr.vmem [resolvable:$true] %s1446_s3 }
 0x115   : > { %s10485_s1 = scalar_lea.vmem %s1424_s4, 128  ;;  %p10492_p1 = scmp.lt.s32.totalorder %s1424_s4, %s1424_s4 }
 0x116   : > { %p10486_p11 = scmp.ne.s32.totalorder %s1424_s4, %s10485_s1  ;;  %p10493_p0 = scmp.lt.s32.totalorder %s10485_s1, %s10485_s1 }
 0x118   : > { %p10487_p12 = pnand %p10486_p11, %p9571_p10  ;;  %p10494_p2 = por %p10493_p0, %p10492_p1 }
 0x11a   : > { %p10488_p13 = pneg %p10487_p12 }
 0x11c   : > { %p10495_p3 = pnand %p10494_p2, %p10488_p13 }
 0x11e   : > { %10498 = shalt.err (!%p10495_p3)
}
 0x11f   : > { %9480 = dma.hbm_to_vmem [thread:$0]  (%p9571_p10), %s11392_s27, 128, %s1424_s4, [#allocation45]  }
 0x120   : > { %s10509_s7 = scalar_lea.vmem %s1447_s3, 4096  ;;  %p10516_p6 = scmp.lt.s32.totalorder %s1447_s3, %s1447_s3 }
 0x121   : > { %p10510_p4 = scmp.ne.s32.totalorder %s1447_s3, %s10509_s7  ;;  %p10517_p8 = scmp.lt.s32.totalorder %s10509_s7, %s10509_s7 }
 0x123   : > { %p10511_p7 = pnand %p10510_p4, %p9571_p10  ;;  %p10518_p9 = por %p10517_p8, %p10516_p6 }
 0x125   : > { %p10512_p5 = pneg %p10511_p7 }
 0x127   : > { %p10519_p11 = pnand %p10518_p9, %p10512_p5 }
 0x129   : > { %10522 = shalt.err (!%p10519_p11)
}
 0x12a   : > { %s12491_s26 = sld [smem:[#allocation100_spill]]  ;;  %s11199_s10 = smov [#allocation50]  }
 0x12b   : > { %s1473_s16 = sshll.u32 %s11199_s10, 4  ;;  %s11200_s4 = smov [#allocation53]   ;;  %s1474_s16 = int_to_ptr.vmem [resolvable:$true] %s1473_s16 }
 0x12c   : > { %s1502_s12 = sshll.u32 %s11200_s4, 4  ;;  %s10533_s1 = scalar_lea.vmem %s1474_s16, 192  ;;  %s1503_s12 = int_to_ptr.vmem [resolvable:$true] %s1502_s12 }
 0x12d   : > { %p10534_p12 = scmp.ne.s32.totalorder %s1474_s16, %s10533_s1  ;;  %p10540_p1 = scmp.lt.s32.totalorder %s1474_s16, %s1474_s16 }
 0x12e   : > { %p10541_p0 = scmp.lt.s32.totalorder %s10533_s1, %s10533_s1 }
 0x12f   : > { %p10535_p13 = pnand %p10534_p12, %p9571_p10 }
 0x130   : > { %9484 = dma.hbm_to_vmem [thread:$0]  (%p9571_p10), %s12491_s26, 4096, %s1447_s3, [#allocation48], %s12489_s11, %s12489_s11, %s12488_s2  }
 0x131   : > { %p10536_p9 = pneg %p10535_p13  ;;  %p10542_p2 = por %p10541_p0, %p10540_p1 }
 0x133   : > { %p10543_p3 = pnand %p10542_p2, %p10536_p9 }
 0x135   : > { %10546 = shalt.err (!%p10543_p3)
}
 0x136   : > { %s12492_s3 = sld [smem:[#allocation103_spill]]  ;;  %s10557_s7 = scalar_lea.vmem %s1503_s12, 256 }
 0x137   : > { %p10558_p4 = scmp.ne.s32.totalorder %s1503_s12, %s10557_s7  ;;  %p10564_p6 = scmp.lt.s32.totalorder %s1503_s12, %s1503_s12 }
 0x138   : > { %p10565_p8 = scmp.lt.s32.totalorder %s10557_s7, %s10557_s7 }
 0x139   : > { %p10559_p7 = pnand %p10558_p4, %p9571_p10 }
 0x13a   : > { %p10566_p11 = por %p10565_p8, %p10564_p6 }
 0x13b   : > { %p10560_p5 = pneg %p10559_p7 }
 0x13c   : > { %9488 = dma.hbm_to_vmem [thread:$0]  (%p9571_p10), %s12492_s3, 192, %s1474_s16, [#allocation51], %s12489_s11, %s12489_s11, %s12488_s2  }
 0x13d   : > { %p10567_p12 = pnand %p10566_p11, %p10560_p5 }
 0x13f   : > { %10570 = shalt.err (!%p10567_p12)
}
 0x140   : > { %9492 = dma.hbm_to_vmem [thread:$0]  (%p9571_p10), %s11432_s9, 256, %s1503_s12, [#allocation54], %s12484_s0, %s12484_s0, %s12485_s23  }
 0x141   : > { %s11201_s26 = smov [#allocation2]   ;;  %s11202_s16 = smov [#allocation7]  }
 0x142   : > { %s1069_s10 = sshll.u32 %s11201_s26, 4  ;;  %s1095_s4 = sshll.u32 %s11202_s16, 4  ;;  %s1070_s10 = int_to_ptr.vmem [resolvable:$true] %s1069_s10  ;;  %s1096_s4 = int_to_ptr.vmem [resolvable:$true] %s1095_s4 }
 0x143   : > { %s10581_s1 = scalar_lea.vmem %s1070_s10, 5120  ;;  %p10588_p0 = scmp.lt.s32.totalorder %s1070_s10, %s1070_s10 }
 0x144   : > { %p10582_p13 = scmp.ne.s32.totalorder %s1070_s10, %s10581_s1  ;;  %p10589_p2 = scmp.lt.s32.totalorder %s10581_s1, %s10581_s1 }
 0x146   : > { %p10583_p9 = pnand %p10582_p13, %p9571_p10  ;;  %p10590_p3 = por %p10589_p2, %p10588_p0 }
 0x148   : > { %p10584_p1 = pneg %p10583_p9 }
 0x14a   : > { %p10591_p4 = pnand %p10590_p3, %p10584_p1 }
 0x14c   : > { %10594 = shalt.err (!%p10591_p4)
}
 0x14d   : > { %s12493_s12 = sld [smem:[#allocation77_spill]]  ;;  %s10605_s3 = scalar_lea.vmem %s1096_s4, 1024 }
 0x14e   : > { %p10606_p7 = scmp.ne.s32.totalorder %s1096_s4, %s10605_s3  ;;  %p10612_p8 = scmp.lt.s32.totalorder %s1096_s4, %s1096_s4 }
 0x14f   : > { %p10613_p11 = scmp.lt.s32.totalorder %s10605_s3, %s10605_s3 }
 0x150   : > { %p10607_p5 = pnand %p10606_p7, %p9571_p10 }
 0x151   : > { %p10614_p12 = por %p10613_p11, %p10612_p8 }
 0x152   : > { %p10608_p6 = pneg %p10607_p5 }
 0x153   : > { %9426 = dma.hbm_to_vmem [thread:$0]  (%p9571_p10), %s12493_s12, 5120, %s1070_s10, [#allocation3], %s12484_s0, %s12484_s0, %s12485_s23  }
 0x154   : > { %p10615_p13 = pnand %p10614_p12, %p10608_p6 }
 0x156   : > { %10618 = shalt.err (!%p10615_p13)
}
 0x157   : > { %s12494_s7 = sld [smem:[#allocation78_spill]]  ;;  %s11203_s26 = smov [#allocation10]  }
 0x158   : > { %s1124_s10 = sshll.u32 %s11203_s26, 4  ;;  %s11204_s16 = smov [#allocation13]   ;;  %s1125_s10 = int_to_ptr.vmem [resolvable:$true] %s1124_s10 }
 0x159   : > { %s1148_s1 = sshll.u32 %s11204_s16, 4  ;;  %s10629_s12 = scalar_lea.vmem %s1125_s10, 3072  ;;  %s1149_s1 = int_to_ptr.vmem [resolvable:$true] %s1148_s1 }
 0x15a   : > { %p10630_p9 = scmp.ne.s32.totalorder %s1125_s10, %s10629_s12  ;;  %p10636_p2 = scmp.lt.s32.totalorder %s1125_s10, %s1125_s10 }
 0x15b   : > { %p10637_p3 = scmp.lt.s32.totalorder %s10629_s12, %s10629_s12 }
 0x15c   : > { %p10631_p1 = pnand %p10630_p9, %p9571_p10 }
 0x15d   : > { %9430 = dma.hbm_to_vmem [thread:$0]  (%p9571_p10), %s12494_s7, 1024, %s1096_s4, [#allocation6], %s12484_s0, %s12484_s0, %s12485_s23  }
 0x15e   : > { %p10632_p0 = pneg %p10631_p1  ;;  %p10638_p4 = por %p10637_p3, %p10636_p2 }
 0x160   : > { %p10639_p7 = pnand %p10638_p4, %p10632_p0 }
 0x162   : > { %10642 = shalt.err (!%p10639_p7)
}
 0x163   : > { %s12495_s4 = sld [smem:[#allocation80_spill]]  ;;  %s10653_s3 = scalar_lea.vmem %s1149_s1, 1024 }
 0x164   : > { %p10654_p5 = scmp.ne.s32.totalorder %s1149_s1, %s10653_s3  ;;  %p10660_p11 = scmp.lt.s32.totalorder %s1149_s1, %s1149_s1 }
 0x165   : > { %p10661_p12 = scmp.lt.s32.totalorder %s10653_s3, %s10653_s3 }
 0x166   : > { %p10655_p6 = pnand %p10654_p5, %p9571_p10 }
 0x167   : > { %p10662_p13 = por %p10661_p12, %p10660_p11 }
 0x168   : > { %p10656_p8 = pneg %p10655_p6 }
 0x169   : > { %9434 = dma.hbm_to_vmem [thread:$0]  (%p9571_p10), %s12495_s4, 3072, %s1125_s10, [#allocation9], %s12489_s11, %s12489_s11, %s12488_s2  }
 0x16a   : > { %p10663_p9 = pnand %p10662_p13, %p10656_p8 }
 0x16c   : > { %10666 = shalt.err (!%p10663_p9)
}
 0x16d   : > { %s12496_s7 = sld [smem:[#allocation82_spill]]  ;;  %s11205_s26 = smov [#allocation16]  }
 0x16e   : > { %s1177_s10 = sshll.u32 %s11205_s26, 4  ;;  %s11206_s16 = smov [#allocation19]   ;;  %s1178_s10 = int_to_ptr.vmem [resolvable:$true] %s1177_s10 }
 0x16f   : > { %s1201_s12 = sshll.u32 %s11206_s16, 4  ;;  %s10677_s4 = scalar_lea.vmem %s1178_s10, 3072  ;;  %s1202_s12 = int_to_ptr.vmem [resolvable:$true] %s1201_s12 }
 0x170   : > { %p10678_p1 = scmp.ne.s32.totalorder %s1178_s10, %s10677_s4  ;;  %p10684_p3 = scmp.lt.s32.totalorder %s1178_s10, %s1178_s10 }
 0x171   : > { %p10685_p4 = scmp.lt.s32.totalorder %s10677_s4, %s10677_s4 }
 0x172   : > { %p10679_p0 = pnand %p10678_p1, %p9571_p10 }
 0x173   : > { %9438 = dma.hbm_to_vmem [thread:$0]  (%p9571_p10), %s12496_s7, 1024, %s1149_s1, [#allocation12], %s12484_s0, %s12484_s0, %s12485_s23  }
 0x174   : > { %p10680_p2 = pneg %p10679_p0  ;;  %p10686_p7 = por %p10685_p4, %p10684_p3 }
 0x176   : > { %p10687_p5 = pnand %p10686_p7, %p10680_p2 }
 0x178   : > { %10690 = shalt.err (!%p10687_p5)
}
 0x179   : > { %s12497_s1 = sld [smem:[#allocation84_spill]]  ;;  %s10701_s3 = scalar_lea.vmem %s1202_s12, 1024 }
 0x17a   : > { %p10702_p6 = scmp.ne.s32.totalorder %s1202_s12, %s10701_s3  ;;  %p10708_p12 = scmp.lt.s32.totalorder %s1202_s12, %s1202_s12 }
 0x17b   : > { %p10709_p13 = scmp.lt.s32.totalorder %s10701_s3, %s10701_s3 }
 0x17c   : > { %p10703_p8 = pnand %p10702_p6, %p9571_p10 }
 0x17d   : > { %p10710_p9 = por %p10709_p13, %p10708_p12 }
 0x17e   : > { %p10704_p11 = pneg %p10703_p8 }
 0x17f   : > { %9442 = dma.hbm_to_vmem [thread:$0]  (%p9571_p10), %s12497_s1, 3072, %s1178_s10, [#allocation15], %s12489_s11, %s12489_s11, %s12488_s2  }
 0x180   : > { %p10711_p1 = pnand %p10710_p9, %p10704_p11 }
 0x182   : > { %10714 = shalt.err (!%p10711_p1)
}
 0x183   : > { %s12498_s7 = sld [smem:[#allocation85_spill]]  ;;  %s11207_s26 = smov [#allocation22]  }
 0x184   : > { %s1227_s10 = sshll.u32 %s11207_s26, 4  ;;  %s11208_s16 = smov [#allocation25]   ;;  %s1228_s10 = int_to_ptr.vmem [resolvable:$true] %s1227_s10 }
 0x185   : > { %s1256_s4 = sshll.u32 %s11208_s16, 4  ;;  %s10725_s1 = scalar_lea.vmem %s1228_s10, 1280  ;;  %s1257_s4 = int_to_ptr.vmem [resolvable:$true] %s1256_s4 }
 0x186   : > { %p10726_p0 = scmp.ne.s32.totalorder %s1228_s10, %s10725_s1  ;;  %p10732_p4 = scmp.lt.s32.totalorder %s1228_s10, %s1228_s10 }
 0x187   : > { %p10733_p7 = scmp.lt.s32.totalorder %s10725_s1, %s10725_s1 }
 0x188   : > { %p10727_p2 = pnand %p10726_p0, %p9571_p10 }
 0x189   : > { %9446 = dma.hbm_to_vmem [thread:$0]  (%p9571_p10), %s12498_s7, 1024, %s1202_s12, [#allocation18], %s12484_s0, %s12484_s0, %s12485_s23  }
 0x18a   : > { %p10728_p3 = pneg %p10727_p2  ;;  %p10734_p5 = por %p10733_p7, %p10732_p4 }
 0x18c   : > { %p10735_p6 = pnand %p10734_p5, %p10728_p3 }
 0x18e   : > { %10738 = shalt.err (!%p10735_p6)
}
 0x18f   : > { %s12499_s12 = sld [smem:[#allocation87_spill]]  ;;  %s10749_s3 = scalar_lea.vmem %s1257_s4, 512 }
 0x190   : > { %p10750_p8 = scmp.ne.s32.totalorder %s1257_s4, %s10749_s3  ;;  %p10756_p13 = scmp.lt.s32.totalorder %s1257_s4, %s1257_s4 }
 0x191   : > { %p10757_p9 = scmp.lt.s32.totalorder %s10749_s3, %s10749_s3 }
 0x192   : > { %p10751_p11 = pnand %p10750_p8, %p9571_p10 }
 0x193   : > { %p10758_p1 = por %p10757_p9, %p10756_p13 }
 0x194   : > { %p10752_p12 = pneg %p10751_p11 }
 0x195   : > { %9450 = dma.hbm_to_vmem [thread:$0]  (%p9571_p10), %s12499_s12, 1280, %s1228_s10, [#allocation21], %s12489_s11, %s12489_s11, %s12488_s2  }
 0x196   : > { %p10759_p0 = pnand %p10758_p1, %p10752_p12 }
 0x198   : > { %10762 = shalt.err (!%p10759_p0)
}
 0x199   : > { %s12500_s7 = sld [smem:[#allocation90_spill]]  ;;  %s11209_s26 = smov [#allocation28]  }
 0x19a   : > { %s1282_s10 = sshll.u32 %s11209_s26, 4  ;;  %s11210_s16 = smov [#allocation31]   ;;  %s1283_s10 = int_to_ptr.vmem [resolvable:$true] %s1282_s10 }
 0x19b   : > { %s1306_s1 = sshll.u32 %s11210_s16, 4  ;;  %s10773_s12 = scalar_lea.vmem %s1283_s10, 3072  ;;  %s1307_s1 = int_to_ptr.vmem [resolvable:$true] %s1306_s1 }
 0x19c   : > { %p10774_p2 = scmp.ne.s32.totalorder %s1283_s10, %s10773_s12  ;;  %p10780_p7 = scmp.lt.s32.totalorder %s1283_s10, %s1283_s10 }
 0x19d   : > { %p10781_p5 = scmp.lt.s32.totalorder %s10773_s12, %s10773_s12 }
 0x19e   : > { %p10775_p3 = pnand %p10774_p2, %p9571_p10 }
 0x19f   : > { %9454 = dma.hbm_to_vmem [thread:$0]  (%p9571_p10), %s12500_s7, 512, %s1257_s4, [#allocation24], %s12484_s0, %s12484_s0, %s12485_s23  }
 0x1a0   : > { %p10776_p4 = pneg %p10775_p3  ;;  %p10782_p6 = por %p10781_p5, %p10780_p7 }
 0x1a2   : > { %p10783_p8 = pnand %p10782_p6, %p10776_p4 }
 0x1a4   : > { %10786 = shalt.err (!%p10783_p8)
}
 0x1a5   : > { %s12501_s4 = sld [smem:[#allocation91_spill]]  ;;  %s10797_s3 = scalar_lea.vmem %s1307_s1, 512 }
 0x1a6   : > { %p10798_p11 = scmp.ne.s32.totalorder %s1307_s1, %s10797_s3  ;;  %p10804_p9 = scmp.lt.s32.totalorder %s1307_s1, %s1307_s1 }
 0x1a7   : > { %p10805_p1 = scmp.lt.s32.totalorder %s10797_s3, %s10797_s3 }
 0x1a8   : > { %p10799_p12 = pnand %p10798_p11, %p9571_p10 }
 0x1a9   : > { %p10806_p0 = por %p10805_p1, %p10804_p9 }
 0x1aa   : > { %p10800_p13 = pneg %p10799_p12 }
 0x1ab   : > { %9458 = dma.hbm_to_vmem [thread:$0]  (%p9571_p10), %s12501_s4, 3072, %s1283_s10, [#allocation27], %s12489_s11, %s12489_s11, %s12488_s2  }
 0x1ac   : > { %p10807_p2 = pnand %p10806_p0, %p10800_p13 }
 0x1ae   : > { %10810 = shalt.err (!%p10807_p2)
}
 0x1af   : > { %s12502_s7 = sld [smem:[#allocation93_spill]]  ;;  %s11211_s26 = smov [#allocation34]  }
 0x1b0   : > { %s1332_s10 = sshll.u32 %s11211_s26, 4  ;;  %s11212_s16 = smov [#allocation37]   ;;  %s1333_s10 = int_to_ptr.vmem [resolvable:$true] %s1332_s10 }
 0x1b1   : > { %s1359_s12 = sshll.u32 %s11212_s16, 4  ;;  %s10821_s4 = scalar_lea.vmem %s1333_s10, 768  ;;  %s1360_s12 = int_to_ptr.vmem [resolvable:$true] %s1359_s12 }
 0x1b2   : > { %p10822_p3 = scmp.ne.s32.totalorder %s1333_s10, %s10821_s4  ;;  %p10828_p5 = scmp.lt.s32.totalorder %s1333_s10, %s1333_s10 }
 0x1b3   : > { %p10829_p6 = scmp.lt.s32.totalorder %s10821_s4, %s10821_s4 }
 0x1b4   : > { %p10823_p4 = pnand %p10822_p3, %p9571_p10 }
 0x1b5   : > { %9462 = dma.hbm_to_vmem [thread:$0]  (%p9571_p10), %s12502_s7, 512, %s1307_s1, [#allocation30], %s12484_s0, %s12484_s0, %s12485_s23  }
 0x1b6   : > { %p10824_p7 = pneg %p10823_p4  ;;  %p10830_p8 = por %p10829_p6, %p10828_p5 }
 0x1b8   : > { %p10831_p11 = pnand %p10830_p8, %p10824_p7 }
 0x1ba   : > { %10834 = shalt.err (!%p10831_p11)
}
 0x1bb   : > { %s12503_s1 = sld [smem:[#allocation94_spill]]  ;;  %s10845_s3 = scalar_lea.vmem %s1360_s12, 16 }
 0x1bc   : > { %p10846_p12 = scmp.ne.s32.totalorder %s1360_s12, %s10845_s3  ;;  %s10851_s7 = scalar_lea.vmem %s1360_s12, 32 }
 0x1bd   : > { %p10852_p1 = scmp.lt.s32.totalorder %s1360_s12, %s1360_s12  ;;  %p10853_p0 = scmp.lt.s32.totalorder %s10851_s7, %s10845_s3 }
 0x1be   : > { %p10847_p13 = pnand %p10846_p12, %p9571_p10 }
 0x1bf   : > { %p10854_p2 = por %p10853_p0, %p10852_p1 }
 0x1c0   : > { %p10848_p9 = pneg %p10847_p13 }
 0x1c1   : > { %9466 = dma.hbm_to_vmem [thread:$0]  (%p9571_p10), %s12503_s1, 768, %s1333_s10, [#allocation33], %s12489_s11, %s12489_s11, %s12488_s2  }
 0x1c2   : > { %p10855_p3 = pnand %p10854_p2, %p10848_p9 }
 0x1c4   : > { %10858 = shalt.err (!%p10855_p3)
}
 0x1c5   : > { %s12504_s26 = sld [smem:[#allocation95_spill]]  ;;  %s11213_s16 = smov [#allocation40]  }
 0x1c6   : > { %s1382_s4 = sshll.u32 %s11213_s16, 4  ;;  %s11214_s10 = smov [#allocation43]   ;;  %s1383_s4 = int_to_ptr.vmem [resolvable:$true] %s1382_s4 }
 0x1c7   : > { %s1412_s1 = sshll.u32 %s11214_s10, 4  ;;  %s10869_s5 = scalar_lea.vmem %s1383_s4, 512  ;;  %s1413_s1 = int_to_ptr.vmem [resolvable:$true] %s1412_s1 }
 0x1c8   : > { %p10870_p4 = scmp.ne.s32.totalorder %s1383_s4, %s10869_s5  ;;  %p10876_p6 = scmp.lt.s32.totalorder %s1383_s4, %s1383_s4 }
 0x1c9   : > { %p10877_p8 = scmp.lt.s32.totalorder %s10869_s5, %s10869_s5 }
 0x1ca   : > { %p10871_p7 = pnand %p10870_p4, %p9571_p10 }
 0x1cb   : > { %9470 = dma.hbm_to_vmem [thread:$0]  (%p9571_p10), %s12504_s26, 16, %s1360_s12, [#allocation36]  }
 0x1cc   : > { %p10872_p5 = pneg %p10871_p7  ;;  %p10878_p11 = por %p10877_p8, %p10876_p6 }
 0x1ce   : > { %p10879_p12 = pnand %p10878_p11, %p10872_p5 }
 0x1d0   : > { %10882 = shalt.err (!%p10879_p12)
}
 0x1d1   : > { %s12505_s12 = sld [smem:[#allocation96_spill]]  ;;  %s10893_s3 = scalar_lea.vmem %s1413_s1, 128 }
 0x1d2   : > { %p10894_p13 = scmp.ne.s32.totalorder %s1413_s1, %s10893_s3  ;;  %p10900_p0 = scmp.lt.s32.totalorder %s1413_s1, %s1413_s1 }
 0x1d3   : > { %p10901_p2 = scmp.lt.s32.totalorder %s10893_s3, %s10893_s3 }
 0x1d4   : > { %p10895_p9 = pnand %p10894_p13, %p9571_p10 }
 0x1d5   : > { %p10902_p3 = por %p10901_p2, %p10900_p0 }
 0x1d6   : > { %p10896_p1 = pneg %p10895_p9 }
 0x1d7   : > { %9474 = dma.hbm_to_vmem [thread:$0]  (%p9571_p10), %s12505_s12, 512, %s1383_s4, [#allocation39], %s12484_s0, %s12484_s0, %s12485_s23  }
 0x1d8   : > { %p10903_p4 = pnand %p10902_p3, %p10896_p1 }
 0x1da   : > { %10906 = shalt.err (!%p10903_p4)
}
 0x1db   : > { %s12506_s5 = sld [smem:[#allocation98_spill]]  ;;  %s11215_s7 = smov [#allocation46]  }
 0x1dc   : > { %s1433_s26 = sshll.u32 %s11215_s7, 4  ;;  %s11216_s16 = smov [#allocation49]   ;;  %s1434_s26 = int_to_ptr.vmem [resolvable:$true] %s1433_s26 }
 0x1dd   : > { %s1460_s4 = sshll.u32 %s11216_s16, 4  ;;  %s10917_s10 = scalar_lea.vmem %s1434_s26, 256  ;;  %s1461_s4 = int_to_ptr.vmem [resolvable:$true] %s1460_s4 }
 0x1de   : > { %p10918_p7 = scmp.ne.s32.totalorder %s1434_s26, %s10917_s10  ;;  %p10924_p8 = scmp.lt.s32.totalorder %s1434_s26, %s1434_s26 }
 0x1df   : > { %p10925_p11 = scmp.lt.s32.totalorder %s10917_s10, %s10917_s10 }
 0x1e0   : > { %p10919_p5 = pnand %p10918_p7, %p9571_p10 }
 0x1e1   : > { %9478 = dma.hbm_to_vmem [thread:$0]  (%p9571_p10), %s12506_s5, 128, %s1413_s1, [#allocation42]  }
 0x1e2   : > { %p10920_p6 = pneg %p10919_p5  ;;  %p10926_p12 = por %p10925_p11, %p10924_p8 }
 0x1e4   : > { %p10927_p13 = pnand %p10926_p12, %p10920_p6 }
 0x1e6   : > { %10930 = shalt.err (!%p10927_p13)
}
 0x1e7   : > { %s12507_s1 = sld [smem:[#allocation99_spill]]  ;;  %s10941_s12 = scalar_lea.vmem %s1461_s4, 64 }
 0x1e8   : > { %p10942_p9 = scmp.ne.s32.totalorder %s1461_s4, %s10941_s12  ;;  %p10948_p2 = scmp.lt.s32.totalorder %s1461_s4, %s1461_s4 }
 0x1e9   : > { %p10949_p3 = scmp.lt.s32.totalorder %s10941_s12, %s10941_s12 }
 0x1ea   : > { %p10943_p1 = pnand %p10942_p9, %p9571_p10 }
 0x1eb   : > { %p10950_p4 = por %p10949_p3, %p10948_p2 }
 0x1ec   : > { %p10944_p0 = pneg %p10943_p1 }
 0x1ed   : > { %9482 = dma.hbm_to_vmem [thread:$0]  (%p9571_p10), %s12507_s1, 256, %s1434_s26, [#allocation45], %s12489_s11, %s12489_s11, %s12488_s2  }
 0x1ee   : > { %p10951_p7 = pnand %p10950_p4, %p10944_p0 }
 0x1f0   : > { %10954 = shalt.err (!%p10951_p7)
}
 0x1f1   : > { %s12508_s3 = sld [smem:[#allocation101_spill]]  ;;  %s11217_s5 = smov [#allocation52]  }
 0x1f2   : > { %s1489_s7 = sshll.u32 %s11217_s5, 4  ;;  %s11218_s2 = smov [#allocation55]   ;;  %s1490_s7 = int_to_ptr.vmem [resolvable:$true] %s1489_s7 }
 0x1f3   : > { %s1519_s11 = sshll.u32 %s11218_s2, 4  ;;  %s10965_s26 = scalar_lea.vmem %s1490_s7, 256  ;;  %s1520_s11 = int_to_ptr.vmem [resolvable:$true] %s1519_s11 }
 0x1f4   : > { %p10966_p5 = scmp.ne.s32.totalorder %s1490_s7, %s10965_s26  ;;  %p10972_p11 = scmp.lt.s32.totalorder %s1490_s7, %s1490_s7 }
 0x1f5   : > { %p10973_p12 = scmp.lt.s32.totalorder %s10965_s26, %s10965_s26 }
 0x1f6   : > { %p10967_p6 = pnand %p10966_p5, %p9571_p10 }
 0x1f7   : > { %9486 = dma.hbm_to_vmem [thread:$0]  (%p9571_p10), %s12508_s3, 64, %s1461_s4, [#allocation48]  }
 0x1f8   : > { %p10968_p8 = pneg %p10967_p6  ;;  %p10974_p13 = por %p10973_p12, %p10972_p11 }
 0x1fa   : > { %p10975_p9 = pnand %p10974_p13, %p10968_p8 }
 0x1fc   : > { %10978 = shalt.err (!%p10975_p9)
}
 0x1fd   : > { %s12509_s16 = sld [smem:[#allocation105_spill]]  ;;  %s10989_s4 = scalar_lea.vmem %s1520_s11, 16 }
 0x1fe   : > { %p10990_p1 = scmp.ne.s32.totalorder %s1520_s11, %s10989_s4  ;;  %s10995_s10 = scalar_lea.vmem %s1520_s11, 32 }
 0x1ff   : > { %p10996_p3 = scmp.lt.s32.totalorder %s1520_s11, %s1520_s11  ;;  %p10997_p4 = scmp.lt.s32.totalorder %s10995_s10, %s10989_s4 }
 0x200   : > { %p10991_p0 = pnand %p10990_p1, %p9571_p10 }
 0x201   : > { %p10998_p7 = por %p10997_p4, %p10996_p3 }
 0x202   : > { %p10992_p2 = pneg %p10991_p0 }
 0x203   : > { %9490 = dma.hbm_to_vmem [thread:$0]  (%p9571_p10), %s12509_s16, 256, %s1490_s7, [#allocation51], %s12484_s0, %s12484_s0, %s12485_s23  }
 0x204   : > { %p10999_p5 = pnand %p10998_p7, %p10992_p2 }
 0x206   : > { %11002 = shalt.err (!%p10999_p5)
}
 0x207   : > { %9494 = dma.hbm_to_vmem [thread:$0]  (%p9571_p10), %s11442_s19, 16, %s1520_s11, [#allocation54]  }
 0x208 PF: > { %p12510_p6 = scmp.ne.s32.totalorder %s12482_s18, 0 }
 0x209   : > { %p9606_p8 = scmp.eq.s32.totalorder (!%p12510_p6), %s11470_s28, 0 }
 0x20a   : > { %1540 = sbr.rel (%p12510_p6) target bundleno = 6880 (0x1ae0), region = 192 }
 0x20f   : > { %11046 = dma.done.wait (%p9606_p8), [#allocation3], 5120  }
 0x210   : > { %11048 = vsyncadd (%p9606_p8), [#allocation3], 4294962176 }
 0x211   : > { %11050 = dma.done.wait (%p9606_p8), [#allocation6], 6144  }
 0x212   : > { %11052 = vsyncadd (%p9606_p8), [#allocation6], 4294961152 }
 0x213   : > { %11054 = dma.done.wait (%p9606_p8), [#allocation9], 4096  }
 0x214   : > { %11056 = vsyncadd (%p9606_p8), [#allocation9], 4294963200 }
 0x215   : > { %11058 = dma.done.wait (%p9606_p8), [#allocation12], 1040  }
 0x216   : > { %11060 = vsyncadd (%p9606_p8), [#allocation12], 4294966256 }
 0x217   : > { %11062 = dma.done.wait (%p9606_p8), [#allocation15], 4096  }
 0x218   : > { %11064 = vsyncadd (%p9606_p8), [#allocation15], 4294963200 }
 0x219   : > { %11066 = dma.done.wait (%p9606_p8), [#allocation18], 1040  }
 0x21a   : > { %11068 = vsyncadd (%p9606_p8), [#allocation18], 4294966256 }
 0x21b   : > { %11070 = dma.done.wait (%p9606_p8), [#allocation21], 2304  }
 0x21c   : > { %11072 = vsyncadd (%p9606_p8), [#allocation21], 4294964992 }
 0x21d   : > { %11074 = dma.done.wait (%p9606_p8), [#allocation24], 1024  }
 0x21e   : > { %11076 = vsyncadd (%p9606_p8), [#allocation24], 4294966272 }
 0x21f   : > { %11078 = dma.done.wait (%p9606_p8), [#allocation27], 3840  }
 0x220   : > { %11080 = vsyncadd (%p9606_p8), [#allocation27], 4294963456 }
 0x221   : > { %11082 = dma.done.wait (%p9606_p8), [#allocation30], 528  }
 0x222   : > { %11084 = vsyncadd (%p9606_p8), [#allocation30], 4294966768 }
 0x223   : > { %11086 = dma.done.wait (%p9606_p8), [#allocation33], 1280  }
 0x224   : > { %11088 = vsyncadd (%p9606_p8), [#allocation33], 4294966016 }
 0x225   : > { %11090 = dma.done.wait (%p9606_p8), [#allocation36], 3088  }
 0x226   : > { %11092 = vsyncadd (%p9606_p8), [#allocation36], 4294964208 }
 0x227   : > { %11094 = dma.done.wait (%p9606_p8), [#allocation39], 1024  }
 0x228   : > { %11096 = vsyncadd (%p9606_p8), [#allocation39], 4294966272 }
 0x229   : > { %11098 = dma.done.wait (%p9606_p8), [#allocation42], 448  }
 0x22a   : > { %11100 = vsyncadd (%p9606_p8), [#allocation42], 4294966848 }
 0x22b   : > { %11102 = dma.done.wait (%p9606_p8), [#allocation45], 384  }
 0x22c   : > { %11104 = vsyncadd (%p9606_p8), [#allocation45], 4294966912 }
 0x22d   : > { %11106 = dma.done.wait (%p9606_p8), [#allocation48], 4160  }
 0x22e   : > { %11108 = vsyncadd (%p9606_p8), [#allocation48], 4294963136 }
 0x22f   : > { %11110 = dma.done.wait (%p9606_p8), [#allocation51], 448  }
 0x230   : > { %11112 = vsyncadd (%p9606_p8), [#allocation51], 4294966848 }
 0x231   : > { %11114 = dma.done.wait (%p9606_p8), [#allocation54], 272  }
 0x232   : > { %11116 = vsyncadd (%p9606_p8), [#allocation54], 4294967024  ;;  %s12511_s18 = sld [smem:[#allocation76_spill]]  ;;  %p1779_p10 = scmp.lt.s32.totalorder %s11470_s28, 1  ;;  %v11219_v0 = vmov 0   ;;  %vm2111_vm0 = vcmask 7168  }
 0x233   : > { %2178 = vmatprep.subr.bf16.mxu0 %v11219_v0  ;;  %9761 = vset.pattern.permute.xlu1 %v11219_v0  ;;  %v9764_v9 = vld [vmem:[#allocation2 + $0x4] ss:$8 sps:$4 sm:$0xff]   ;;  %vm2172_vm1 = vcmask 1040384   ;;  %v9762_v30 = vld [vmem:[#allocation2] ss:$8 sps:$4 sm:$0xff]   ;;  %v9822_v50 = vld [vmem:[#allocation5 + $0x78] sm:$0xff]  }
 0x234   : > { %s1780_s0 = scalar_select %p1779_p10, %s11470_s28, 1  ;;  %9760 = vset.pattern.permute.xlu0 %v11219_v0  ;;  %8123 = vmatprep.mubr.msk.bf16.mxu0 %vm2111_vm0, %v9764_v9  ;;  %v2174_v28 = vsel %vm2172_vm1, 65535, %v11219_v0  ;;  %v9765_v31 = vld [vmem:[#allocation2 + $0x14] ss:$8 sps:$4 sm:$0xff]   ;;  %v9767_v32 = vld [vmem:[#allocation2 + $0x10] ss:$8 sps:$4 sm:$0xff]  }
 0x235   : > { %v9768_v33 = vld [vmem:[#allocation2 + $0x24] ss:$8 sps:$4 sm:$0xff]   ;;  %v9770_v34 = vld [vmem:[#allocation2 + $0x20] ss:$8 sps:$4 sm:$0xff]   ;;  %v9771_v35 = vld [vmem:[#allocation2 + $0x34] ss:$8 sps:$4 sm:$0xff]   ;;  %8528 = vmatprep.subr.bf16.mxu1 %v9822_v50 }
 0x236   : > { %s9392_s23 = smul.u32 136, %s1780_s0  ;;  %v9773_v36 = vld [vmem:[#allocation2 + $0x30] ss:$8 sps:$4 sm:$0xff]   ;;  %v9774_v37 = vld [vmem:[#allocation2 + $0x44] ss:$8 sps:$4 sm:$0xff]   ;;  %s12512_s12 = sld [smem:[#allocation79_spill]] }
 0x237   : > { %v9776_v38 = vld [vmem:[#allocation2 + $0x40] ss:$8 sps:$4 sm:$0xff]   ;;  %v9777_v39 = vld [vmem:[#allocation2 + $0x54] ss:$8 sps:$4 sm:$0xff]   ;;  %v9779_v40 = vld [vmem:[#allocation2 + $0x50] ss:$8 sps:$4 sm:$0xff]  }
 0x238   : > { %s11838_s1 = scalar_lea.vmem %s12511_s18, %s9392_s23  ;;  %v9780_v41 = vld [vmem:[#allocation2 + $0x64] ss:$8 sps:$4 sm:$0xff]   ;;  %v9782_v42 = vld [vmem:[#allocation2 + $0x60] ss:$8 sps:$4 sm:$0xff]   ;;  %v9783_v43 = vld [vmem:[#allocation2 + $0x74] ss:$8 sps:$4 sm:$0xff]  }
 0x239   : > { %v1799_v1 = vld [vmem:[%s11838_s1 + $0x70] sm:$0xff]  ;;  %v1800_v2 = vld [vmem:[%s11838_s1 + $0x78] sm:$0xff]  ;;  %v1797_v3 = vld [vmem:[%s11838_s1 + $0x60] sm:$0xff]  ;;  %vm2848_vm2 = vcmask 1046528   ;;  %vm3069_vm3 = vcmask 515072   ;;  %vm3106_vm4 = vcmask 1047552  }
 0x23a   : > { %v1929_v4 = vpack.c.bf16 %v1800_v2, %v1799_v1  ;;  %v1798_v5 = vld [vmem:[%s11838_s1 + $0x68] sm:$0xff]  ;;  %v1795_v7 = vld [vmem:[%s11838_s1 + $0x50] sm:$0xff]  ;;  %v1796_v8 = vld [vmem:[%s11838_s1 + $0x58] sm:$0xff]  ;;  %s12513_s7 = sld [smem:[#allocation83_spill]]  ;;  %vm5206_vm5 = vcmask 252928   ;;  %vm11222_vm6 = vmmov 0  }
 0x23b   : > { %v1928_v6 = vpack.c.bf16 %v1798_v5, %v1797_v3  ;;  %v1927_v10 = vpack.c.bf16 %v1796_v8, %v1795_v7  ;;  %v1793_v11 = vld [vmem:[%s11838_s1 + $0x40] sm:$0xff]  ;;  %v1794_v12 = vld [vmem:[%s11838_s1 + $0x48] sm:$0xff]  ;;  %v1791_v14 = vld [vmem:[%s11838_s1 + $0x30] sm:$0xff]  ;;  %s12514_s26 = sld [smem:[#allocation88_spill]]  ;;  %vm6795_vm7 = vcmask 64512   ;;  %vm6802_vm8 = vcmask 1043456  }
 0x23c   : > { %2179 = vmatpush1.bf16.msra.mxu0 %v1929_v4  ;;  %v1926_v13 = vpack.c.bf16 %v1794_v12, %v1793_v11  ;;  %v1792_v15 = vld [vmem:[%s11838_s1 + $0x38] sm:$0xff]  ;;  %v1789_v17 = vld [vmem:[%s11838_s1 + $0x20] sm:$0xff]  ;;  %v1790_v18 = vld [vmem:[%s11838_s1 + $0x28] sm:$0xff]  ;;  %vm7133_vm9 = vcmask 1042432   ;;  %vm7228_vm10 = vcmask 23552   ;;  %vm7235_vm11 = vcmask 1041408  }
 0x23d   : > { %2180 = vmatprep.subr.bf16.mxu0 %v11219_v0  ;;  %v1925_v16 = vpack.c.bf16 %v1792_v15, %v1791_v14  ;;  %v1924_v19 = vpack.c.bf16 %v1790_v18, %v1789_v17  ;;  %v1787_v20 = vld [vmem:[%s11838_s1 + $0x10] sm:$0xff]  ;;  %v1788_v21 = vld [vmem:[%s11838_s1 + $0x18] sm:$0xff]  ;;  %v1785_v22 = vld [vmem:[%s11838_s1] sm:$0xff]  ;;  %vm7560_vm12 = vcmask 57344   ;;  %p12519_p12 = scmp.ne.s32.totalorder %s12479_s15, 0 }
 0x23e   : > { %v1923_v23 = vpack.c.bf16 %v1788_v21, %v1787_v20  ;;  %v1786_v24 = vld [vmem:[%s11838_s1 + $0x8] sm:$0xff]  ;;  %v1801_v25 = vld [vmem:[%s11838_s1 + $0x80] sm:$0x1]  ;;  %v9785_v44 = vld [vmem:[#allocation2 + $0x70] ss:$8 sps:$4 sm:$0xff]  }
 0x23f   : > { %v1922_v26 = vpack.c.bf16 %v1786_v24, %v1785_v22  ;;  %v1930_v27 = vpack.c.bf16 %v1801_v25, %v1801_v25  ;;  %v9786_v45 = vld [vmem:[#allocation2 + $0x84] ss:$8 sps:$4 sm:$0xff]   ;;  %v9788_v46 = vld [vmem:[#allocation2 + $0x80] ss:$8 sps:$4 sm:$0xff]   ;;  %v9789_v47 = vld [vmem:[#allocation2 + $0x94] ss:$8 sps:$4 sm:$0xff]  }
 0x240   : > { %2181 = vmatpush1.bf16.msra.mxu0 %v1928_v6  ;;  %v9791_v48 = vld [vmem:[#allocation2 + $0x90] ss:$8 sps:$4 sm:$0xff]   ;;  %v9792_v49 = vld [vmem:[#allocation2 + $0xa4] ss:$8 sps:$4 sm:$0xff]   ;;  %v9794_v52 = vld [vmem:[#allocation2 + $0xa0] ss:$8 sps:$4 sm:$0xff]  }
 0x241   : > { %2182 = vmatprep.subr.bf16.mxu0 %v11219_v0  ;;  %v2176_v29 = vand.u32 %v2174_v28, %v1930_v27  ;;  %v9823_v51 = vld [vmem:[#allocation5 + $0x38] sm:$0xff]   ;;  %v9824_v53 = vld [vmem:[#allocation5 + $0x70] sm:$0xff]   ;;  %v9826_v56 = vld [vmem:[#allocation5 + $0x68] sm:$0xff]   ;;  %s12515_s16 = smov %s12514_s26 }
 0x242   : > { %8529 = vmatpush3.bf16.msra.mxu1 %v9823_v51  ;;  %v9795_v54 = vld [vmem:[#allocation2 + $0xb4] ss:$8 sps:$4 sm:$0xff]   ;;  %v9827_v57 = vld [vmem:[#allocation5 + $0x28] sm:$0xff]   ;;  %v9797_v58 = vld [vmem:[#allocation2 + $0xb0] ss:$8 sps:$4 sm:$0xff]  }
 0x243   : > { %v9825_v55 = vld [vmem:[#allocation5 + $0x30] sm:$0xff]   ;;  %8530 = vmatprep.subr.bf16.mxu1 %v9824_v53  ;;  %v9828_v59 = vld [vmem:[#allocation5 + $0x60] sm:$0xff]   ;;  %v9830_v62 = vld [vmem:[#allocation5 + $0x58] sm:$0xff]  }
 0x244   : > { %2183 = vmatpush1.bf16.msra.mxu0 %v1927_v10  ;;  %v9798_v60 = vld [vmem:[#allocation2 + $0xc4] ss:$8 sps:$4 sm:$0xff]   ;;  %v9831_v63 = vld [vmem:[#allocation5 + $0x18] sm:$0xff]   ;;  %v9832_v1 = vld [vmem:[#allocation5 + $0x50] sm:$0xff]  }
 0x245   : > { %2184 = vmatprep.subr.bf16.mxu0 %v11219_v0  ;;  %v9829_v61 = vld [vmem:[#allocation5 + $0x20] sm:$0xff]   ;;  %v9801_v2 = vld [vmem:[#allocation2 + $0xd4] ss:$8 sps:$4 sm:$0xff]   ;;  %v9834_v4 = vld [vmem:[#allocation5 + $0x48] sm:$0xff]  }
 0x246   : > { %8531 = vmatpush3.bf16.msra.mxu1 %v9825_v55  ;;  %v9833_v3 = vld [vmem:[#allocation5 + $0x10] sm:$0xff]   ;;  %v9835_v5 = vld [vmem:[#allocation5 + $0x8] sm:$0xff]   ;;  %v9836_v7 = vld [vmem:[#allocation5 + $0x40] sm:$0xff]  }
 0x247   : > { %8532 = vmatprep.subr.bf16.mxu1 %v9826_v56  ;;  %v9803_v6 = vld [vmem:[#allocation2 + $0xd0] ss:$8 sps:$4 sm:$0xff]   ;;  %v9804_v8 = vld [vmem:[#allocation2 + $0xe4] ss:$8 sps:$4 sm:$0xff]   ;;  %v9806_v10 = vld [vmem:[#allocation2 + $0xe0] ss:$8 sps:$4 sm:$0xff]  }
 0x248   : > { %2185 = vmatpush1.bf16.msra.mxu0 %v1926_v13  ;;  %v9837_v9 = vld [vmem:[#allocation5] sm:$0xff]   ;;  %v9807_v11 = vld [vmem:[#allocation2 + $0xf4] ss:$8 sps:$4 sm:$0xff]   ;;  %v9809_v12 = vld [vmem:[#allocation2 + $0xf0] ss:$8 sps:$4 sm:$0xff]  }
 0x249   : > { %2186 = vmatprep.subr.bf16.mxu0 %v11219_v0  ;;  %v9810_v13 = vld [vmem:[#allocation2 + $0x104] ss:$8 sps:$4 sm:$0xff]   ;;  %v9812_v14 = vld [vmem:[#allocation2 + $0x100] ss:$8 sps:$4 sm:$0xff]   ;;  %v9813_v15 = vld [vmem:[#allocation2 + $0x114] ss:$8 sps:$4 sm:$0xff]  }
 0x24a   : > { %8533 = vmatpush3.bf16.msra.mxu1 %v9827_v57  ;;  %v9816_v17 = vld [vmem:[#allocation2 + $0x124] ss:$8 sps:$4 sm:$0xff]   ;;  %v9838_v18 = vld [vmem:[#allocation5 + $0xf8] sm:$0xff]  }
 0x24b   : > { %8534 = vmatprep.subr.bf16.mxu1 %v9828_v59  ;;  %v9819_v20 = vld [vmem:[#allocation2 + $0x134] ss:$8 sps:$4 sm:$0xff]   ;;  %v9821_v21 = vld [vmem:[#allocation2 + $0x130] ss:$8 sps:$4 sm:$0xff]   ;;  %v9844_v55 = vld [vmem:[#allocation5 + $0xe0] sm:$0xff]  }
 0x24c   : > { %2187 = vmatpush1.bf16.msra.mxu0 %v1925_v16  ;;  %v9815_v16 = vld [vmem:[#allocation2 + $0x110] ss:$8 sps:$4 sm:$0xff]   ;;  %v9845_v57 = vld [vmem:[#allocation5 + $0xa0] sm:$0xff]  }
 0x24d   : > { %2188 = vmatprep.subr.bf16.mxu0 %v11219_v0  ;;  %v9846_v59 = vld [vmem:[#allocation5 + $0xd8] sm:$0xff]  }
 0x24e   : > { %8535 = vmatpush3.bf16.msra.mxu1 %v9829_v61 }
 0x24f   : > { %8536 = vmatprep.subr.bf16.mxu1 %v9830_v62  ;;  %v9847_v62 = vld [vmem:[#allocation5 + $0x98] sm:$0xff]  }
 0x250   : > { %2189 = vmatpush1.bf16.msra.mxu0 %v1924_v19  ;;  %v9818_v19 = vld [vmem:[#allocation2 + $0x120] ss:$8 sps:$4 sm:$0xff]  }
 0x251   : > { %2190 = vmatprep.subr.bf16.mxu0 %v11219_v0 }
 0x252   : > { %8537 = vmatpush3.bf16.msra.mxu1 %v9831_v63 }
 0x253   : > { %8538 = vmatprep.subr.bf16.mxu1 %v9832_v1  ;;  %v9848_v1 = vld [vmem:[#allocation5 + $0xd0] sm:$0xff]  }
 0x254   : > { %2191 = vmatpush1.bf16.msra.mxu0 %v1923_v23 }
 0x255   : > { %2192 = vmatprep.subr.bf16.mxu0 %v11219_v0 }
 0x256   : > { %8539 = vmatpush3.bf16.msra.mxu1 %v9833_v3  ;;  %v9849_v3 = vld [vmem:[#allocation5 + $0x90] sm:$0xff]  }
 0x257   : > { %8540 = vmatprep.subr.bf16.mxu1 %v9834_v4 }
 0x258   : > { %2193 = vmatpush1.bf16.msra.mxu0 %v1922_v26 }
 0x259   : > { %2208 = vmatprep.subr.bf16.mxu0 %v11219_v0  ;;  %v9800_v0 = vld [vmem:[#allocation2 + $0xc0] ss:$8 sps:$4 sm:$0xff]  }
 0x25a   : > { %8541 = vmatpush3.bf16.msra.mxu1 %v9835_v5  ;;  %v9850_v5 = vld [vmem:[#allocation5 + $0xc8] sm:$0xff]  }
 0x25b   : > { %8542 = vmatprep.subr.bf16.mxu1 %v9836_v7 }
 0x25c   : > { %2209 = vmatpush2.bf16.msra.mxu0 %v2176_v29 }
 0x25e   : > { %8543 = vmatpush3.bf16.msra.mxu1 %v9837_v9 }
 0x25f   : > { %2211 = vmatmul.mubr.bf16.vlgmr.msra.gmra.mxu0 %v9762_v30  ;;  %8568 = vmatprep.subr.bf16.mxu1 %v9838_v18 }
 0x260   : > { %8124 = vmatprep.mubr.msk.bf16.mxu0 %vm2111_vm0, %v9765_v31 }
 0x267   : > { %2219 = vmatmul.mubr.bf16.gmra.mxu0 %v9767_v32 }
 0x268   : > { %8125 = vmatprep.mubr.msk.bf16.mxu0 %vm2111_vm0, %v9768_v33 }
 0x26f   : > { %2227 = vmatmul.mubr.bf16.gmra.mxu0 %v9770_v34 }
 0x270   : > { %8126 = vmatprep.mubr.msk.bf16.mxu0 %vm2111_vm0, %v9771_v35 }
 0x277   : > { %2235 = vmatmul.mubr.bf16.gmra.mxu0 %v9773_v36 }
 0x278   : > { %8127 = vmatprep.mubr.msk.bf16.mxu0 %vm2111_vm0, %v9774_v37 }
 0x27f   : > { %2243 = vmatmul.mubr.bf16.gmra.mxu0 %v9776_v38 }
 0x280   : > { %8128 = vmatprep.mubr.msk.bf16.mxu0 %vm2111_vm0, %v9777_v39 }
 0x287   : > { %2251 = vmatmul.mubr.bf16.gmra.mxu0 %v9779_v40 }
 0x288   : > { %8129 = vmatprep.mubr.msk.bf16.mxu0 %vm2111_vm0, %v9780_v41 }
 0x28f   : > { %2259 = vmatmul.mubr.bf16.gmra.mxu0 %v9782_v42  ;;  %v9839_v42 = vld [vmem:[#allocation5 + $0xb8] sm:$0xff]  }
 0x290   : > { %8130 = vmatprep.mubr.msk.bf16.mxu0 %vm2111_vm0, %v9783_v43 }
 0x297   : > { %2267 = vmatmul.mubr.bf16.gmra.mxu0 %v9785_v44 }
 0x298   : > { %8131 = vmatprep.mubr.msk.bf16.mxu0 %vm2111_vm0, %v9786_v45  ;;  %v9840_v45 = vld [vmem:[#allocation5 + $0xf0] sm:$0xff]  }
 0x29f   : > { %2275 = vmatmul.mubr.bf16.gmra.mxu0 %v9788_v46 }
 0x2a0   : > { %8132 = vmatprep.mubr.msk.bf16.mxu0 %vm2111_vm0, %v9789_v47  ;;  %v9841_v47 = vld [vmem:[#allocation5 + $0xb0] sm:$0xff]  }
 0x2a7   : > { %2283 = vmatmul.mubr.bf16.gmra.mxu0 %v9791_v48 }
 0x2a8   : > { %8133 = vmatprep.mubr.msk.bf16.mxu0 %vm2111_vm0, %v9792_v49  ;;  %v9842_v49 = vld [vmem:[#allocation5 + $0xe8] sm:$0xff]  }
 0x2af   : > { %2291 = vmatmul.mubr.bf16.gmra.mxu0 %v9794_v52  ;;  %v9843_v52 = vld [vmem:[#allocation5 + $0xa8] sm:$0xff]  }
 0x2b0   : > { %8134 = vmatprep.mubr.msk.bf16.mxu0 %vm2111_vm0, %v9795_v54 }
 0x2b7   : > { %2299 = vmatmul.mubr.bf16.gmra.mxu0 %v9797_v58 }
 0x2b8   : > { %8135 = vmatprep.mubr.msk.bf16.mxu0 %vm2111_vm0, %v9798_v60 }
 0x2bf   : > { %2307 = vmatmul.mubr.bf16.gmra.mxu0 %v9800_v0 }
 0x2c0   : > { %8136 = vmatprep.mubr.msk.bf16.mxu0 %vm2111_vm0, %v9801_v2 }
 0x2c7   : > { %2315 = vmatmul.mubr.bf16.gmra.mxu0 %v9803_v6 }
 0x2c8   : > { %8137 = vmatprep.mubr.msk.bf16.mxu0 %vm2111_vm0, %v9804_v8  ;;  %v9851_v8 = vld [vmem:[#allocation5 + $0x88] sm:$0xff]  }
 0x2cf   : > { %2323 = vmatmul.mubr.bf16.gmra.mxu0 %v9806_v10 }
 0x2d0   : > { %8138 = vmatprep.mubr.msk.bf16.mxu0 %vm2111_vm0, %v9807_v11  ;;  %v9852_v11 = vld [vmem:[#allocation5 + $0xc0] sm:$0xff]  }
 0x2d7   : > { %2331 = vmatmul.mubr.bf16.gmra.mxu0 %v9809_v12 }
 0x2d8   : > { %8139 = vmatprep.mubr.msk.bf16.mxu0 %vm2111_vm0, %v9810_v13  ;;  %v9853_v13 = vld [vmem:[#allocation5 + $0x80] sm:$0xff]  }
 0x2df   : > { %2339 = vmatmul.mubr.bf16.gmra.mxu0 %v9812_v14 }
 0x2e0   : > { %8140 = vmatprep.mubr.msk.bf16.mxu0 %vm2111_vm0, %v9813_v15  ;;  %v9854_v15 = vld [vmem:[#allocation5 + $0x138] sm:$0xff]  }
 0x2e7   : > { %2347 = vmatmul.mubr.bf16.gmra.mxu0 %v9815_v16 }
 0x2e8   : > { %8141 = vmatprep.mubr.msk.bf16.mxu0 %vm2111_vm0, %v9816_v17 }
 0x2ef   : > { %2355 = vmatmul.mubr.bf16.gmra.mxu0 %v9818_v19 }
 0x2f0   : > { %8142 = vmatprep.mubr.msk.bf16.mxu0 %vm2111_vm0, %v9819_v20 }
 0x2f7   : > { %2363 = vmatmul.mubr.bf16.gmra.mxu0 %v9821_v21 }
 0x31f   : > { %v2212_v22 = vpop.f32.mrf.mxu0 }
 0x321   : > { %v2214_v23 = vpop.f32.mrf.mxu0 }
 0x323   : > { %v2215_v24 = vpop.f32.mrf.mxu0 }
 0x324   : > { %v2371_v43 = vpack.c.bf16 %v2215_v24, %v2212_v22 }
 0x325   : > { %v2217_v25 = vpop.f32.mrf.mxu0 }
 0x327   : > { %v2220_v26 = vpop.f32.mrf.mxu0 }
 0x329   : > { %v2222_v27 = vpop.f32.mrf.mxu0 }
 0x32b   : > { %v2223_v28 = vpop.f32.mrf.mxu0 }
 0x32c   : > { %v2376_v53 = vpack.c.bf16 %v2223_v28, %v2220_v26 }
 0x32d   : > { %v2225_v29 = vpop.f32.mrf.mxu0 }
 0x32f   : > { %v2228_v30 = vpop.f32.mrf.mxu0 }
 0x331   : > { %v2230_v31 = vpop.f32.mrf.mxu0 }
 0x333   : > { %v2231_v32 = vpop.f32.mrf.mxu0 }
 0x334   : > { %v2381_v63 = vpack.c.bf16 %v2231_v32, %v2228_v30 }
 0x335   : > { %v2233_v33 = vpop.f32.mrf.mxu0 }
 0x337   : > { %v2236_v34 = vpop.f32.mrf.mxu0 }
 0x339   : > { %v2238_v35 = vpop.f32.mrf.mxu0 }
 0x33b   : > { %v2239_v36 = vpop.f32.mrf.mxu0 }
 0x33c   : > { %v2386_v9 = vpack.c.bf16 %v2239_v36, %v2236_v34  ;;  %v9855_v36 = vld [vmem:[#allocation5 + $0x130] sm:$0xff]  }
 0x33d   : > { %v2241_v37 = vpop.f32.mrf.mxu0 }
 0x33f   : > { %v2244_v38 = vpop.f32.mrf.mxu0 }
 0x341   : > { %v2246_v39 = vpop.f32.mrf.mxu0 }
 0x342   : > { %v9856_v39 = vld [vmem:[#allocation5 + $0x128] sm:$0xff]  }
 0x343   : > { %v2247_v40 = vpop.f32.mrf.mxu0 }
 0x344   : > { %v2372_v41 = vpack.c.bf16 %v2247_v40, %v2244_v38 }
 0x345   : > { %v2249_v44 = vpop.f32.mrf.mxu0 }
 0x346   : > { %2663 = vmatprep.mubr.bf16.mxu1 %v2372_v41  ;;  %v9857_v44 = vld [vmem:[#allocation5 + $0x120] sm:$0xff]  }
 0x347   : > { %v2252_v46 = vpop.f32.mrf.mxu0  ;;  %2664 = vmatmul.mubr.bf16.vlgmr.msra.gmra.mxu1 %v2371_v43 }
 0x348   : > { %8569 = vmatpush3.bf16.msra.mxu1 %v9839_v42 }
 0x349   : > { %v2254_v48 = vpop.f32.mrf.mxu0  ;;  %8570 = vmatprep.subr.bf16.mxu1 %v9840_v45 }
 0x34b   : > { %v2255_v50 = vpop.f32.mrf.mxu0 }
 0x34c   : > { %v2377_v51 = vpack.c.bf16 %v2255_v50, %v2252_v46  ;;  %8571 = vmatpush3.bf16.msra.mxu1 %v9841_v47  ;;  %v9858_v47 = vld [vmem:[#allocation5 + $0x118] sm:$0xff]  }
 0x34d   : > { %v2257_v54 = vpop.f32.mrf.mxu0  ;;  %8572 = vmatprep.subr.bf16.mxu1 %v9842_v49 }
 0x34e   : > { %2671 = vmatprep.mubr.bf16.mxu1 %v2377_v51 }
 0x34f   : > { %v2260_v56 = vpop.f32.mrf.mxu0  ;;  %2672 = vmatmul.mubr.bf16.gmra.mxu1 %v2376_v53 }
 0x350   : > { %8573 = vmatpush3.bf16.msra.mxu1 %v9843_v52  ;;  %v9859_v52 = vld [vmem:[#allocation5 + $0x110] sm:$0xff]  }
 0x351   : > { %v2262_v58 = vpop.f32.mrf.mxu0  ;;  %8574 = vmatprep.subr.bf16.mxu1 %v9844_v55  ;;  %v9860_v55 = vld [vmem:[#allocation5 + $0x108] sm:$0xff]  }
 0x353   : > { %v2263_v60 = vpop.f32.mrf.mxu0 }
 0x354   : > { %v2382_v61 = vpack.c.bf16 %v2263_v60, %v2260_v56  ;;  %8575 = vmatpush3.bf16.msra.mxu1 %v9845_v57  ;;  %v9861_v60 = vld [vmem:[#allocation5 + $0x100] sm:$0xff]  }
 0x355   : > { %v2265_v0 = vpop.f32.mrf.mxu0  ;;  %8576 = vmatprep.subr.bf16.mxu1 %v9846_v59 }
 0x356   : > { %2679 = vmatprep.mubr.bf16.mxu1 %v2382_v61 }
 0x357   : > { %v2268_v2 = vpop.f32.mrf.mxu0  ;;  %2680 = vmatmul.mubr.bf16.gmra.mxu1 %v2381_v63 }
 0x358   : > { %8577 = vmatpush3.bf16.msra.mxu1 %v9847_v62 }
 0x359   : > { %v2270_v4 = vpop.f32.mrf.mxu0  ;;  %8578 = vmatprep.subr.bf16.mxu1 %v9848_v1 }
 0x35b   : > { %v2271_v6 = vpop.f32.mrf.mxu0 }
 0x35c   : > { %v2387_v7 = vpack.c.bf16 %v2271_v6, %v2268_v2  ;;  %8579 = vmatpush3.bf16.msra.mxu1 %v9849_v3 }
 0x35d   : > { %v2273_v10 = vpop.f32.mrf.mxu0  ;;  %8580 = vmatprep.subr.bf16.mxu1 %v9850_v5 }
 0x35e   : > { %2687 = vmatprep.mubr.bf16.mxu1 %v2387_v7 }
 0x35f   : > { %v2276_v12 = vpop.f32.mrf.mxu0  ;;  %2688 = vmatmul.mubr.bf16.gmra.mxu1 %v2386_v9 }
 0x360   : > { %8581 = vmatpush3.bf16.msra.mxu1 %v9851_v8 }
 0x361   : > { %v2278_v14 = vpop.f32.mrf.mxu0  ;;  %8582 = vmatprep.subr.bf16.mxu1 %v9852_v11 }
 0x363   : > { %v2279_v16 = vpop.f32.mrf.mxu0 }
 0x364   : > { %8583 = vmatpush3.bf16.msra.mxu1 %v9853_v13  ;;  %v2373_v34 = vpack.c.bf16 %v2279_v16, %v2276_v12 }
 0x365   : > { %v2281_v17 = vpop.f32.mrf.mxu0  ;;  %9067 = vmatprep.subr.bf16.mxu1 %v9854_v15 }
 0x367   : > { %v2284_v18 = vpop.f32.mrf.mxu0 }
 0x369   : > { %v2286_v19 = vpop.f32.mrf.mxu0 }
 0x36b   : > { %v2287_v20 = vpop.f32.mrf.mxu0 }
 0x36c   : > { %v2378_v42 = vpack.c.bf16 %v2287_v20, %v2284_v18 }
 0x36d   : > { %v2289_v21 = vpop.f32.mrf.mxu0 }
 0x36f   : > { %v2292_v22 = vpop.f32.mrf.mxu0 }
 0x371   : > { %v2294_v23 = vpop.f32.mrf.mxu0 }
 0x373   : > { %v2295_v24 = vpop.f32.mrf.mxu0 }
 0x374   : > { %v2383_v50 = vpack.c.bf16 %v2295_v24, %v2292_v22 }
 0x375   : > { %v2297_v25 = vpop.f32.mrf.mxu0 }
 0x377   : > { %v2300_v26 = vpop.f32.mrf.mxu0 }
 0x379   : > { %v2302_v27 = vpop.f32.mrf.mxu0 }
 0x37b   : > { %v2303_v28 = vpop.f32.mrf.mxu0 }
 0x37c   : > { %v2388_v58 = vpack.c.bf16 %v2303_v28, %v2300_v26 }
 0x37d   : > { %v2305_v29 = vpop.f32.mrf.mxu0 }
 0x37f   : > { %v2308_v30 = vpop.f32.mrf.mxu0 }
 0x381   : > { %v2310_v31 = vpop.f32.mrf.mxu0 }
 0x383   : > { %v2311_v32 = vpop.f32.mrf.mxu0 }
 0x384   : > { %v2374_v33 = vpack.c.bf16 %v2311_v32, %v2308_v30 }
 0x385   : > { %v2313_v35 = vpop.f32.mrf.mxu0 }
 0x386   : > { %2728 = vmatprep.mubr.bf16.mxu1 %v2374_v33 }
 0x387   : > { %v2316_v37 = vpop.f32.mrf.mxu0  ;;  %2729 = vmatmul.mubr.bf16.vlgmr.msra.gmra.mxu1 %v2373_v34 }
 0x388   : > { %9068 = vmatpush3.bf16.msra.mxu1 %v9854_v15 }
 0x389   : > { %v2318_v38 = vpop.f32.mrf.mxu0  ;;  %9069 = vmatprep.subr.bf16.mxu1 %v9855_v36 }
 0x38b   : > { %v2319_v40 = vpop.f32.mrf.mxu0 }
 0x38c   : > { %v2379_v41 = vpack.c.bf16 %v2319_v40, %v2316_v37  ;;  %9070 = vmatpush3.bf16.msra.mxu1 %v9855_v36 }
 0x38d   : > { %v2321_v43 = vpop.f32.mrf.mxu0  ;;  %9071 = vmatprep.subr.bf16.mxu1 %v9856_v39 }
 0x38e   : > { %2736 = vmatprep.mubr.bf16.mxu1 %v2379_v41 }
 0x38f   : > { %v2324_v45 = vpop.f32.mrf.mxu0  ;;  %2737 = vmatmul.mubr.bf16.gmra.mxu1 %v2378_v42 }
 0x390   : > { %9072 = vmatpush3.bf16.msra.mxu1 %v9856_v39 }
 0x391   : > { %v2326_v46 = vpop.f32.mrf.mxu0  ;;  %9073 = vmatprep.subr.bf16.mxu1 %v9857_v44 }
 0x393   : > { %v2327_v48 = vpop.f32.mrf.mxu0 }
 0x394   : > { %v2384_v49 = vpack.c.bf16 %v2327_v48, %v2324_v45  ;;  %9074 = vmatpush3.bf16.msra.mxu1 %v9857_v44 }
 0x395   : > { %v2329_v51 = vpop.f32.mrf.mxu0  ;;  %9075 = vmatprep.subr.bf16.mxu1 %v9858_v47 }
 0x396   : > { %2744 = vmatprep.mubr.bf16.mxu1 %v2384_v49 }
 0x397   : > { %v2332_v53 = vpop.f32.mrf.mxu0  ;;  %2745 = vmatmul.mubr.bf16.gmra.mxu1 %v2383_v50 }
 0x398   : > { %9076 = vmatpush3.bf16.msra.mxu1 %v9858_v47 }
 0x399   : > { %v2334_v54 = vpop.f32.mrf.mxu0  ;;  %9077 = vmatprep.subr.bf16.mxu1 %v9859_v52 }
 0x39b   : > { %v2335_v56 = vpop.f32.mrf.mxu0 }
 0x39c   : > { %v2389_v57 = vpack.c.bf16 %v2335_v56, %v2332_v53  ;;  %9078 = vmatpush3.bf16.msra.mxu1 %v9859_v52 }
 0x39d   : > { %v2337_v59 = vpop.f32.mrf.mxu0  ;;  %9079 = vmatprep.subr.bf16.mxu1 %v9860_v55 }
 0x39e   : > { %2752 = vmatprep.mubr.bf16.mxu1 %v2389_v57 }
 0x39f   : > { %v2340_v61 = vpop.f32.mrf.mxu0  ;;  %2753 = vmatmul.mubr.bf16.gmra.mxu1 %v2388_v58 }
 0x3a0   : > { %9080 = vmatpush3.bf16.msra.mxu1 %v9860_v55 }
 0x3a1   : > { %v2342_v62 = vpop.f32.mrf.mxu0  ;;  %9081 = vmatprep.subr.bf16.mxu1 %v9861_v60 }
 0x3a3   : > { %v2343_v63 = vpop.f32.mrf.mxu0 }
 0x3a4   : > { %v2375_v0 = vpack.c.bf16 %v2343_v63, %v2340_v61  ;;  %9082 = vmatpush3.bf16.msra.mxu1 %v9861_v60 }
 0x3a5   : > { %v2345_v1 = vpop.f32.mrf.mxu0 }
 0x3a6   : > { %9083 = vmatprep.mubr.bf16.mxu1 %v2375_v0 }
 0x3a7   : > { %v2348_v2 = vpop.f32.mrf.mxu0 }
 0x3a9   : > { %v2350_v3 = vpop.f32.mrf.mxu0 }
 0x3ab   : > { %v2351_v4 = vpop.f32.mrf.mxu0 }
 0x3ac   : > { %v2380_v5 = vpack.c.bf16 %v2351_v4, %v2348_v2 }
 0x3ad   : > { %v2353_v6 = vpop.f32.mrf.mxu0 }
 0x3ae   : > { %9084 = vmatmul.mubr.bf16.vlgmr.msra.gmra.mxu1 %v2380_v5 }
 0x3af   : > { %v2356_v7 = vpop.f32.mrf.mxu0 }
 0x3b1   : > { %v2358_v8 = vpop.f32.mrf.mxu0 }
 0x3b3   : > { %v2359_v9 = vpop.f32.mrf.mxu0 }
 0x3b4   : > { %v2385_v10 = vpack.c.bf16 %v2359_v9, %v2356_v7 }
 0x3b5   : > { %v2361_v11 = vpop.f32.mrf.mxu0 }
 0x3b6   : > { %9087 = vmatprep.mubr.bf16.mxu1 %v2385_v10 }
 0x3b7   : > { %v2364_v12 = vpop.f32.mrf.mxu0 }
 0x3b9   : > { %v2366_v13 = vpop.f32.mrf.mxu0 }
 0x3bb   : > { %v2367_v14 = vpop.f32.mrf.mxu0 }
 0x3bc   : > { %v2390_v15 = vpack.c.bf16 %v2367_v14, %v2364_v12 }
 0x3bd   : > { %v2369_v16 = vpop.f32.mrf.mxu0 }
 0x3be   : > { %9088 = vmatmul.mubr.bf16.gmra.mxu1 %v2390_v15 }
 0x407   : > { %v8544_v17 = vpop.f32.mrf.mxu1 }
 0x409   : > { %v8545_v18 = vpop.f32.mrf.mxu1 }
 0x40a   : > { %v8546_v19 = vadd.f32 %v8545_v18, %v8544_v17 }
 0x40b   : > { %v8547_v20 = vpop.f32.mrf.mxu1 }
 0x40d   : > { %v8548_v21 = vpop.f32.mrf.mxu1 }
 0x40e   : > { %v8549_v53 = vadd.f32 %v8548_v21, %v8547_v20 }
 0x40f   : > { %v8550_v22 = vpop.f32.mrf.mxu1 }
 0x411   : > { %v8551_v23 = vpop.f32.mrf.mxu1 }
 0x412   : > { %v8552_v61 = vadd.f32 %v8551_v23, %v8550_v22 }
 0x413   : > { %v8553_v24 = vpop.f32.mrf.mxu1 }
 0x415   : > { %v8554_v25 = vpop.f32.mrf.mxu1 }
 0x416   : > { %v8555_v3 = vadd.f32 %v8554_v25, %v8553_v24 }
 0x417   : > { %v8556_v26 = vpop.f32.mrf.mxu1 }
 0x419   : > { %v8557_v27 = vpop.f32.mrf.mxu1 }
 0x41a   : > { %v8558_v7 = vadd.f32 %v8557_v27, %v8556_v26 }
 0x41b   : > { %v8559_v28 = vpop.f32.mrf.mxu1 }
 0x41d   : > { %v8560_v29 = vpop.f32.mrf.mxu1 }
 0x41e   : > { %v8561_v17 = vadd.f32 %v8560_v29, %v8559_v28 }
 0x41f   : > { %v8562_v30 = vpop.f32.mrf.mxu1 }
 0x421   : > { %v8563_v31 = vpop.f32.mrf.mxu1 }
 0x422   : > { %v8564_v20 = vadd.f32 %v8563_v31, %v8562_v30 }
 0x423   : > { %v8565_v32 = vpop.f32.mrf.mxu1 }
 0x425   : > { %v8566_v33 = vpop.f32.mrf.mxu1 }
 0x426   : > { %v8567_v23 = vadd.f32 %v8566_v33, %v8565_v32 }
 0x447   : > { %v8584_v34 = vpop.f32.mrf.mxu1 }
 0x449   : > { %v8585_v35 = vpop.f32.mrf.mxu1 }
 0x44a   : > { %v8586_v54 = vadd.f32 %v8585_v35, %v8584_v34 }
 0x44b   : > { %v8587_v36 = vpop.f32.mrf.mxu1 }
 0x44c   : > { %v2731_v59 = vadd.f32 %v8586_v54, %v8546_v19 }
 0x44d   : > { %v8588_v37 = vpop.f32.mrf.mxu1 }
 0x44e   : > { %v8589_v51 = vadd.f32 %v8588_v37, %v8587_v36 }
 0x44f   : > { %v8590_v38 = vpop.f32.mrf.mxu1 }
 0x450   : > { %v2734_v56 = vadd.f32 %v8589_v51, %v8549_v53 }
 0x451   : > { %v8591_v39 = vpop.f32.mrf.mxu1 }
 0x452   : > { %v8592_v58 = vadd.f32 %v8591_v39, %v8590_v38 }
 0x453   : > { %v8593_v40 = vpop.f32.mrf.mxu1 }
 0x454   : > { %v2739_v0 = vadd.f32 %v8592_v58, %v8552_v61 }
 0x455   : > { %v8594_v41 = vpop.f32.mrf.mxu1 }
 0x456   : > { %v8595_v63 = vadd.f32 %v8594_v41, %v8593_v40 }
 0x457   : > { %v8596_v42 = vpop.f32.mrf.mxu1 }
 0x458   : > { %v2742_v8 = vadd.f32 %v8595_v63, %v8555_v3 }
 0x459   : > { %v8597_v43 = vpop.f32.mrf.mxu1 }
 0x45a   : > { %v8598_v2 = vadd.f32 %v8597_v43, %v8596_v42 }
 0x45b   : > { %v8599_v44 = vpop.f32.mrf.mxu1 }
 0x45c   : > { %v2747_v12 = vadd.f32 %v8598_v2, %v8558_v7 }
 0x45d   : > { %v8600_v45 = vpop.f32.mrf.mxu1 }
 0x45e   : > { %v8601_v10 = vadd.f32 %v8600_v45, %v8599_v44 }
 0x45f   : > { %v8602_v46 = vpop.f32.mrf.mxu1 }
 0x460   : > { %v2750_v25 = vadd.f32 %v8601_v10, %v8561_v17  ;;  %v2832_v10 = vld [vmem:[#allocation7 + $0x30] sm:$0xff]  ;;  %v2833_v17 = vld [vmem:[#allocation7 + $0x38] sm:$0x7f] }
 0x461   : > { %v8603_v47 = vpop.f32.mrf.mxu1 }
 0x462   : > { %v8604_v13 = vadd.f32 %v8603_v47, %v8602_v46 }
 0x463   : > { %v8605_v48 = vpop.f32.mrf.mxu1 }
 0x464   : > { %v2755_v27 = vadd.f32 %v8604_v13, %v8564_v20  ;;  %v2830_v20 = vld [vmem:[#allocation7 + $0x20] sm:$0xff] }
 0x465   : > { %v8606_v49 = vpop.f32.mrf.mxu1 }
 0x466   : > { %v8607_v18 = vadd.f32 %v8606_v49, %v8605_v48  ;;  %v9862_v49 = vld [vmem:[%s12512_s12] sm:$0xff]  }
 0x467   : > { %9099 = vmatprep.mubr.msk.bf16.mxu1 %vm3069_vm3, %v9862_v49  ;;  %v2827_v49 = vld [vmem:[#allocation7 + $0x8] sm:$0xff] }
 0x468   : > { %v2758_v36 = vadd.f32 %v8607_v18, %v8567_v23  ;;  %v11220_v18 = vmov 65535  }
 0x46e   : > { %v9085_v50 = vpop.f32.mrf.mxu1 }
 0x46f   : > { %v11884_v4 = vadd.f32 %v9085_v50, %v2739_v0 }
 0x470   : > { %v2795_v52 = vpop.f32.mrf.mxu1 }
 0x471   : > { %v11880_v62 = vadd.f32 %v2795_v52, %v2731_v59  ;;  %v2863_v14 = vmul.f32 %v11884_v4, %v11884_v4 }
 0x472   : > { %v9086_v55 = vpop.f32.mrf.mxu1 }
 0x473   : > { %v2861_v5 = vmul.f32 %v11880_v62, %v11880_v62  ;;  %v11892_v15 = vadd.f32 %v9086_v55, %v2742_v8 }
 0x474   : > { %v2798_v57 = vpop.f32.mrf.mxu1 }
 0x475   : > { %v11878_v60 = vadd.f32 %v2798_v57, %v2734_v56  ;;  %v2864_v26 = vmul.f32 %v11892_v15, %v11892_v15 }
 0x477   : > { %v2862_v1 = vmul.f32 %v11878_v60, %v11878_v60  ;;  %v2842_v6 = vadd.f32 %v11878_v60, %v11880_v62 }
 0x479   : > { %v2869_v9 = vadd.f32 %v2862_v1, %v2861_v5  ;;  %v2843_v16 = vadd.f32 %v2842_v6, %v11884_v4 }
 0x47b   : > { %v2870_v21 = vadd.f32 %v2869_v9, %v2863_v14  ;;  %v2844_v34 = vadd.f32 %v2843_v16, %v11892_v15 }
 0x47d   : > { %v2871_v31 = vadd.f32 %v2870_v21, %v2864_v26  ;;  %v2831_v21 = vld [vmem:[#allocation7 + $0x28] sm:$0xff] }
 0x47e   : > { %v9089_v11 = vpop.f32.mrf.mxu1 }
 0x47f   : > { %v11902_v29 = vadd.f32 %v9089_v11, %v2755_v27 }
 0x480   : > { %v2811_v19 = vpop.f32.mrf.mxu1 }
 0x481   : > { %v11895_v22 = vadd.f32 %v2811_v19, %v2747_v12  ;;  %v2867_v40 = vmul.f32 %v11902_v29, %v11902_v29  ;;  %v3107_v19 = vsel %vm2848_vm2, 4294967295, %v11220_v18 }
 0x482   : > { %v9090_v24 = vpop.f32.mrf.mxu1 }
 0x483   : > { %v2865_v35 = vmul.f32 %v11895_v22, %v11895_v22  ;;  %v2845_v30 = vadd.f32 %v2844_v34, %v11895_v22  ;;  %v2823_v32 = vadd.f32 %v9090_v24, %v2758_v36  ;;  %v2829_v36 = vld [vmem:[#allocation7 + $0x18] sm:$0xff] }
 0x484   : > { %v2814_v28 = vpop.f32.mrf.mxu1 }
 0x485   : > { %v11905_v37 = vadd.f32 %v2814_v28, %v2750_v25  ;;  %v2872_v33 = vadd.f32 %v2871_v31, %v2865_v35  ;;  %v2849_v43 = vsel %vm2848_vm2, %v2823_v32, 0.0  ;;  %v2868_v44 = vmul.f32 %v2823_v32, %v2823_v32  ;;  %v2840_v25 = vld [vmem:[#allocation8 + $0x30] sm:$0xff]  ;;  %v2841_v28 = vld [vmem:[#allocation8 + $0x38] sm:$0x7f] }
 0x486   : > { %v2828_v35 = vld [vmem:[#allocation7 + $0x10] sm:$0xff] }
 0x487   : > { %v2866_v38 = vmul.f32 %v11905_v37, %v11905_v37  ;;  %v2846_v39 = vadd.f32 %v2845_v30, %v11905_v37  ;;  %v2875_v47 = vsel %vm2848_vm2, %v2868_v44, 0.0  ;;  %v2839_v30 = vld [vmem:[#allocation8 + $0x28] sm:$0xff] }
 0x489   : > { %v2847_v41 = vadd.f32 %v2846_v39, %v11902_v29  ;;  %v2873_v42 = vadd.f32 %v2872_v33, %v2866_v38 }
 0x48b   : > { %v2850_v45 = vadd.f32 %v2849_v43, %v2847_v41  ;;  %v2874_v46 = vadd.f32 %v2873_v42, %v2867_v40 }
 0x48d   : > { %2851 = vadd.xlane.f32.xlu0 %v2850_v45  ;;  %v2876_v48 = vadd.f32 %v2875_v47, %v2874_v46 }
 0x491   : > { %2877 = vadd.xlane.f32.xlu0 %v2876_v48  ;;  %v2836_v48 = vld [vmem:[#allocation8 + $0x10] sm:$0xff] }
 0x516   : > { %v2852_v50 = vpop.xlane.xlu0 %2851 }
 0x517   : > { %v2853_v51 = vrot.slane %v2852_v50, 4 }
 0x519   : > { %v2854_v52 = vadd.f32 %v2853_v51, %v2852_v50 }
 0x51a   : > { %v2878_v53 = vpop.xlane.xlu0 %2877 }
 0x51b   : > { %v2855_v54 = vrot.slane %v2854_v52, 2  ;;  %v2879_v55 = vrot.slane %v2878_v53, 4 }
 0x51d   : > { %v2880_v56 = vadd.f32 %v2879_v55, %v2878_v53  ;;  %v2856_v57 = vadd.f32 %v2855_v54, %v2854_v52  ;;  %v11937_v52 = vsel %vm3106_vm4, %v3107_v19, 0  ;;  %v9865_v19 = vld [vmem:[%s12512_s12 + $0x18] sm:$0xff]  }
 0x51f   : > { %v2881_v58 = vrot.slane %v2880_v56, 2  ;;  %v2857_v59 = vrot.slane %v2856_v57, 1 }
 0x521   : > { %v2858_v61 = vadd.f32 %v2857_v59, %v2856_v57  ;;  %v2882_v63 = vadd.f32 %v2881_v58, %v2880_v56 }
 0x523   : > { %9393 = vpush %v2858_v61  ;;  %v2883_v0 = vrot.slane %v2882_v63, 1  ;;  %v2834_v61 = vld [vmem:[#allocation8] sm:$0xff] }
 0x525   : > { %v2884_v1 = vadd.f32 %v2883_v0, %v2882_v63  ;;  %v2835_v63 = vld [vmem:[#allocation8 + $0x8] sm:$0xff] }
 0x527   : > { %9395 = vpush %v2884_v1 }
 0x554   : > { %s9394_s3 = spop %9393 }
 0x555   : > { %v2860_v2 = vstv %s9394_s3 }
 0x556   : > { %v2887_v3 = vmul.f32 0.0004960318, %v2860_v2 }
 0x558   : > { %s9396_s5 = spop %9395  ;;  %v2889_v7 = vmul.f32 %v2887_v3, %v2887_v3  ;;  %v2897_v11 = vsub.f32 %v11902_v29, %v2887_v3  ;;  %v2898_v12 = vsub.f32 %v2823_v32, %v2887_v3  ;;  %v2895_v13 = vsub.f32 %v11895_v22, %v2887_v3  ;;  %v2838_v29 = vld [vmem:[#allocation8 + $0x20] sm:$0xff] }
 0x559   : > { %v2886_v5 = vstv %s9396_s5  ;;  %v2896_v14 = vsub.f32 %v11905_v37, %v2887_v3  ;;  %v2893_v23 = vsub.f32 %v11884_v4, %v2887_v3  ;;  %v2894_v24 = vsub.f32 %v11892_v15, %v2887_v3 }
 0x55a   : > { %v2888_v6 = vmul.f32 0.0004960318, %v2886_v5  ;;  %v2891_v32 = vsub.f32 %v11880_v62, %v2887_v3  ;;  %v2892_v33 = vsub.f32 %v11878_v60, %v2887_v3  ;;  %v2826_v62 = vld [vmem:[#allocation7] sm:$0xff]  ;;  %v2837_v60 = vld [vmem:[#allocation8 + $0x18] sm:$0xff] }
 0x55c   : > { %v2890_v8 = vsub.f32 %v2888_v6, %v2889_v7 }
 0x55e   : > { %v2899_v9 = vadd.f32 1e-05, %v2890_v8 }
 0x560   : > { %10147 = vrsqrt.f32 %v2899_v9 }
 0x56d   : > { %v10148_v16 = vpop.eup %10147 }
 0x56e   : > { %v2907_v26 = vmul.f32 %v10148_v16, %v2897_v11  ;;  %v2908_v27 = vmul.f32 %v10148_v16, %v2898_v12  ;;  %v2905_v34 = vmul.f32 %v10148_v16, %v2895_v13  ;;  %v2906_v22 = vmul.f32 %v10148_v16, %v2896_v14  ;;  %v9874_v11 = vld [vmem:[#allocation10 + $0x78] sm:$0xff]   ;;  %v9863_v12 = vld [vmem:[%s12512_s12 + $0x8] sm:$0xff]   ;;  %v9864_v13 = vld [vmem:[%s12512_s12 + $0x10] sm:$0xff]  }
 0x56f   : > { %v2903_v31 = vmul.f32 %v10148_v16, %v2893_v23  ;;  %v2904_v37 = vmul.f32 %v10148_v16, %v2894_v24  ;;  %v2901_v42 = vmul.f32 %v10148_v16, %v2891_v32  ;;  %v2902_v43 = vmul.f32 %v10148_v16, %v2892_v33  ;;  %v9875_v14 = vld [vmem:[#allocation10 + $0x38] sm:$0xff]   ;;  %v9876_v16 = vld [vmem:[#allocation10 + $0x70] sm:$0xff]   ;;  %v9886_v32 = vld [vmem:[#allocation10 + $0x48] sm:$0xff]  }
 0x570   : > { %v2915_v38 = vmul.f32 %v2907_v26, %v2832_v10  ;;  %v2916_v4 = vmul.f32 %v2908_v27, %v2833_v17  ;;  %v2913_v39 = vmul.f32 %v2905_v34, %v2830_v20  ;;  %v2914_v15 = vmul.f32 %v2906_v22, %v2831_v21  ;;  %v9877_v17 = vld [vmem:[#allocation10 + $0x30] sm:$0xff]   ;;  %v9866_v20 = vld [vmem:[%s12512_s12 + $0x20] sm:$0xff]   ;;  %v9867_v21 = vld [vmem:[%s12512_s12 + $0x28] sm:$0xff]  }
 0x571   : > { %v2911_v40 = vmul.f32 %v2903_v31, %v2828_v35  ;;  %v2912_v41 = vmul.f32 %v2904_v37, %v2829_v36  ;;  %v2909_v54 = vmul.f32 %v2901_v42, %v2826_v62  ;;  %v2910_v55 = vmul.f32 %v2902_v43, %v2827_v49  ;;  %v9868_v23 = vld [vmem:[%s12512_s12 + $0x30] sm:$0xff]   ;;  %v9869_v24 = vld [vmem:[%s12512_s12 + $0x38] sm:$0xff]   ;;  %v9871_v26 = vld [vmem:[%s12512_s12 + $0x48] sm:$0xff]  }
 0x572   : > { %v11926_v44 = vadd.f32 %v2915_v38, %v2840_v25  ;;  %v11928_v45 = vadd.f32 %v2916_v4, %v2841_v28  ;;  %v11930_v46 = vadd.f32 %v2913_v39, %v2838_v29  ;;  %v11932_v47 = vadd.f32 %v2914_v15, %v2839_v30  ;;  %v9870_v25 = vld [vmem:[%s12512_s12 + $0x40] sm:$0xff]   ;;  %v9872_v27 = vld [vmem:[%s12512_s12 + $0x50] sm:$0xff]   ;;  %v9873_v34 = vld [vmem:[%s12512_s12 + $0x58] sm:$0xff]  }
 0x573   : > { %v11939_v53 = vadd.f32 %v2911_v40, %v2836_v48  ;;  %v11947_v59 = vadd.f32 %v2912_v41, %v2837_v60  ;;  %v11950_v1 = vadd.f32 %v2909_v54, %v2834_v61  ;;  %v11958_v6 = vadd.f32 %v2910_v55, %v2835_v63  ;;  %v9878_v22 = vld [vmem:[#allocation10 + $0x68] sm:$0xff]   ;;  %v9880_v36 = vld [vmem:[#allocation10 + $0x60] sm:$0xff]   ;;  %v9882_v29 = vld [vmem:[#allocation10 + $0x58] sm:$0xff]  }
 0x574   : > { %v2931_v50 = vmax.f32 %v11926_v44, 0.0  ;;  %v2932_v51 = vmax.f32 %v11928_v45, 0.0  ;;  %v2929_v57 = vmax.f32 %v11930_v46, 0.0  ;;  %v2930_v58 = vmax.f32 %v11932_v47, 0.0  ;;  %v9879_v35 = vld [vmem:[#allocation10 + $0x28] sm:$0xff]   ;;  %v9881_v28 = vld [vmem:[#allocation10 + $0x20] sm:$0xff]  }
 0x575   : > { %v2927_v3 = vmax.f32 %v11939_v53, 0.0  ;;  %v2928_v5 = vmax.f32 %v11947_v59, 0.0  ;;  %v2925_v8 = vmax.f32 %v11950_v1, 0.0  ;;  %v2926_v9 = vmax.f32 %v11958_v6, 0.0  ;;  %v9883_v30 = vld [vmem:[#allocation10 + $0x18] sm:$0xff]   ;;  %v9884_v31 = vld [vmem:[#allocation10 + $0x50] sm:$0xff]  }
 0x576   : > { %v3008_v56 = vpack.c.bf16 %v2932_v51, %v2931_v50  ;;  %v3007_v2 = vpack.c.bf16 %v2930_v58, %v2929_v57  ;;  %v9885_v37 = vld [vmem:[#allocation10 + $0x10] sm:$0xff]   ;;  %v9887_v33 = vld [vmem:[#allocation10 + $0x8] sm:$0xff]   ;;  %v9888_v38 = vld [vmem:[#allocation10 + $0x40] sm:$0xff]  }
 0x577   : > { %v3006_v7 = vpack.c.bf16 %v2928_v5, %v2927_v3  ;;  %v3005_v10 = vpack.c.bf16 %v2926_v9, %v2925_v8  ;;  %v9889_v4 = vld [vmem:[#allocation10] sm:$0xff]   ;;  %v9890_v39 = vld [vmem:[#allocation10 + $0xb8] sm:$0xff]   ;;  %v9935_v53 = vld [vmem:[#allocation22 + $0x8] sm:$0xff]  }
 0x578   : > { %v3110_v0 = vand.u32 %v11937_v52, %v3008_v56  ;;  %v9937_v59 = vld [vmem:[#allocation22 + $0x18] sm:$0xff]   ;;  %v9938_v1 = vld [vmem:[#allocation22 + $0x20] sm:$0xff]   ;;  %v9940_v6 = vld [vmem:[#allocation22 + $0x30] sm:$0xff]  }
 0x57a   : > { %9091 = vmatprep.subr.bf16.mxu1 %v3110_v0 }
 0x57b   : > { %9092 = vmatpush3.bf16.msra.mxu1 %v3110_v0 }
 0x57c   : > { %9093 = vmatprep.subr.bf16.mxu1 %v3007_v2 }
 0x57f   : > { %9094 = vmatpush3.bf16.msra.mxu1 %v3007_v2  ;;  %v9891_v2 = vld [vmem:[#allocation10 + $0xb0] sm:$0xff]  }
 0x580   : > { %9095 = vmatprep.subr.bf16.mxu1 %v3006_v7 }
 0x583   : > { %9096 = vmatpush3.bf16.msra.mxu1 %v3006_v7 }
 0x584   : > { %9097 = vmatprep.subr.bf16.mxu1 %v3005_v10 }
 0x587   : > { %9098 = vmatpush3.bf16.msra.mxu1 %v3005_v10 }
 0x588   : > { %8636 = vmatprep.subr.bf16.mxu1 %v9874_v11 }
 0x58a   : > { %9100 = vmatmul.mubr.msk.bf16.vlgmr.msra.gmra.mxu1 %vm3069_vm3, %v9863_v12  ;;  %v9892_v12 = vld [vmem:[#allocation10 + $0xa8] sm:$0xff]  }
 0x58b   : > { %9103 = vmatprep.mubr.msk.bf16.mxu1 %vm3069_vm3, %v9864_v13  ;;  %8637 = vmatpush3.bf16.msra.mxu1 %v9875_v14 }
 0x58c   : > { %8638 = vmatprep.subr.bf16.mxu1 %v9876_v16 }
 0x58f   : > { %8639 = vmatpush3.bf16.msra.mxu1 %v9877_v17  ;;  %v9893_v17 = vld [vmem:[#allocation10 + $0xa0] sm:$0xff]  }
 0x590   : > { %8640 = vmatprep.subr.bf16.mxu1 %v9878_v22  ;;  %v9896_v22 = vld [vmem:[#allocation10 + $0x88] sm:$0xff]  }
 0x592   : > { %9104 = vmatmul.mubr.msk.bf16.gmra.mxu1 %vm3069_vm3, %v9865_v19 }
 0x593   : > { %9107 = vmatprep.mubr.msk.bf16.mxu1 %vm3069_vm3, %v9866_v20  ;;  %8641 = vmatpush3.bf16.msra.mxu1 %v9879_v35 }
 0x594   : > { %8642 = vmatprep.subr.bf16.mxu1 %v9880_v36 }
 0x597   : > { %8643 = vmatpush3.bf16.msra.mxu1 %v9881_v28 }
 0x598   : > { %8644 = vmatprep.subr.bf16.mxu1 %v9882_v29 }
 0x59a   : > { %9108 = vmatmul.mubr.msk.bf16.gmra.mxu1 %vm3069_vm3, %v9867_v21  ;;  %v9894_v21 = vld [vmem:[#allocation10 + $0x98] sm:$0xff]  }
 0x59b   : > { %9111 = vmatprep.mubr.msk.bf16.mxu1 %vm3069_vm3, %v9868_v23  ;;  %8645 = vmatpush3.bf16.msra.mxu1 %v9883_v30  ;;  %v9897_v30 = vld [vmem:[#allocation10 + $0x80] sm:$0xff]  }
 0x59c   : > { %8646 = vmatprep.subr.bf16.mxu1 %v9884_v31 }
 0x59f   : > { %8647 = vmatpush3.bf16.msra.mxu1 %v9885_v37 }
 0x5a0   : > { %8648 = vmatprep.subr.bf16.mxu1 %v9886_v32 }
 0x5a2   : > { %9112 = vmatmul.mubr.msk.bf16.gmra.mxu1 %vm3069_vm3, %v9869_v24 }
 0x5a3   : > { %9115 = vmatprep.mubr.msk.bf16.mxu1 %vm3069_vm3, %v9870_v25  ;;  %8649 = vmatpush3.bf16.msra.mxu1 %v9887_v33 }
 0x5a4   : > { %8650 = vmatprep.subr.bf16.mxu1 %v9888_v38 }
 0x5a7   : > { %8651 = vmatpush3.bf16.msra.mxu1 %v9889_v4 }
 0x5a8   : > { %9123 = vmatprep.subr.bf16.mxu1 %v9890_v39 }
 0x5aa   : > { %9116 = vmatmul.mubr.msk.bf16.gmra.mxu1 %vm3069_vm3, %v9871_v26  ;;  %v9895_v26 = vld [vmem:[#allocation10 + $0x90] sm:$0xff]  }
 0x5ab   : > { %9119 = vmatprep.mubr.msk.bf16.mxu1 %vm3069_vm3, %v9872_v27 }
 0x5b2   : > { %9120 = vmatmul.mubr.msk.bf16.gmra.mxu1 %vm3069_vm3, %v9873_v34 }
 0x64a   : > { %v9101_v15 = vpop.f32.mrf.mxu1 }
 0x64c   : > { %v3146_v40 = vpop.f32.mrf.mxu1 }
 0x64e   : > { %v9102_v41 = vpop.f32.mrf.mxu1 }
 0x64f   : > { %v3244_v16 = vpack.c.bf16 %v9102_v41, %v9101_v15 }
 0x650   : > { %v3149_v42 = vpop.f32.mrf.mxu1 }
 0x651   : > { %v3241_v63 = vpack.c.bf16 %v3149_v42, %v3146_v40 }
 0x652   : > { %v9105_v43 = vpop.f32.mrf.mxu1 }
 0x654   : > { %v3162_v48 = vpop.f32.mrf.mxu1 }
 0x656   : > { %v9106_v62 = vpop.f32.mrf.mxu1 }
 0x657   : > { %v3250_v28 = vpack.c.bf16 %v9106_v62, %v9105_v43 }
 0x658   : > { %v3165_v49 = vpop.f32.mrf.mxu1 }
 0x659   : > { %v3247_v25 = vpack.c.bf16 %v3165_v49, %v3162_v48 }
 0x65a   : > { %v9109_v60 = vpop.f32.mrf.mxu1 }
 0x65c   : > { %v3178_v54 = vpop.f32.mrf.mxu1 }
 0x65e   : > { %v9110_v55 = vpop.f32.mrf.mxu1 }
 0x65f   : > { %v3245_v7 = vpack.c.bf16 %v9110_v55, %v9109_v60 }
 0x660   : > { %v3181_v56 = vpop.f32.mrf.mxu1 }
 0x661   : > { %v3242_v61 = vpack.c.bf16 %v3181_v56, %v3178_v54 }
 0x662   : > { %v9113_v0 = vpop.f32.mrf.mxu1 }
 0x663   : > { %3436 = vmatprep.mubr.bf16.mxu1 %v3242_v61 }
 0x664   : > { %3437 = vmatmul.mubr.bf16.vlgmr.msra.gmra.mxu1 %v3241_v63  ;;  %v3194_v10 = vpop.f32.mrf.mxu1 }
 0x665   : > { %3444 = vmatprep.mubr.bf16.mxu1 %v3245_v7  ;;  %9124 = vmatpush3.bf16.msra.mxu1 %v9890_v39 }
 0x666   : > { %v9114_v11 = vpop.f32.mrf.mxu1  ;;  %9125 = vmatprep.subr.bf16.mxu1 %v9891_v2 }
 0x667   : > { %v3251_v34 = vpack.c.bf16 %v9114_v11, %v9113_v0  ;;  %v8207_v0 = vld [vmem:[#allocation11] ss:$0 sm:$0xff] }
 0x668   : > { %v3197_v13 = vpop.f32.mrf.mxu1 }
 0x669   : > { %9126 = vmatpush3.bf16.msra.mxu1 %v9891_v2  ;;  %v3248_v14 = vpack.c.bf16 %v3197_v13, %v3194_v10 }
 0x66a   : > { %9127 = vmatprep.subr.bf16.mxu1 %v9892_v12  ;;  %v9117_v19 = vpop.f32.mrf.mxu1 }
 0x66c   : > { %3445 = vmatmul.mubr.bf16.gmra.mxu1 %v3244_v16  ;;  %v3210_v20 = vpop.f32.mrf.mxu1 }
 0x66d   : > { %3452 = vmatprep.mubr.bf16.mxu1 %v3248_v14  ;;  %9128 = vmatpush3.bf16.msra.mxu1 %v9892_v12 }
 0x66e   : > { %9129 = vmatprep.subr.bf16.mxu1 %v9893_v17  ;;  %v9118_v23 = vpop.f32.mrf.mxu1 }
 0x66f   : > { %v3246_v32 = vpack.c.bf16 %v9118_v23, %v9117_v19 }
 0x670   : > { %v3213_v24 = vpop.f32.mrf.mxu1 }
 0x671   : > { %9130 = vmatpush3.bf16.msra.mxu1 %v9893_v17  ;;  %v3243_v36 = vpack.c.bf16 %v3213_v24, %v3210_v20 }
 0x672   : > { %9131 = vmatprep.subr.bf16.mxu1 %v9894_v21  ;;  %v9121_v27 = vpop.f32.mrf.mxu1 }
 0x674   : > { %3453 = vmatmul.mubr.bf16.gmra.mxu1 %v3247_v25  ;;  %v3226_v35 = vpop.f32.mrf.mxu1 }
 0x675   : > { %3460 = vmatprep.mubr.bf16.mxu1 %v3251_v34  ;;  %9132 = vmatpush3.bf16.msra.mxu1 %v9894_v21 }
 0x676   : > { %9133 = vmatprep.subr.bf16.mxu1 %v9895_v26  ;;  %v9122_v29 = vpop.f32.mrf.mxu1 }
 0x677   : > { %v3252_v33 = vpack.c.bf16 %v9122_v29, %v9121_v27 }
 0x678   : > { %v3229_v31 = vpop.f32.mrf.mxu1 }
 0x679   : > { %9134 = vmatpush3.bf16.msra.mxu1 %v9895_v26  ;;  %v3249_v37 = vpack.c.bf16 %v3229_v31, %v3226_v35 }
 0x67a   : > { %9135 = vmatprep.subr.bf16.mxu1 %v9896_v22 }
 0x67c   : > { %3461 = vmatmul.mubr.bf16.gmra.mxu1 %v3250_v28 }
 0x67d   : > { %9136 = vmatpush3.bf16.msra.mxu1 %v9896_v22  ;;  %9139 = vmatprep.mubr.bf16.mxu1 %v3243_v36 }
 0x67e   : > { %9137 = vmatprep.subr.bf16.mxu1 %v9897_v30 }
 0x681   : > { %9138 = vmatpush3.bf16.msra.mxu1 %v9897_v30 }
 0x684   : > { %9140 = vmatmul.mubr.bf16.vlgmr.msra.gmra.mxu1 %v3246_v32 }
 0x685   : > { %9143 = vmatprep.mubr.bf16.mxu1 %v3249_v37 }
 0x68c   : > { %9144 = vmatmul.mubr.bf16.gmra.mxu1 %v3252_v33 }
 0x724   : > { %v8652_v38 = vpop.f32.mrf.mxu1 }
 0x726   : > { %v8653_v4 = vpop.f32.mrf.mxu1 }
 0x727   : > { %v8654_v63 = vadd.f32 %v8653_v4, %v8652_v38 }
 0x728   : > { %v8655_v39 = vpop.f32.mrf.mxu1 }
 0x729   : > { %v3439_v13 = vadd.f32 %v8654_v63, %v8207_v0 }
 0x72a   : > { %v8656_v15 = vpop.f32.mrf.mxu1 }
 0x72b   : > { %v8657_v7 = vadd.f32 %v8656_v15, %v8655_v39 }
 0x72c   : > { %v8658_v40 = vpop.f32.mrf.mxu1 }
 0x72d   : > { %v3442_v20 = vadd.f32 %v8657_v7, %v8207_v0 }
 0x72e   : > { %v8659_v41 = vpop.f32.mrf.mxu1 }
 0x72f   : > { %v8660_v10 = vadd.f32 %v8659_v41, %v8658_v40 }
 0x730   : > { %v8661_v42 = vpop.f32.mrf.mxu1 }
 0x731   : > { %v3447_v17 = vadd.f32 %v8660_v10, %v8207_v0 }
 0x732   : > { %v8662_v43 = vpop.f32.mrf.mxu1 }
 0x733   : > { %v8663_v12 = vadd.f32 %v8662_v43, %v8661_v42 }
 0x734   : > { %v8664_v48 = vpop.f32.mrf.mxu1 }
 0x735   : > { %v3450_v24 = vadd.f32 %v8663_v12, %v8207_v0 }
 0x736   : > { %v8665_v62 = vpop.f32.mrf.mxu1 }
 0x737   : > { %v8666_v14 = vadd.f32 %v8665_v62, %v8664_v48 }
 0x738   : > { %v8667_v49 = vpop.f32.mrf.mxu1 }
 0x739   : > { %v3455_v22 = vadd.f32 %v8666_v14, %v8207_v0 }
 0x73a   : > { %v8668_v60 = vpop.f32.mrf.mxu1 }
 0x73b   : > { %v8669_v26 = vadd.f32 %v8668_v60, %v8667_v49 }
 0x73c   : > { %v8670_v54 = vpop.f32.mrf.mxu1 }
 0x73d   : > { %v3458_v42 = vadd.f32 %v8669_v26, %v8207_v0 }
 0x73e   : > { %v8671_v55 = vpop.f32.mrf.mxu1 }
 0x73f   : > { %v8672_v27 = vadd.f32 %v8671_v55, %v8670_v54 }
 0x740   : > { %v8673_v56 = vpop.f32.mrf.mxu1 }
 0x741   : > { %v3463_v4 = vadd.f32 %v8672_v27, %v8207_v0 }
 0x742   : > { %v8674_v61 = vpop.f32.mrf.mxu1 }
 0x743   : > { %v8675_v30 = vadd.f32 %v8674_v61, %v8673_v56 }
 0x744   : > { %v9141_v2 = vpop.f32.mrf.mxu1 }
 0x745   : > { %v11994_v23 = vadd.f32 %v9141_v2, %v3447_v17  ;;  %v3466_v48 = vadd.f32 %v8675_v30, %v8207_v0 }
 0x746   : > { %v3503_v11 = vpop.f32.mrf.mxu1 }
 0x747   : > { %v11992_v19 = vadd.f32 %v3503_v11, %v3439_v13  ;;  %v3570_v37 = vmul.f32 %v11994_v23, %v11994_v23 }
 0x748   : > { %v9142_v16 = vpop.f32.mrf.mxu1 }
 0x749   : > { %v3568_v35 = vmul.f32 %v11992_v19, %v11992_v19  ;;  %v12000_v36 = vadd.f32 %v9142_v16, %v3450_v24 }
 0x74a   : > { %v3506_v21 = vpop.f32.mrf.mxu1 }
 0x74b   : > { %v11996_v25 = vadd.f32 %v3506_v21, %v3442_v20  ;;  %v3571_v15 = vmul.f32 %v12000_v36, %v12000_v36  ;;  %v9898_v20 = vld [vmem:[%s12513_s7] sm:$0xff]  }
 0x74c   : > { %v9145_v34 = vpop.f32.mrf.mxu1  ;;  %9155 = vmatprep.mubr.msk.bf16.mxu0 %vm3069_vm3, %v9898_v20 }
 0x74d   : > { %v3550_v28 = vadd.f32 %v11996_v25, %v11992_v19  ;;  %v3569_v29 = vmul.f32 %v11996_v25, %v11996_v25  ;;  %v12014_v43 = vadd.f32 %v9145_v34, %v3463_v4  ;;  %v9910_v4 = vld [vmem:[#allocation16 + $0x78] sm:$0xff]  }
 0x74e   : > { %v3519_v31 = vpop.f32.mrf.mxu1  ;;  %8704 = vmatprep.subr.bf16.mxu1 %v9910_v4 }
 0x74f   : > { %v3551_v32 = vadd.f32 %v3550_v28, %v11994_v23  ;;  %v3576_v33 = vadd.f32 %v3569_v29, %v3568_v35  ;;  %v12009_v38 = vadd.f32 %v3519_v31, %v3455_v22  ;;  %v3574_v0 = vmul.f32 %v12014_v43, %v12014_v43 }
 0x750   : > { %v9146_v39 = vpop.f32.mrf.mxu1 }
 0x751   : > { %v3577_v40 = vadd.f32 %v3576_v33, %v3570_v37  ;;  %v3552_v41 = vadd.f32 %v3551_v32, %v12000_v36  ;;  %v3572_v60 = vmul.f32 %v12009_v38, %v12009_v38  ;;  %v12021_v56 = vadd.f32 %v9146_v39, %v3466_v48  ;;  %v9911_v39 = vld [vmem:[#allocation16 + $0x38] sm:$0xff]  }
 0x752   : > { %v3522_v62 = vpop.f32.mrf.mxu1  ;;  %8705 = vmatpush3.bf16.msra.mxu1 %v9911_v39 }
 0x753   : > { %v3553_v49 = vadd.f32 %v3552_v41, %v12009_v38  ;;  %v3578_v54 = vadd.f32 %v3577_v40, %v3571_v15  ;;  %v12019_v55 = vadd.f32 %v3522_v62, %v3458_v42  ;;  %v3556_v11 = vsel %vm2848_vm2, %v12021_v56, 0.0  ;;  %v9912_v15 = vld [vmem:[#allocation16 + $0x70] sm:$0xff]  }
 0x754   : > { %v3575_v12 = vmul.f32 %v12021_v56, %v12021_v56  ;;  %v9913_v40 = vld [vmem:[#allocation16 + $0x30] sm:$0xff]   ;;  %8706 = vmatprep.subr.bf16.mxu1 %v9912_v15 }
 0x755   : > { %v3579_v61 = vadd.f32 %v3578_v54, %v3572_v60  ;;  %v3573_v63 = vmul.f32 %v12019_v55, %v12019_v55  ;;  %v3554_v2 = vadd.f32 %v3553_v49, %v12019_v55 }
 0x756   : > { %v3582_v16 = vsel %vm2848_vm2, %v3575_v12, 0.0  ;;  %8707 = vmatpush3.bf16.msra.mxu1 %v9913_v40  ;;  %v3538_v12 = vld [vmem:[#allocation13 + $0x20] sm:$0xff] }
 0x757   : > { %v3555_v7 = vadd.f32 %v3554_v2, %v12014_v43  ;;  %v3580_v10 = vadd.f32 %v3579_v61, %v3573_v63  ;;  %v3540_v61 = vld [vmem:[#allocation13 + $0x30] sm:$0xff] }
 0x759   : > { %v3557_v13 = vadd.f32 %v3556_v11, %v3555_v7  ;;  %v3581_v14 = vadd.f32 %v3580_v10, %v3574_v0  ;;  %v3541_v11 = vld [vmem:[#allocation13 + $0x38] sm:$0x7f] }
 0x75b   : > { %3558 = vadd.xlane.f32.xlu1 %v3557_v13  ;;  %v3583_v17 = vadd.f32 %v3582_v16, %v3581_v14  ;;  %v3539_v13 = vld [vmem:[#allocation13 + $0x28] sm:$0xff] }
 0x75f   : > { %3584 = vadd.xlane.f32.xlu1 %v3583_v17  ;;  %v3548_v17 = vld [vmem:[#allocation14 + $0x30] sm:$0xff] }
 0x7e4   : > { %v3559_v21 = vpop.xlane.xlu1 %3558 }
 0x7e5   : > { %v3560_v24 = vrot.slane %v3559_v21, 4 }
 0x7e7   : > { %v3561_v26 = vadd.f32 %v3560_v24, %v3559_v21 }
 0x7e8   : > { %v3585_v27 = vpop.xlane.xlu1 %3584 }
 0x7e9   : > { %v3562_v34 = vrot.slane %v3561_v26, 2  ;;  %v3586_v22 = vrot.slane %v3585_v27, 4 }
 0x7eb   : > { %v3587_v35 = vadd.f32 %v3586_v22, %v3585_v27  ;;  %v3563_v28 = vadd.f32 %v3562_v34, %v3561_v26  ;;  %v3537_v27 = vld [vmem:[#allocation13 + $0x18] sm:$0xff]  ;;  %v3546_v34 = vld [vmem:[#allocation14 + $0x20] sm:$0xff] }
 0x7ed   : > { %v3588_v29 = vrot.slane %v3587_v35, 2  ;;  %v3564_v30 = vrot.slane %v3563_v28, 1 }
 0x7ef   : > { %v3565_v31 = vadd.f32 %v3564_v30, %v3563_v28  ;;  %v3589_v37 = vadd.f32 %v3588_v29, %v3587_v35 }
 0x7f1   : > { %9397 = vpush %v3565_v31  ;;  %v3590_v32 = vrot.slane %v3589_v37, 1 }
 0x7f3   : > { %v3591_v33 = vadd.f32 %v3590_v32, %v3589_v37 }
 0x7f5   : > { %9399 = vpush %v3591_v33 }
 0x822   : > { %s9398_s2 = spop %9397 }
 0x823   : > { %v3567_v41 = vstv %s9398_s2  ;;  %s12516_s2 = sld [smem:[#allocation97_spill]] }
 0x824   : > { %v3594_v42 = vmul.f32 0.0004960318, %v3567_v41  ;;  %v3544_v41 = vld [vmem:[#allocation14 + $0x10] sm:$0xff] }
 0x826   : > { %s9400_s11 = spop %9399  ;;  %v3596_v49 = vmul.f32 %v3594_v42, %v3594_v42  ;;  %v3604_v63 = vsub.f32 %v12014_v43, %v3594_v42  ;;  %v3605_v2 = vsub.f32 %v12021_v56, %v3594_v42  ;;  %v3602_v0 = vsub.f32 %v12009_v38, %v3594_v42  ;;  %v3536_v43 = vld [vmem:[#allocation13 + $0x10] sm:$0xff]  ;;  %v3549_v56 = vld [vmem:[#allocation14 + $0x38] sm:$0x7f]  ;;  %v3547_v38 = vld [vmem:[#allocation14 + $0x28] sm:$0xff] }
 0x827   : > { %v3593_v48 = vstv %s9400_s11  ;;  %v3603_v7 = vsub.f32 %v12019_v55, %v3594_v42  ;;  %v3600_v14 = vsub.f32 %v11994_v23, %v3594_v42  ;;  %v3601_v16 = vsub.f32 %v12000_v36, %v3594_v42 }
 0x828   : > { %v3595_v62 = vmul.f32 0.0004960318, %v3593_v48  ;;  %v3598_v35 = vsub.f32 %v11992_v19, %v3594_v42  ;;  %v3599_v28 = vsub.f32 %v11996_v25, %v3594_v42  ;;  %v3534_v48 = vld [vmem:[#allocation13] sm:$0xff] }
 0x82a   : > { %v3597_v60 = vsub.f32 %v3595_v62, %v3596_v49  ;;  %v3535_v62 = vld [vmem:[#allocation13 + $0x8] sm:$0xff]  ;;  %v3545_v49 = vld [vmem:[#allocation14 + $0x18] sm:$0xff] }
 0x82c   : > { %v3606_v54 = vadd.f32 1e-05, %v3597_v60 }
 0x82e   : > { %10149 = vrsqrt.f32 %v3606_v54 }
 0x83b   : > { %v10150_v10 = vpop.eup %10149 }
 0x83c   : > { %v3614_v20 = vmul.f32 %v10150_v10, %v3604_v63  ;;  %v3615_v21 = vmul.f32 %v10150_v10, %v3605_v2  ;;  %v3612_v24 = vmul.f32 %v10150_v10, %v3602_v0  ;;  %v3613_v26 = vmul.f32 %v10150_v10, %v3603_v7  ;;  %v3542_v7 = vld [vmem:[#allocation14] sm:$0xff] }
 0x83d   : > { %v3610_v22 = vmul.f32 %v10150_v10, %v3600_v14  ;;  %v3611_v55 = vmul.f32 %v10150_v10, %v3601_v16  ;;  %v3608_v32 = vmul.f32 %v10150_v10, %v3598_v35  ;;  %v3609_v33 = vmul.f32 %v10150_v10, %v3599_v28  ;;  %v9906_v35 = vld [vmem:[%s12513_s7 + $0x40] sm:$0xff]   ;;  %v9907_v28 = vld [vmem:[%s12513_s7 + $0x48] sm:$0xff]  }
 0x83e   : > { %v3622_v29 = vmul.f32 %v3614_v20, %v3540_v61  ;;  %v3623_v23 = vmul.f32 %v3615_v21, %v3541_v11  ;;  %v3620_v30 = vmul.f32 %v3612_v24, %v3538_v12  ;;  %v3621_v36 = vmul.f32 %v3613_v26, %v3539_v13  ;;  %v3543_v11 = vld [vmem:[#allocation14 + $0x8] sm:$0xff] }
 0x83f   : > { %v3618_v31 = vmul.f32 %v3610_v22, %v3536_v43  ;;  %v3619_v37 = vmul.f32 %v3611_v55, %v3537_v27  ;;  %v3616_v25 = vmul.f32 %v3608_v32, %v3534_v48  ;;  %v3617_v42 = vmul.f32 %v3609_v33, %v3535_v62  ;;  %v9899_v43 = vld [vmem:[%s12513_s7 + $0x8] sm:$0xff]   ;;  %v9900_v27 = vld [vmem:[%s12513_s7 + $0x10] sm:$0xff]   ;;  %v9905_v55 = vld [vmem:[%s12513_s7 + $0x38] sm:$0xff]  }
 0x840   : > { %v3630_v4 = vadd.f32 %v3622_v29, %v3548_v17  ;;  %v3631_v39 = vadd.f32 %v3623_v23, %v3549_v56  ;;  %v3628_v15 = vadd.f32 %v3620_v30, %v3546_v34  ;;  %v3629_v40 = vadd.f32 %v3621_v36, %v3547_v38  ;;  %v9901_v56 = vld [vmem:[%s12513_s7 + $0x18] sm:$0xff]   ;;  %v9902_v34 = vld [vmem:[%s12513_s7 + $0x20] sm:$0xff]   ;;  %v9903_v38 = vld [vmem:[%s12513_s7 + $0x28] sm:$0xff]  }
 0x841   : > { %v3626_v54 = vadd.f32 %v3618_v31, %v3544_v41  ;;  %v3627_v0 = vadd.f32 %v3619_v37, %v3545_v49  ;;  %v3624_v12 = vadd.f32 %v3616_v25, %v3542_v7  ;;  %v3625_v17 = vadd.f32 %v3617_v42, %v3543_v11  ;;  %v9904_v22 = vld [vmem:[%s12513_s7 + $0x30] sm:$0xff]   ;;  %v9909_v23 = vld [vmem:[%s12513_s7 + $0x58] sm:$0xff]   ;;  %v9916_v31 = vld [vmem:[#allocation16 + $0x60] sm:$0xff]  }
 0x842   : > { %v3638_v60 = vmax.f32 %v3630_v4, 0.0  ;;  %v3639_v19 = vmax.f32 %v3631_v39, 0.0  ;;  %v3636_v63 = vmax.f32 %v3628_v15, 0.0  ;;  %v3637_v2 = vmax.f32 %v3629_v40, 0.0  ;;  %v9908_v29 = vld [vmem:[%s12513_s7 + $0x50] sm:$0xff]   ;;  %v9917_v37 = vld [vmem:[#allocation16 + $0x20] sm:$0xff]  }
 0x843   : > { %v3634_v14 = vmax.f32 %v3626_v54, 0.0  ;;  %v3635_v16 = vmax.f32 %v3627_v0, 0.0  ;;  %v3632_v21 = vmax.f32 %v3624_v12, 0.0  ;;  %v3633_v24 = vmax.f32 %v3625_v17, 0.0  ;;  %v9914_v30 = vld [vmem:[#allocation16 + $0x68] sm:$0xff]   ;;  %v9918_v32 = vld [vmem:[#allocation16 + $0x58] sm:$0xff]  }
 0x844   : > { %v3715_v61 = vpack.c.bf16 %v3639_v19, %v3638_v60  ;;  %v3714_v13 = vpack.c.bf16 %v3637_v2, %v3636_v63  ;;  %v9915_v36 = vld [vmem:[#allocation16 + $0x28] sm:$0xff]   ;;  %8708 = vmatprep.subr.bf16.mxu1 %v9914_v30  ;;  %v9919_v33 = vld [vmem:[#allocation16 + $0x18] sm:$0xff]   ;;  %v9921_v39 = vld [vmem:[#allocation16 + $0x50] sm:$0xff]  }
 0x845   : > { %v3713_v20 = vpack.c.bf16 %v3635_v16, %v3634_v14  ;;  %v3712_v26 = vpack.c.bf16 %v3633_v24, %v3632_v21  ;;  %8709 = vmatpush3.bf16.msra.mxu1 %v9915_v36  ;;  %v9920_v4 = vld [vmem:[#allocation16 + $0xb8] sm:$0xff]   ;;  %v9923_v15 = vld [vmem:[#allocation16 + $0xb0] sm:$0xff]   ;;  %v9924_v41 = vld [vmem:[#allocation16 + $0x48] sm:$0xff]  }
 0x846   : > { %v3813_v10 = vand.u32 %v3715_v61, %v11937_v52  ;;  %8710 = vmatprep.subr.bf16.mxu1 %v9916_v31  ;;  %v9922_v40 = vld [vmem:[#allocation16 + $0x10] sm:$0xff]   ;;  %v9925_v48 = vld [vmem:[#allocation16 + $0x8] sm:$0xff]   ;;  %v9927_v49 = vld [vmem:[#allocation16 + $0x40] sm:$0xff]  }
 0x847   : > { %v9926_v62 = vld [vmem:[#allocation16 + $0xa8] sm:$0xff]   ;;  %v9929_v60 = vld [vmem:[#allocation16 + $0xa0] sm:$0xff]   ;;  %v9930_v54 = vld [vmem:[#allocation16 + $0x98] sm:$0xff]  }
 0x848   : > { %9147 = vmatprep.subr.bf16.mxu0 %v3813_v10  ;;  %v9928_v19 = vld [vmem:[#allocation16] sm:$0xff]   ;;  %v9931_v25 = vld [vmem:[#allocation16 + $0x90] sm:$0xff]   ;;  %v9932_v42 = vld [vmem:[#allocation16 + $0x88] sm:$0xff]  }
 0x849   : > { %9148 = vmatpush3.bf16.msra.mxu0 %v3813_v10  ;;  %8711 = vmatpush3.bf16.msra.mxu1 %v9917_v37  ;;  %v9933_v61 = vld [vmem:[#allocation16 + $0x80] sm:$0xff]  }
 0x84a   : > { %9149 = vmatprep.subr.bf16.mxu0 %v3714_v13  ;;  %8712 = vmatprep.subr.bf16.mxu1 %v9918_v32 }
 0x84d   : > { %9150 = vmatpush3.bf16.msra.mxu0 %v3714_v13  ;;  %8713 = vmatpush3.bf16.msra.mxu1 %v9919_v33 }
 0x84e   : > { %9151 = vmatprep.subr.bf16.mxu0 %v3713_v20  ;;  %8714 = vmatprep.subr.bf16.mxu1 %v9921_v39 }
 0x851   : > { %9152 = vmatpush3.bf16.msra.mxu0 %v3713_v20  ;;  %8715 = vmatpush3.bf16.msra.mxu1 %v9922_v40 }
 0x852   : > { %9153 = vmatprep.subr.bf16.mxu0 %v3712_v26  ;;  %8716 = vmatprep.subr.bf16.mxu1 %v9924_v41 }
 0x855   : > { %9154 = vmatpush3.bf16.msra.mxu0 %v3712_v26  ;;  %8717 = vmatpush3.bf16.msra.mxu1 %v9925_v48 }
 0x856   : > { %9179 = vmatprep.subr.bf16.mxu0 %v9920_v4  ;;  %8718 = vmatprep.subr.bf16.mxu1 %v9927_v49 }
 0x858   : > { %9156 = vmatmul.mubr.msk.bf16.vlgmr.msra.gmra.mxu0 %vm3069_vm3, %v9899_v43 }
 0x859   : > { %9159 = vmatprep.mubr.msk.bf16.mxu0 %vm3069_vm3, %v9900_v27  ;;  %9180 = vmatpush3.bf16.msra.mxu0 %v9920_v4 }
 0x85a   : > { %9181 = vmatprep.subr.bf16.mxu0 %v9923_v15  ;;  %8719 = vmatpush3.bf16.msra.mxu1 %v9928_v19 }
 0x85d   : > { %9182 = vmatpush3.bf16.msra.mxu0 %v9923_v15 }
 0x85e   : > { %9183 = vmatprep.subr.bf16.mxu0 %v9926_v62 }
 0x860   : > { %9160 = vmatmul.mubr.msk.bf16.gmra.mxu0 %vm3069_vm3, %v9901_v56 }
 0x861   : > { %9163 = vmatprep.mubr.msk.bf16.mxu0 %vm3069_vm3, %v9902_v34  ;;  %9184 = vmatpush3.bf16.msra.mxu0 %v9926_v62 }
 0x862   : > { %9185 = vmatprep.subr.bf16.mxu0 %v9929_v60 }
 0x865   : > { %9186 = vmatpush3.bf16.msra.mxu0 %v9929_v60 }
 0x866   : > { %9187 = vmatprep.subr.bf16.mxu0 %v9930_v54 }
 0x868   : > { %9164 = vmatmul.mubr.msk.bf16.gmra.mxu0 %vm3069_vm3, %v9903_v38 }
 0x869   : > { %9167 = vmatprep.mubr.msk.bf16.mxu0 %vm3069_vm3, %v9904_v22  ;;  %9188 = vmatpush3.bf16.msra.mxu0 %v9930_v54 }
 0x86a   : > { %9189 = vmatprep.subr.bf16.mxu0 %v9931_v25 }
 0x86d   : > { %9190 = vmatpush3.bf16.msra.mxu0 %v9931_v25 }
 0x86e   : > { %9191 = vmatprep.subr.bf16.mxu0 %v9932_v42 }
 0x870   : > { %9168 = vmatmul.mubr.msk.bf16.gmra.mxu0 %vm3069_vm3, %v9905_v55 }
 0x871   : > { %9171 = vmatprep.mubr.msk.bf16.mxu0 %vm3069_vm3, %v9906_v35  ;;  %9192 = vmatpush3.bf16.msra.mxu0 %v9932_v42 }
 0x872   : > { %9193 = vmatprep.subr.bf16.mxu0 %v9933_v61 }
 0x875   : > { %9194 = vmatpush3.bf16.msra.mxu0 %v9933_v61  ;;  %v8256_v61 = vld [vmem:[#allocation17] ss:$0 sm:$0xff] }
 0x878   : > { %9172 = vmatmul.mubr.msk.bf16.gmra.mxu0 %vm3069_vm3, %v9907_v28 }
 0x879   : > { %9175 = vmatprep.mubr.msk.bf16.mxu0 %vm3069_vm3, %v9908_v29 }
 0x880   : > { %9176 = vmatmul.mubr.msk.bf16.gmra.mxu0 %vm3069_vm3, %v9909_v23 }
 0x918   : > { %v9157_v63 = vpop.f32.mrf.mxu0 }
 0x91a   : > { %v3849_v2 = vpop.f32.mrf.mxu0 }
 0x91c   : > { %v9158_v0 = vpop.f32.mrf.mxu0 }
 0x91d   : > { %v3947_v38 = vpack.c.bf16 %v9158_v0, %v9157_v63 }
 0x91e   : > { %v3852_v7 = vpop.f32.mrf.mxu0 }
 0x91f   : > { %v3944_v24 = vpack.c.bf16 %v3852_v7, %v3849_v2 }
 0x920   : > { %v9161_v11 = vpop.f32.mrf.mxu0 }
 0x922   : > { %v3865_v10 = vpop.f32.mrf.mxu0 }
 0x924   : > { %v9162_v12 = vpop.f32.mrf.mxu0 }
 0x925   : > { %v3953_v15 = vpack.c.bf16 %v9162_v12, %v9161_v11 }
 0x926   : > { %v3868_v13 = vpop.f32.mrf.mxu0 }
 0x927   : > { %v3950_v30 = vpack.c.bf16 %v3868_v13, %v3865_v10 }
 0x928   : > { %v9165_v14 = vpop.f32.mrf.mxu0 }
 0x92a   : > { %v3881_v16 = vpop.f32.mrf.mxu0 }
 0x92c   : > { %v9166_v17 = vpop.f32.mrf.mxu0 }
 0x92d   : > { %v3948_v43 = vpack.c.bf16 %v9166_v17, %v9165_v14 }
 0x92e   : > { %v3884_v20 = vpop.f32.mrf.mxu0 }
 0x92f   : > { %v3945_v21 = vpack.c.bf16 %v3884_v20, %v3881_v16 }
 0x930   : > { %v9169_v26 = vpop.f32.mrf.mxu0 }
 0x931   : > { %4139 = vmatprep.mubr.bf16.mxu1 %v3945_v21 }
 0x932   : > { %4140 = vmatmul.mubr.bf16.vlgmr.msra.gmra.mxu1 %v3944_v24  ;;  %v3897_v27 = vpop.f32.mrf.mxu0 }
 0x933   : > { %4147 = vmatprep.mubr.bf16.mxu1 %v3948_v43 }
 0x934   : > { %v9170_v56 = vpop.f32.mrf.mxu0 }
 0x935   : > { %v3954_v37 = vpack.c.bf16 %v9170_v56, %v9169_v26 }
 0x936   : > { %v3900_v34 = vpop.f32.mrf.mxu0 }
 0x937   : > { %v3951_v55 = vpack.c.bf16 %v3900_v34, %v3897_v27 }
 0x938   : > { %v9173_v22 = vpop.f32.mrf.mxu0 }
 0x93a   : > { %4148 = vmatmul.mubr.bf16.gmra.mxu1 %v3947_v38  ;;  %v3913_v35 = vpop.f32.mrf.mxu0 }
 0x93b   : > { %4155 = vmatprep.mubr.bf16.mxu1 %v3951_v55 }
 0x93c   : > { %v9174_v28 = vpop.f32.mrf.mxu0 }
 0x93d   : > { %v3949_v36 = vpack.c.bf16 %v9174_v28, %v9173_v22 }
 0x93e   : > { %v3916_v29 = vpop.f32.mrf.mxu0 }
 0x93f   : > { %v3946_v23 = vpack.c.bf16 %v3916_v29, %v3913_v35 }
 0x940   : > { %v9177_v31 = vpop.f32.mrf.mxu0 }
 0x941   : > { %9195 = vmatprep.mubr.bf16.mxu0 %v3946_v23 }
 0x942   : > { %4156 = vmatmul.mubr.bf16.gmra.mxu1 %v3950_v30  ;;  %v3929_v32 = vpop.f32.mrf.mxu0  ;;  %9196 = vmatmul.mubr.bf16.vlgmr.msra.gmra.mxu0 %v3949_v36 }
 0x943   : > { %4163 = vmatprep.mubr.bf16.mxu1 %v3954_v37 }
 0x944   : > { %v9178_v33 = vpop.f32.mrf.mxu0 }
 0x945   : > { %v3955_v40 = vpack.c.bf16 %v9178_v33, %v9177_v31 }
 0x946   : > { %v3932_v4 = vpop.f32.mrf.mxu0 }
 0x947   : > { %v3952_v39 = vpack.c.bf16 %v3932_v4, %v3929_v32 }
 0x949   : > { %9199 = vmatprep.mubr.bf16.mxu0 %v3952_v39 }
 0x94a   : > { %4164 = vmatmul.mubr.bf16.gmra.mxu1 %v3953_v15  ;;  %9200 = vmatmul.mubr.bf16.gmra.mxu0 %v3955_v40 }
 0x9f2   : > { %v8720_v41 = vpop.f32.mrf.mxu1 }
 0x9f4   : > { %v8721_v48 = vpop.f32.mrf.mxu1 }
 0x9f5   : > { %v8722_v25 = vadd.f32 %v8721_v48, %v8720_v41 }
 0x9f6   : > { %v8723_v62 = vpop.f32.mrf.mxu1 }
 0x9f7   : > { %v4142_v11 = vadd.f32 %v8722_v25, %v8256_v61 }
 0x9f8   : > { %v8724_v49 = vpop.f32.mrf.mxu1 }
 0x9f9   : > { %v8725_v7 = vadd.f32 %v8724_v49, %v8723_v62 }
 0x9fa   : > { %v8726_v60 = vpop.f32.mrf.mxu1 }
 0x9fb   : > { %v4145_v24 = vadd.f32 %v8725_v7, %v8256_v61 }
 0x9fc   : > { %v8727_v19 = vpop.f32.mrf.mxu1 }
 0x9fd   : > { %v8728_v63 = vadd.f32 %v8727_v19, %v8726_v60 }
 0x9fe   : > { %v8729_v54 = vpop.f32.mrf.mxu1 }
 0x9ff   : > { %v4150_v14 = vadd.f32 %v8728_v63, %v8256_v61 }
 0xa00   : > { %v8730_v42 = vpop.f32.mrf.mxu1 }
 0xa01   : > { %v8731_v13 = vadd.f32 %v8730_v42, %v8729_v54 }
 0xa02   : > { %v8732_v2 = vpop.f32.mrf.mxu1  ;;  %v9197_v0 = vpop.f32.mrf.mxu0 }
 0xa03   : > { %v12069_v26 = vadd.f32 %v9197_v0, %v4150_v14  ;;  %v4153_v56 = vadd.f32 %v8731_v13, %v8256_v61 }
 0xa04   : > { %v8733_v10 = vpop.f32.mrf.mxu1  ;;  %v4206_v12 = vpop.f32.mrf.mxu0 }
 0xa05   : > { %v12067_v16 = vadd.f32 %v4206_v12, %v4142_v11  ;;  %v8734_v21 = vadd.f32 %v8733_v10, %v8732_v2  ;;  %v4273_v30 = vmul.f32 %v12069_v26, %v12069_v26 }
 0xa06   : > { %v8735_v17 = vpop.f32.mrf.mxu1  ;;  %v9198_v20 = vpop.f32.mrf.mxu0 }
 0xa07   : > { %v4271_v38 = vmul.f32 %v12067_v16, %v12067_v16  ;;  %v12075_v35 = vadd.f32 %v9198_v20, %v4153_v56  ;;  %v4158_v23 = vadd.f32 %v8734_v21, %v8256_v61 }
 0xa08   : > { %v8736_v43 = vpop.f32.mrf.mxu1  ;;  %v4209_v27 = vpop.f32.mrf.mxu0 }
 0xa09   : > { %v12071_v34 = vadd.f32 %v4209_v27, %v4145_v24  ;;  %v8737_v36 = vadd.f32 %v8736_v43, %v8735_v17  ;;  %v4274_v41 = vmul.f32 %v12075_v35, %v12075_v35 }
 0xa0a   : > { %v8738_v22 = vpop.f32.mrf.mxu1  ;;  %v9201_v55 = vpop.f32.mrf.mxu0 }
 0xa0b   : > { %v4253_v28 = vadd.f32 %v12071_v34, %v12067_v16  ;;  %v4272_v29 = vmul.f32 %v12071_v34, %v12071_v34  ;;  %v4161_v19 = vadd.f32 %v8737_v36, %v8256_v61 }
 0xa0c   : > { %v8739_v31 = vpop.f32.mrf.mxu1  ;;  %v4222_v37 = vpop.f32.mrf.mxu0 }
 0xa0d   : > { %v4254_v32 = vadd.f32 %v4253_v28, %v12069_v26  ;;  %v4279_v33 = vadd.f32 %v4272_v29, %v4271_v38  ;;  %v8740_v4 = vadd.f32 %v8739_v31, %v8738_v22  ;;  %v12084_v39 = vadd.f32 %v4222_v37, %v4158_v23  ;;  %v9934_v22 = vld [vmem:[#allocation22] sm:$0xff]  }
 0xa0e   : > { %v8741_v15 = vpop.f32.mrf.mxu1  ;;  %v9202_v40 = vpop.f32.mrf.mxu0  ;;  %9211 = vmatprep.mubr.msk.bf16.mxu1 %vm3069_vm3, %v9934_v22  ;;  %v4241_v22 = vld [vmem:[#allocation19 + $0x20] sm:$0xff] }
 0xa0f   : > { %v4280_v48 = vadd.f32 %v4279_v33, %v4273_v30  ;;  %v4166_v62 = vadd.f32 %v8740_v4, %v8256_v61  ;;  %v4255_v49 = vadd.f32 %v4254_v32, %v12075_v35  ;;  %v4275_v42 = vmul.f32 %v12084_v39, %v12084_v39 }
 0xa10   : > { %v8742_v60 = vpop.f32.mrf.mxu1  ;;  %v4225_v54 = vpop.f32.mrf.mxu0 }
 0xa11   : > { %v4256_v25 = vadd.f32 %v4255_v49, %v12084_v39  ;;  %v4281_v63 = vadd.f32 %v4280_v48, %v4274_v41  ;;  %v8743_v2 = vadd.f32 %v8742_v60, %v8741_v15  ;;  %v12092_v0 = vadd.f32 %v9201_v55, %v4166_v62  ;;  %v9944_v48 = vld [vmem:[%s12514_s26 + $0x78] sm:$0xff]   ;;  %v9946_v49 = vld [vmem:[%s12515_s16 + $0x70] sm:$0xff]  }
 0xa12   : > { %v12094_v7 = vadd.f32 %v4225_v54, %v4161_v19  ;;  %v9945_v62 = vld [vmem:[%s12515_s16 + $0x38] sm:$0xff]   ;;  %8770 = vmatprep.subr.bf16.mxu0 %v9944_v48  ;;  %v9947_v60 = vld [vmem:[%s12515_s16 + $0x30] sm:$0xff]   ;;  %v9948_v19 = vld [vmem:[%s12515_s16 + $0x68] sm:$0xff]  }
 0xa13   : > { %v4282_v10 = vadd.f32 %v4281_v63, %v4275_v42  ;;  %v4169_v11 = vadd.f32 %v8743_v2, %v8256_v61  ;;  %v4277_v20 = vmul.f32 %v12092_v0, %v12092_v0  ;;  %8771 = vmatpush3.bf16.msra.mxu0 %v9945_v62  ;;  %v9949_v54 = vld [vmem:[%s12515_s16 + $0x28] sm:$0xff]   ;;  %v9951_v42 = vld [vmem:[%s12515_s16 + $0x20] sm:$0xff]  }
 0xa14   : > { %v4257_v12 = vadd.f32 %v4256_v25, %v12094_v7  ;;  %v4276_v13 = vmul.f32 %v12094_v7, %v12094_v7  ;;  %8772 = vmatprep.subr.bf16.mxu0 %v9946_v49  ;;  %v9950_v25 = vld [vmem:[%s12515_s16 + $0x60] sm:$0xff]   ;;  %v4247_v49 = vld [vmem:[#allocation20 + $0x10] sm:$0xff] }
 0xa15   : > { %v12099_v14 = vadd.f32 %v9202_v40, %v4169_v11 }
 0xa16   : > { %v4258_v17 = vadd.f32 %v4257_v12, %v12092_v0  ;;  %v4283_v21 = vadd.f32 %v4282_v10, %v4276_v13 }
 0xa17   : > { %v4259_v24 = vsel %vm2848_vm2, %v12099_v14, 0.0  ;;  %v4278_v43 = vmul.f32 %v12099_v14, %v12099_v14  ;;  %8773 = vmatpush3.bf16.msra.mxu0 %v9947_v60  ;;  %v4238_v60 = vld [vmem:[#allocation19 + $0x8] sm:$0xff] }
 0xa18   : > { %v4260_v61 = vadd.f32 %v4259_v24, %v4258_v17  ;;  %v4284_v27 = vadd.f32 %v4283_v21, %v4277_v20  ;;  %8774 = vmatprep.subr.bf16.mxu0 %v9948_v19  ;;  %v4243_v20 = vld [vmem:[#allocation19 + $0x30] sm:$0xff]  ;;  %v4244_v21 = vld [vmem:[#allocation19 + $0x38] sm:$0x7f] }
 0xa19   : > { %v4285_v56 = vsel %vm2848_vm2, %v4278_v43, 0.0 }
 0xa1a   : > { %4261 = vadd.xlane.f32.xlu0 %v4260_v61  ;;  %v4286_v38 = vadd.f32 %v4285_v56, %v4284_v27 }
 0xa1b   : > { %8775 = vmatpush3.bf16.msra.mxu0 %v9949_v54 }
 0xa1c   : > { %4287 = vadd.xlane.f32.xlu1 %v4286_v38  ;;  %8776 = vmatprep.subr.bf16.mxu0 %v9950_v25  ;;  %v4251_v38 = vld [vmem:[#allocation20 + $0x30] sm:$0xff] }
 0xa1f   : > { %8777 = vmatpush3.bf16.msra.mxu0 %v9951_v42 }
 0xaa3   : > { %v4262_v55 = vpop.xlane.xlu0 %4261 }
 0xaa4   : > { %v4263_v28 = vrot.slane %v4262_v55, 4 }
 0xaa5   : > { %v4288_v29 = vpop.xlane.xlu1 %4287 }
 0xaa6   : > { %v4264_v23 = vadd.f32 %v4263_v28, %v4262_v55  ;;  %v4289_v30 = vrot.slane %v4288_v29, 4  ;;  %v4242_v55 = vld [vmem:[#allocation19 + $0x28] sm:$0xff] }
 0xaa8   : > { %v4265_v36 = vrot.slane %v4264_v23, 2  ;;  %v4290_v31 = vadd.f32 %v4289_v30, %v4288_v29 }
 0xaaa   : > { %v4291_v37 = vrot.slane %v4290_v31, 2  ;;  %v4266_v32 = vadd.f32 %v4265_v36, %v4264_v23  ;;  %v4252_v36 = vld [vmem:[#allocation20 + $0x38] sm:$0x7f] }
 0xaac   : > { %v4267_v33 = vrot.slane %v4266_v32, 1  ;;  %v4292_v4 = vadd.f32 %v4291_v37, %v4290_v31 }
 0xaae   : > { %v4268_v15 = vadd.f32 %v4267_v33, %v4266_v32  ;;  %v4293_v40 = vrot.slane %v4292_v4, 1  ;;  %v4240_v32 = vld [vmem:[#allocation19 + $0x18] sm:$0xff]  ;;  %v4250_v33 = vld [vmem:[#allocation20 + $0x28] sm:$0xff] }
 0xab0   : > { %9401 = vpush %v4268_v15  ;;  %v4294_v41 = vadd.f32 %v4293_v40, %v4292_v4  ;;  %v4237_v40 = vld [vmem:[#allocation19] sm:$0xff] }
 0xab2   : > { %9403 = vpush %v4294_v41 }
 0xae1   : > { %s9402_s4 = spop %9401 }
 0xae2   : > { %v4270_v63 = vstv %s9402_s4  ;;  %s12517_s4 = sld [smem:[#allocation104_spill]] }
 0xae3   : > { %v4297_v2 = vmul.f32 0.0004960318, %v4270_v63  ;;  %s9404_s10 = spop %9403 }
 0xae4   : > { %v4296_v10 = vstv %s9404_s10  ;;  %s12518_s10 = sld [smem:[#allocation102_spill]] }
 0xae5   : > { %v4298_v11 = vmul.f32 0.0004960318, %v4296_v10  ;;  %v4299_v12 = vmul.f32 %v4297_v2, %v4297_v2  ;;  %v4307_v24 = vsub.f32 %v12092_v0, %v4297_v2  ;;  %v4308_v43 = vsub.f32 %v12099_v14, %v4297_v2 }
 0xae6   : > { %v4305_v61 = vsub.f32 %v12084_v39, %v4297_v2  ;;  %v4306_v27 = vsub.f32 %v12094_v7, %v4297_v2  ;;  %v4303_v28 = vsub.f32 %v12069_v26, %v4297_v2  ;;  %v4304_v29 = vsub.f32 %v12075_v35, %v4297_v2  ;;  %v4239_v39 = vld [vmem:[#allocation19 + $0x10] sm:$0xff]  ;;  %v4249_v7 = vld [vmem:[#allocation20 + $0x20] sm:$0xff] }
 0xae7   : > { %v4300_v13 = vsub.f32 %v4298_v11, %v4299_v12  ;;  %v4301_v23 = vsub.f32 %v12067_v16, %v4297_v2  ;;  %v4302_v30 = vsub.f32 %v12071_v34, %v4297_v2  ;;  %v4248_v34 = vld [vmem:[#allocation20 + $0x18] sm:$0xff] }
 0xae9   : > { %v4309_v17 = vadd.f32 1e-05, %v4300_v13 }
 0xaeb   : > { %10151 = vrsqrt.f32 %v4309_v17 }
 0xaf8   : > { %v10152_v56 = vpop.eup %10151 }
 0xaf9   : > { %v4317_v0 = vmul.f32 %v10152_v56, %v4307_v24  ;;  %v4318_v31 = vmul.f32 %v10152_v56, %v4308_v43  ;;  %v4315_v14 = vmul.f32 %v10152_v56, %v4305_v61  ;;  %v4316_v37 = vmul.f32 %v10152_v56, %v4306_v27  ;;  %v4246_v61 = vld [vmem:[#allocation20 + $0x8] sm:$0xff] }
 0xafa   : > { %v4313_v4 = vmul.f32 %v10152_v56, %v4303_v28  ;;  %v4314_v15 = vmul.f32 %v10152_v56, %v4304_v29  ;;  %v4311_v41 = vmul.f32 %v10152_v56, %v4301_v23  ;;  %v4312_v26 = vmul.f32 %v10152_v56, %v4302_v30 }
 0xafb   : > { %v4325_v48 = vmul.f32 %v4317_v0, %v4243_v20  ;;  %v4326_v35 = vmul.f32 %v4318_v31, %v4244_v21  ;;  %v4323_v62 = vmul.f32 %v4315_v14, %v4241_v22  ;;  %v4324_v16 = vmul.f32 %v4316_v37, %v4242_v55  ;;  %v4245_v21 = vld [vmem:[#allocation20] sm:$0xff]  ;;  %v9943_v31 = vld [vmem:[#allocation22 + $0x48] sm:$0xff]   ;;  %v9952_v14 = vld [vmem:[%s12515_s16 + $0x58] sm:$0xff]  }
 0xafc   : > { %v4321_v19 = vmul.f32 %v4313_v4, %v4239_v39  ;;  %v4322_v54 = vmul.f32 %v4314_v15, %v4240_v32  ;;  %v4319_v12 = vmul.f32 %v4311_v41, %v4237_v40  ;;  %v4320_v13 = vmul.f32 %v4312_v26, %v4238_v60  ;;  %8778 = vmatprep.subr.bf16.mxu0 %v9952_v14  ;;  %v9953_v37 = vld [vmem:[%s12515_s16 + $0x18] sm:$0xff]   ;;  %v9960_v4 = vld [vmem:[%s12515_s16 + $0xf0] sm:$0xff]   ;;  %v9957_v40 = vld [vmem:[%s12515_s16 + $0x48] sm:$0xff]  }
 0xafd   : > { %v4333_v25 = vadd.f32 %v4325_v48, %v4251_v38  ;;  %v4334_v42 = vadd.f32 %v4326_v35, %v4252_v36  ;;  %v4331_v63 = vadd.f32 %v4323_v62, %v4249_v7  ;;  %v4332_v2 = vadd.f32 %v4324_v16, %v4250_v33  ;;  %v9956_v39 = vld [vmem:[%s12515_s16 + $0xf8] sm:$0xff]   ;;  %8779 = vmatpush3.bf16.msra.mxu0 %v9953_v37  ;;  %v9954_v7 = vld [vmem:[%s12515_s16 + $0x50] sm:$0xff]   ;;  %v9959_v41 = vld [vmem:[%s12515_s16 + $0x8] sm:$0xff]  }
 0xafe   : > { %v4329_v10 = vadd.f32 %v4321_v19, %v4247_v49  ;;  %v4330_v11 = vadd.f32 %v4322_v54, %v4248_v34  ;;  %v4327_v22 = vadd.f32 %v4319_v12, %v4245_v21  ;;  %v4328_v55 = vadd.f32 %v4320_v13, %v4246_v61  ;;  %v9958_v32 = vld [vmem:[%s12515_s16 + $0xb8] sm:$0xff]   ;;  %v9955_v33 = vld [vmem:[%s12515_s16 + $0x10] sm:$0xff]   ;;  %8780 = vmatprep.subr.bf16.mxu0 %v9954_v7  ;;  %v9964_v26 = vld [vmem:[%s12515_s16 + $0xe8] sm:$0xff]  }
 0xaff   : > { %v4341_v17 = vmax.f32 %v4333_v25, 0.0  ;;  %v4342_v24 = vmax.f32 %v4334_v42, 0.0  ;;  %v4339_v43 = vmax.f32 %v4331_v63, 0.0  ;;  %v4340_v20 = vmax.f32 %v4332_v2, 0.0  ;;  %v9962_v15 = vld [vmem:[%s12515_s16 + $0xb0] sm:$0xff]   ;;  %v9965_v48 = vld [vmem:[%s12515_s16 + $0xa8] sm:$0xff]  }
 0xb00   : > { %v4337_v38 = vmax.f32 %v4329_v10, 0.0  ;;  %v4338_v30 = vmax.f32 %v4330_v11, 0.0  ;;  %v4335_v0 = vmax.f32 %v4327_v22, 0.0  ;;  %v9961_v35 = vld [vmem:[%s12515_s16 + $0x40] sm:$0xff]   ;;  %v9966_v34 = vld [vmem:[%s12515_s16 + $0x138] sm:$0xff]   ;;  %v9973_v54 = vld [vmem:[%s12515_s16 + $0xd0] sm:$0xff]  }
 0xb01   : > { %v4349_v27 = vadd.f32 %v4341_v17, %v2931_v50  ;;  %v4350_v56 = vadd.f32 %v4342_v24, %v2932_v51  ;;  %v4347_v29 = vadd.f32 %v4339_v43, %v2929_v57  ;;  %v4348_v23 = vadd.f32 %v4340_v20, %v2930_v58  ;;  %8781 = vmatpush3.bf16.msra.mxu0 %v9955_v33  ;;  %v9963_v62 = vld [vmem:[%s12515_s16] sm:$0xff]   ;;  %v9970_v60 = vld [vmem:[%s12515_s16 + $0xd8] sm:$0xff]   ;;  %v9974_v25 = vld [vmem:[%s12515_s16 + $0x90] sm:$0xff]  }
 0xb02   : > { %v4345_v45 = vadd.f32 %v4337_v38, %v2927_v3  ;;  %v4346_v50 = vadd.f32 %v4338_v30, %v2928_v5  ;;  %v4336_v51 = vmax.f32 %v4328_v55, 0.0  ;;  %v4343_v47 = vadd.f32 %v4335_v0, %v2925_v8  ;;  %v9936_v3 = vld [vmem:[#allocation22 + $0x10] sm:$0xff]   ;;  %v9939_v5 = vld [vmem:[#allocation22 + $0x28] sm:$0xff]   ;;  %v9941_v8 = vld [vmem:[#allocation22 + $0x38] sm:$0xff]   ;;  %8782 = vmatprep.subr.bf16.mxu0 %v9957_v40 }
 0xb03   : > { %v4454_v28 = vpack.c.bf16 %v4350_v56, %v4349_v27  ;;  %v4453_v44 = vpack.c.bf16 %v4348_v23, %v4347_v29  ;;  %v9967_v16 = vld [vmem:[%s12515_s16 + $0xe0] sm:$0xff]   ;;  %v9971_v19 = vld [vmem:[%s12515_s16 + $0x98] sm:$0xff]   ;;  %v9976_v42 = vld [vmem:[%s12515_s16 + $0xc8] sm:$0xff]  }
 0xb04   : > { %v4452_v46 = vpack.c.bf16 %v4346_v50, %v4345_v45  ;;  %v4344_v57 = vadd.f32 %v4336_v51, %v2926_v9  ;;  %v9942_v9 = vld [vmem:[#allocation22 + $0x40] sm:$0xff]   ;;  %v9969_v56 = vld [vmem:[%s12515_s16 + $0x130] sm:$0xff]   ;;  %v9978_v45 = vld [vmem:[%s12515_s16 + $0x118] sm:$0xff]  }
 0xb05   : > { %v4536_v36 = vand.u32 %v4454_v28, %v11937_v52  ;;  %8783 = vmatpush3.bf16.msra.mxu0 %v9959_v41  ;;  %v9968_v49 = vld [vmem:[%s12515_s16 + $0xa0] sm:$0xff]   ;;  %v9977_v63 = vld [vmem:[%s12515_s16 + $0x88] sm:$0xff]  }
 0xb06   : > { %v4451_v58 = vpack.c.bf16 %v4344_v57, %v4343_v47  ;;  %8784 = vmatprep.subr.bf16.mxu0 %v9961_v35  ;;  %v9979_v2 = vld [vmem:[%s12515_s16 + $0xc0] sm:$0xff]   ;;  %v9972_v28 = vld [vmem:[%s12515_s16 + $0x128] sm:$0xff]   ;;  %v9981_v57 = vld [vmem:[%s12515_s16 + $0x110] sm:$0xff]  }
 0xb07   : > { %9203 = vmatprep.subr.bf16.mxu1 %v4536_v36  ;;  %v9980_v10 = vld [vmem:[%s12515_s16 + $0x80] sm:$0xff]  }
 0xb08   : > { %9204 = vmatpush3.bf16.msra.mxu1 %v4536_v36  ;;  %v9975_v36 = vld [vmem:[%s12515_s16 + $0x120] sm:$0xff]  }
 0xb09   : > { %9205 = vmatprep.subr.bf16.mxu1 %v4453_v44  ;;  %8785 = vmatpush3.bf16.msra.mxu0 %v9963_v62 }
 0xb0a   : > { %9231 = vmatprep.subr.bf16.mxu0 %v9966_v34 }
 0xb0c   : > { %9206 = vmatpush3.bf16.msra.mxu1 %v4453_v44 }
 0xb0d   : > { %9207 = vmatprep.subr.bf16.mxu1 %v4452_v46 }
 0xb10   : > { %9208 = vmatpush3.bf16.msra.mxu1 %v4452_v46 }
 0xb11   : > { %9209 = vmatprep.subr.bf16.mxu1 %v4451_v58 }
 0xb14   : > { %9210 = vmatpush3.bf16.msra.mxu1 %v4451_v58 }
 0xb15   : > { %8798 = vmatprep.subr.bf16.mxu1 %v9956_v39 }
 0xb17   : > { %9212 = vmatmul.mubr.msk.bf16.vlgmr.msra.gmra.mxu1 %vm3069_vm3, %v9935_v53 }
 0xb18   : > { %9215 = vmatprep.mubr.msk.bf16.mxu1 %vm3069_vm3, %v9936_v3  ;;  %8799 = vmatpush3.bf16.msra.mxu1 %v9958_v32 }
 0xb19   : > { %8800 = vmatprep.subr.bf16.mxu1 %v9960_v4 }
 0xb1c   : > { %8801 = vmatpush3.bf16.msra.mxu1 %v9962_v15 }
 0xb1d   : > { %8802 = vmatprep.subr.bf16.mxu1 %v9964_v26 }
 0xb1f   : > { %9216 = vmatmul.mubr.msk.bf16.gmra.mxu1 %vm3069_vm3, %v9937_v59  ;;  %v9982_v59 = vld [vmem:[%s12515_s16 + $0x108] sm:$0xff]  }
 0xb20   : > { %9219 = vmatprep.mubr.msk.bf16.mxu1 %vm3069_vm3, %v9938_v1  ;;  %8803 = vmatpush3.bf16.msra.mxu1 %v9965_v48 }
 0xb21   : > { %8804 = vmatprep.subr.bf16.mxu1 %v9967_v16 }
 0xb24   : > { %8805 = vmatpush3.bf16.msra.mxu1 %v9968_v49 }
 0xb25   : > { %8806 = vmatprep.subr.bf16.mxu1 %v9970_v60 }
 0xb27   : > { %9220 = vmatmul.mubr.msk.bf16.gmra.mxu1 %vm3069_vm3, %v9939_v5 }
 0xb28   : > { %9223 = vmatprep.mubr.msk.bf16.mxu1 %vm3069_vm3, %v9940_v6  ;;  %8807 = vmatpush3.bf16.msra.mxu1 %v9971_v19 }
 0xb29   : > { %8808 = vmatprep.subr.bf16.mxu1 %v9973_v54 }
 0xb2c   : > { %8809 = vmatpush3.bf16.msra.mxu1 %v9974_v25 }
 0xb2d   : > { %8810 = vmatprep.subr.bf16.mxu1 %v9976_v42 }
 0xb2f   : > { %9224 = vmatmul.mubr.msk.bf16.gmra.mxu1 %vm3069_vm3, %v9941_v8 }
 0xb30   : > { %9227 = vmatprep.mubr.msk.bf16.mxu1 %vm3069_vm3, %v9942_v9  ;;  %8811 = vmatpush3.bf16.msra.mxu1 %v9977_v63  ;;  %v9983_v9 = vld [vmem:[%s12515_s16 + $0x100] sm:$0xff]  }
 0xb31   : > { %8812 = vmatprep.subr.bf16.mxu1 %v9979_v2 }
 0xb34   : > { %8813 = vmatpush3.bf16.msra.mxu1 %v9980_v10 }
 0xb37   : > { %9228 = vmatmul.mubr.msk.bf16.gmra.mxu1 %vm3069_vm3, %v9943_v31 }
 0xbd7   : > { %v9213_v11 = vpop.f32.mrf.mxu1 }
 0xbd9   : > { %v4572_v12 = vpop.f32.mrf.mxu1 }
 0xbdb   : > { %v9214_v13 = vpop.f32.mrf.mxu1 }
 0xbdc   : > { %v4656_v30 = vpack.c.bf16 %v9214_v13, %v9213_v11 }
 0xbdd   : > { %v4575_v17 = vpop.f32.mrf.mxu1 }
 0xbde   : > { %v4651_v27 = vpack.c.bf16 %v4575_v17, %v4572_v12 }
 0xbdf   : > { %v9217_v24 = vpop.f32.mrf.mxu1 }
 0xbe1   : > { %v4588_v43 = vpop.f32.mrf.mxu1 }
 0xbe3   : > { %v9218_v20 = vpop.f32.mrf.mxu1 }
 0xbe4   : > { %v4657_v22 = vpack.c.bf16 %v9218_v20, %v9217_v24 }
 0xbe5   : > { %v4591_v21 = vpop.f32.mrf.mxu1 }
 0xbe6   : > { %v4652_v61 = vpack.c.bf16 %v4591_v21, %v4588_v43 }
 0xbe7   : > { %v9221_v38 = vpop.f32.mrf.mxu1 }
 0xbe8   : > { %4933 = vmatprep.mubr.bf16.mxu0 %v4652_v61 }
 0xbe9   : > { %4934 = vmatmul.mubr.bf16.vlgmr.msra.gmra.mxu0 %v4651_v27  ;;  %v4604_v55 = vpop.f32.mrf.mxu1 }
 0xbea   : > { %9232 = vmatpush3.bf16.msra.mxu0 %v9966_v34  ;;  %4941 = vmatprep.mubr.bf16.mxu0 %v4657_v22 }
 0xbeb   : > { %9233 = vmatprep.subr.bf16.mxu0 %v9969_v56  ;;  %v9222_v29 = vpop.f32.mrf.mxu1 }
 0xbec   : > { %v4658_v8 = vpack.c.bf16 %v9222_v29, %v9221_v38 }
 0xbed   : > { %v4607_v23 = vpop.f32.mrf.mxu1 }
 0xbee   : > { %9234 = vmatpush3.bf16.msra.mxu0 %v9969_v56  ;;  %v4653_v47 = vpack.c.bf16 %v4607_v23, %v4604_v55 }
 0xbef   : > { %9235 = vmatprep.subr.bf16.mxu0 %v9972_v28  ;;  %v9225_v0 = vpop.f32.mrf.mxu1 }
 0xbf1   : > { %v4620_v44 = vpop.f32.mrf.mxu1  ;;  %4942 = vmatmul.mubr.bf16.gmra.mxu0 %v4656_v30 }
 0xbf2   : > { %9236 = vmatpush3.bf16.msra.mxu0 %v9972_v28 }
 0xbf3   : > { %9237 = vmatprep.subr.bf16.mxu0 %v9975_v36  ;;  %v9226_v50 = vpop.f32.mrf.mxu1 }
 0xbf4   : > { %v4659_v53 = vpack.c.bf16 %v9226_v50, %v9225_v0 }
 0xbf5   : > { %v4623_v51 = vpop.f32.mrf.mxu1 }
 0xbf6   : > { %9238 = vmatpush3.bf16.msra.mxu0 %v9975_v36  ;;  %v4654_v46 = vpack.c.bf16 %v4623_v51, %v4620_v44  ;;  %v9984_v51 = vld [vmem:[#allocation26] sm:$0xff]  }
 0xbf7   : > { %9239 = vmatprep.subr.bf16.mxu0 %v9978_v45  ;;  %v9229_v58 = vpop.f32.mrf.mxu1 }
 0xbf8   : > { %4982 = vmatprep.mubr.bf16.mxu1 %v4654_v46  ;;  %v9996_v46 = vld [vmem:[#allocation28 + $0xb8] sm:$0xff]  }
 0xbf9   : > { %4983 = vmatmul.mubr.bf16.vlgmr.msra.gmra.mxu1 %v4653_v47  ;;  %v4636_v3 = vpop.f32.mrf.mxu1  ;;  %v9999_v47 = vld [vmem:[#allocation28 + $0xb0] sm:$0xff]   ;;  %9267 = vmatprep.subr.bf16.mxu1 %v9996_v46 }
 0xbfa   : > { %9240 = vmatpush3.bf16.msra.mxu0 %v9978_v45  ;;  %4990 = vmatprep.mubr.bf16.mxu1 %v4659_v53 }
 0xbfb   : > { %9241 = vmatprep.subr.bf16.mxu0 %v9981_v57  ;;  %v9230_v1 = vpop.f32.mrf.mxu1  ;;  %9268 = vmatpush3.bf16.msra.mxu1 %v9996_v46  ;;  %v9987_v46 = vld [vmem:[#allocation26 + $0x18] sm:$0xff]  }
 0xbfc   : > { %v4660_v31 = vpack.c.bf16 %v9230_v1, %v9229_v58  ;;  %9269 = vmatprep.subr.bf16.mxu1 %v9999_v47 }
 0xbfd   : > { %v4639_v5 = vpop.f32.mrf.mxu1 }
 0xbfe   : > { %9242 = vmatpush3.bf16.msra.mxu0 %v9981_v57  ;;  %v4655_v6 = vpack.c.bf16 %v4639_v5, %v4636_v3 }
 0xbff   : > { %9243 = vmatprep.subr.bf16.mxu0 %v9982_v59  ;;  %9270 = vmatpush3.bf16.msra.mxu1 %v9999_v47  ;;  %v9988_v47 = vld [vmem:[#allocation26 + $0x20] sm:$0xff]  }
 0xc00   : > { %9247 = vmatprep.mubr.bf16.mxu0 %v4655_v6 }
 0xc01   : > { %4991 = vmatmul.mubr.bf16.gmra.mxu1 %v4658_v8 }
 0xc02   : > { %9244 = vmatpush3.bf16.msra.mxu0 %v9982_v59 }
 0xc03   : > { %9245 = vmatprep.subr.bf16.mxu0 %v9983_v9 }
 0xc06   : > { %9246 = vmatpush3.bf16.msra.mxu0 %v9983_v9 }
 0xc09   : > { %9248 = vmatmul.mubr.bf16.vlgmr.msra.gmra.mxu0 %v4660_v31 }
 0xc0a   : > { %9255 = vmatprep.mubr.msk.bf16.mxu0 %vm5206_vm5, %v9984_v51  ;;  %v9994_v51 = vld [vmem:[#allocation28 + $0x68] sm:$0xff]  }
 0xca9   : > { %v8786_v14 = vpop.f32.mrf.mxu0 }
 0xcab   : > { %v8787_v37 = vpop.f32.mrf.mxu0 }
 0xcac   : > { %v8788_v42 = vadd.f32 %v8787_v37, %v8786_v14 }
 0xcad   : > { %v8789_v39 = vpop.f32.mrf.mxu0 }
 0xcaf   : > { %v8790_v32 = vpop.f32.mrf.mxu0 }
 0xcb0   : > { %v8791_v12 = vadd.f32 %v8790_v32, %v8789_v39 }
 0xcb1   : > { %v8792_v33 = vpop.f32.mrf.mxu0 }
 0xcb3   : > { %v8793_v40 = vpop.f32.mrf.mxu0 }
 0xcb4   : > { %v8794_v63 = vadd.f32 %v8793_v40, %v8792_v33 }
 0xcb5   : > { %v8795_v48 = vpop.f32.mrf.mxu0 }
 0xcb7   : > { %v8796_v16 = vpop.f32.mrf.mxu0 }
 0xcb8   : > { %v8797_v54 = vadd.f32 %v8796_v16, %v8795_v48 }
 0xcb9   : > { %v8814_v7 = vpop.f32.mrf.mxu1 }
 0xcbb   : > { %v8815_v4 = vpop.f32.mrf.mxu1 }
 0xcbc   : > { %v8816_v34 = vadd.f32 %v8815_v4, %v8814_v7 }
 0xcbd   : > { %v8817_v15 = vpop.f32.mrf.mxu1 }
 0xcbe   : > { %v4985_v17 = vadd.f32 %v8816_v34, %v8788_v42  ;;  %v5051_v34 = vld [vmem:[#allocation23 + $0x18] sm:$0x7f] }
 0xcbf   : > { %v8818_v41 = vpop.f32.mrf.mxu1 }
 0xcc0   : > { %v8819_v2 = vadd.f32 %v8818_v41, %v8817_v15 }
 0xcc1   : > { %v8820_v26 = vpop.f32.mrf.mxu1 }
 0xcc2   : > { %v4988_v20 = vadd.f32 %v8819_v2, %v8791_v12  ;;  %v5053_v12 = vld [vmem:[#allocation25 + $0x8] sm:$0xff] }
 0xcc3   : > { %v8821_v35 = vpop.f32.mrf.mxu1 }
 0xcc4   : > { %v8822_v60 = vadd.f32 %v8821_v35, %v8820_v26  ;;  %v5050_v35 = vld [vmem:[#allocation23 + $0x10] sm:$0xff] }
 0xcc5   : > { %v8823_v62 = vpop.f32.mrf.mxu1 }
 0xcc6   : > { %v4993_v13 = vadd.f32 %v8822_v60, %v8794_v63  ;;  %v5048_v60 = vld [vmem:[#allocation23] sm:$0xff] }
 0xcc7   : > { %v8824_v49 = vpop.f32.mrf.mxu1 }
 0xcc8   : > { %v8825_v19 = vadd.f32 %v8824_v49, %v8823_v62 }
 0xcc9   : > { %v9249_v25 = vpop.f32.mrf.mxu0 }
 0xcca   : > { %v4996_v11 = vadd.f32 %v8825_v19, %v8797_v54  ;;  %v5042_v27 = vadd.f32 %v9249_v25, %v4993_v13  ;;  %v5049_v19 = vld [vmem:[#allocation23 + $0x8] sm:$0xff]  ;;  %v5054_v54 = vld [vmem:[#allocation25 + $0x10] sm:$0xff] }
 0xccb   : > { %v5033_v10 = vpop.f32.mrf.mxu0 }
 0xccc   : > { %v12184_v43 = vadd.f32 %v5033_v10, %v4985_v17  ;;  %v5072_v23 = vmul.f32 %v5042_v27, %v5042_v27  ;;  %v5055_v10 = vld [vmem:[#allocation25 + $0x18] sm:$0x7f] }
 0xccd   : > { %v9250_v24 = vpop.f32.mrf.mxu0 }
 0xcce   : > { %v12186_v21 = vadd.f32 %v9250_v24, %v4996_v11  ;;  %v5070_v38 = vmul.f32 %v12184_v43, %v12184_v43  ;;  %v5052_v11 = vld [vmem:[#allocation25] sm:$0xff] }
 0xccf   : > { %v5036_v61 = vpop.f32.mrf.mxu0 }
 0xcd0   : > { %v12188_v56 = vadd.f32 %v5036_v61, %v4988_v20  ;;  %v5073_v28 = vmul.f32 %v12186_v21, %v12186_v21  ;;  %v5058_v36 = vsel %vm2848_vm2, %v12186_v21, 0.0 }
 0xcd2   : > { %v5056_v22 = vadd.f32 %v12188_v56, %v12184_v43  ;;  %v5071_v55 = vmul.f32 %v12188_v56, %v12188_v56  ;;  %v5076_v45 = vsel %vm2848_vm2, %v5073_v28, 0.0 }
 0xcd4   : > { %v5057_v29 = vadd.f32 %v5056_v22, %v5042_v27  ;;  %v5074_v30 = vadd.f32 %v5071_v55, %v5070_v38 }
 0xcd6   : > { %v5059_v0 = vadd.f32 %v5058_v36, %v5057_v29  ;;  %v5075_v44 = vadd.f32 %v5074_v30, %v5072_v23  ;;  %v9990_v30 = vld [vmem:[#allocation28 + $0x78] sm:$0xff]  }
 0xcd7   : > { %v9985_v36 = vld [vmem:[#allocation26 + $0x8] sm:$0xff]  }
 0xcd8   : > { %5060 = vadd.xlane.f32.xlu0 %v5059_v0  ;;  %v5077_v50 = vadd.f32 %v5076_v45, %v5075_v44  ;;  %v9986_v0 = vld [vmem:[#allocation26 + $0x10] sm:$0xff]   ;;  %v9991_v44 = vld [vmem:[#allocation28 + $0x38] sm:$0xff]   ;;  %v9992_v45 = vld [vmem:[#allocation28 + $0x70] sm:$0xff]  }
 0xcda   : > { %5078 = vadd.xlane.f32.xlu1 %v5077_v50  ;;  %v9993_v50 = vld [vmem:[#allocation28 + $0x30] sm:$0xff]  }
 0xd61   : > { %v5061_v57 = vpop.xlane.xlu0 %5060 }
 0xd62   : > { %v5062_v58 = vrot.slane %v5061_v57, 4 }
 0xd63   : > { %v5079_v53 = vpop.xlane.xlu1 %5078 }
 0xd64   : > { %v5063_v3 = vadd.f32 %v5062_v58, %v5061_v57  ;;  %v5080_v59 = vrot.slane %v5079_v53, 4  ;;  %v9995_v57 = vld [vmem:[#allocation28 + $0x28] sm:$0xff]   ;;  %v9997_v58 = vld [vmem:[#allocation28 + $0x60] sm:$0xff]  }
 0xd66   : > { %v5064_v1 = vrot.slane %v5063_v3, 2  ;;  %v5081_v5 = vadd.f32 %v5080_v59, %v5079_v53  ;;  %v9998_v53 = vld [vmem:[#allocation28 + $0x20] sm:$0xff]   ;;  %v10000_v59 = vld [vmem:[#allocation28 + $0x58] sm:$0xff]  }
 0xd68   : > { %v5082_v6 = vrot.slane %v5081_v5, 2  ;;  %v5065_v8 = vadd.f32 %v5064_v1, %v5063_v3  ;;  %v9989_v3 = vld [vmem:[#allocation26 + $0x28] sm:$0xff]   ;;  %v10002_v1 = vld [vmem:[#allocation28 + $0xa8] sm:$0xff]  }
 0xd69   : > { %9271 = vmatprep.subr.bf16.mxu1 %v10002_v1 }
 0xd6a   : > { %v5066_v9 = vrot.slane %v5065_v8, 1  ;;  %v5083_v31 = vadd.f32 %v5082_v6, %v5081_v5  ;;  %v10001_v5 = vld [vmem:[#allocation28 + $0x18] sm:$0xff]   ;;  %9272 = vmatpush3.bf16.msra.mxu1 %v10002_v1  ;;  %v10003_v6 = vld [vmem:[#allocation28 + $0x50] sm:$0xff]  }
 0xd6c   : > { %v5067_v14 = vadd.f32 %v5066_v9, %v5065_v8  ;;  %v5084_v37 = vrot.slane %v5083_v31, 1  ;;  %v10005_v8 = vld [vmem:[#allocation28 + $0xa0] sm:$0xff]   ;;  %v10004_v9 = vld [vmem:[#allocation28 + $0x10] sm:$0xff]  }
 0xd6d   : > { %9273 = vmatprep.subr.bf16.mxu1 %v10005_v8 }
 0xd6e   : > { %9405 = vpush %v5067_v14  ;;  %v5085_v39 = vadd.f32 %v5084_v37, %v5083_v31  ;;  %9274 = vmatpush3.bf16.msra.mxu1 %v10005_v8  ;;  %v10006_v31 = vld [vmem:[#allocation28 + $0x48] sm:$0xff]   ;;  %v10008_v14 = vld [vmem:[#allocation28 + $0x98] sm:$0xff]  }
 0xd6f   : > { %v10007_v37 = vld [vmem:[#allocation28 + $0x8] sm:$0xff]   ;;  %9275 = vmatprep.subr.bf16.mxu1 %v10008_v14 }
 0xd70   : > { %9407 = vpush %v5085_v39  ;;  %v10009_v39 = vld [vmem:[#allocation28 + $0x40] sm:$0xff]  }
 0xd72   : > { %9276 = vmatpush3.bf16.msra.mxu1 %v10008_v14 }
 0xd9f   : > { %s9406_s18 = spop %9405 }
 0xda0   : > { %v5069_v32 = vstv %s9406_s18 }
 0xda1   : > { %v5088_v7 = vmul.f32 0.0008064516, %v5069_v32  ;;  %s9408_s0 = spop %9407  ;;  %v10011_v32 = vld [vmem:[#allocation28 + $0x90] sm:$0xff]  }
 0xda2   : > { %v5087_v33 = vstv %s9408_s0  ;;  %9277 = vmatprep.subr.bf16.mxu1 %v10011_v32 }
 0xda3   : > { %v5089_v4 = vmul.f32 0.0008064516, %v5087_v33  ;;  %v5090_v15 = vmul.f32 %v5088_v7, %v5088_v7  ;;  %v5094_v26 = vsub.f32 %v5042_v27, %v5088_v7  ;;  %v5095_v48 = vsub.f32 %v12186_v21, %v5088_v7  ;;  %9278 = vmatpush3.bf16.msra.mxu1 %v10011_v32  ;;  %v10012_v33 = vld [vmem:[#allocation28 + $0x88] sm:$0xff]  }
 0xda4   : > { %v5092_v62 = vsub.f32 %v12184_v43, %v5088_v7  ;;  %v5093_v16 = vsub.f32 %v12188_v56, %v5088_v7  ;;  %v10010_v7 = vld [vmem:[#allocation28] sm:$0xff]   ;;  %9279 = vmatprep.subr.bf16.mxu1 %v10012_v33 }
 0xda5   : > { %v5091_v40 = vsub.f32 %v5089_v4, %v5090_v15  ;;  %v10013_v4 = vld [vmem:[#allocation28 + $0x80] sm:$0xff]  }
 0xda7   : > { %v5096_v41 = vadd.f32 1e-05, %v5091_v40  ;;  %9280 = vmatpush3.bf16.msra.mxu1 %v10012_v33 }
 0xda8   : > { %9281 = vmatprep.subr.bf16.mxu1 %v10013_v4 }
 0xda9   : > { %10153 = vrsqrt.f32 %v5096_v41 }
 0xdab   : > { %9282 = vmatpush3.bf16.msra.mxu1 %v10013_v4 }
 0xdb6   : > { %v10154_v49 = vpop.eup %10153 }
 0xdb7   : > { %v5100_v25 = vmul.f32 %v10154_v49, %v5094_v26  ;;  %v5101_v42 = vmul.f32 %v10154_v49, %v5095_v48  ;;  %v5098_v63 = vmul.f32 %v10154_v49, %v5092_v62  ;;  %v5099_v2 = vmul.f32 %v10154_v49, %v5093_v16 }
 0xdb9   : > { %v5104_v13 = vmul.f32 %v5100_v25, %v5050_v35  ;;  %v5105_v17 = vmul.f32 %v5101_v42, %v5051_v34  ;;  %v5102_v24 = vmul.f32 %v5098_v63, %v5048_v60  ;;  %v5103_v20 = vmul.f32 %v5099_v2, %v5049_v19 }
 0xdbb   : > { %v12205_v21 = vadd.f32 %v5104_v13, %v5054_v54  ;;  %v12207_v43 = vadd.f32 %v5105_v17, %v5055_v10  ;;  %v12209_v61 = vadd.f32 %v5102_v24, %v5052_v11  ;;  %v12211_v27 = vadd.f32 %v5103_v20, %v5053_v12 }
 0xdbd   : > { %v5112_v56 = vmax.f32 %v12205_v21, 0.0  ;;  %v5113_v38 = vmax.f32 %v12207_v43, 0.0  ;;  %v5110_v55 = vmax.f32 %v12209_v61, 0.0  ;;  %v5111_v28 = vmax.f32 %v12211_v27, 0.0  ;;  %v10047_v21 = vld [vmem:[%s12516_s2 + $0x78] sm:$0xff]   ;;  %v10050_v61 = vld [vmem:[%s12516_s2 + $0x30] sm:$0xff]  }
 0xdbe   : > { %v10051_v27 = vld [vmem:[%s12516_s2 + $0x68] sm:$0xff]  }
 0xdbf   : > { %v5175_v22 = vpack.c.bf16 %v5113_v38, %v5112_v56  ;;  %v5174_v23 = vpack.c.bf16 %v5111_v28, %v5110_v55 }
 0xdc1   : > { %v5226_v29 = vand.u32 %v5175_v22, %v11937_v52 }
 0xdc3   : > { %9251 = vmatprep.subr.bf16.mxu0 %v5226_v29 }
 0xdc4   : > { %9252 = vmatpush3.bf16.msra.mxu0 %v5226_v29  ;;  %v8353_v29 = vld [vmem:[#allocation29] ss:$0 sm:$0xff] }
 0xdc5   : > { %9253 = vmatprep.subr.bf16.mxu0 %v5174_v23 }
 0xdc8   : > { %9254 = vmatpush3.bf16.msra.mxu0 %v5174_v23 }
 0xdc9   : > { %8844 = vmatprep.subr.bf16.mxu0 %v9990_v30 }
 0xdcb   : > { %9256 = vmatmul.mubr.msk.bf16.vlgmr.msra.gmra.mxu0 %vm5206_vm5, %v9985_v36 }
 0xdcc   : > { %9259 = vmatprep.mubr.msk.bf16.mxu0 %vm5206_vm5, %v9986_v0  ;;  %8845 = vmatpush3.bf16.msra.mxu0 %v9991_v44 }
 0xdcd   : > { %8846 = vmatprep.subr.bf16.mxu0 %v9992_v45 }
 0xdd0   : > { %8847 = vmatpush3.bf16.msra.mxu0 %v9993_v50 }
 0xdd1   : > { %8848 = vmatprep.subr.bf16.mxu0 %v9994_v51 }
 0xdd3   : > { %9260 = vmatmul.mubr.msk.bf16.gmra.mxu0 %vm5206_vm5, %v9987_v46 }
 0xdd4   : > { %9263 = vmatprep.mubr.msk.bf16.mxu0 %vm5206_vm5, %v9988_v47  ;;  %8849 = vmatpush3.bf16.msra.mxu0 %v9995_v57 }
 0xdd5   : > { %8850 = vmatprep.subr.bf16.mxu0 %v9997_v58 }
 0xdd8   : > { %8851 = vmatpush3.bf16.msra.mxu0 %v9998_v53 }
 0xdd9   : > { %8852 = vmatprep.subr.bf16.mxu0 %v10000_v59 }
 0xddb   : > { %9264 = vmatmul.mubr.msk.bf16.gmra.mxu0 %vm5206_vm5, %v9989_v3 }
 0xddc   : > { %8853 = vmatpush3.bf16.msra.mxu0 %v10001_v5 }
 0xddd   : > { %8854 = vmatprep.subr.bf16.mxu0 %v10003_v6 }
 0xde0   : > { %8855 = vmatpush3.bf16.msra.mxu0 %v10004_v9 }
 0xde1   : > { %8856 = vmatprep.subr.bf16.mxu0 %v10006_v31 }
 0xde4   : > { %8857 = vmatpush3.bf16.msra.mxu0 %v10007_v37 }
 0xde5   : > { %8858 = vmatprep.subr.bf16.mxu0 %v10009_v39 }
 0xde8   : > { %8859 = vmatpush3.bf16.msra.mxu0 %v10010_v7 }
 0xe8b   : > { %v9257_v15 = vpop.f32.mrf.mxu0 }
 0xe8d   : > { %v5262_v40 = vpop.f32.mrf.mxu0 }
 0xe8f   : > { %v9258_v41 = vpop.f32.mrf.mxu0 }
 0xe90   : > { %v5312_v2 = vpack.c.bf16 %v9258_v41, %v9257_v15  ;;  %v10020_v41 = vld [vmem:[#allocation35 + $0x78] sm:$0xff]  }
 0xe91   : > { %v5265_v26 = vpop.f32.mrf.mxu0  ;;  %8890 = vmatprep.subr.bf16.mxu0 %v10020_v41 }
 0xe92   : > { %v5309_v34 = vpack.c.bf16 %v5265_v26, %v5262_v40  ;;  %v10014_v40 = vld [vmem:[#allocation34] sm:$0xff]   ;;  %v10021_v26 = vld [vmem:[#allocation35 + $0x38] sm:$0xff]  }
 0xe93   : > { %v9261_v48 = vpop.f32.mrf.mxu0 }
 0xe95   : > { %v5278_v35 = vpop.f32.mrf.mxu0 }
 0xe97   : > { %v9262_v62 = vpop.f32.mrf.mxu0 }
 0xe98   : > { %v5313_v19 = vpack.c.bf16 %v9262_v62, %v9261_v48  ;;  %v10022_v48 = vld [vmem:[#allocation35 + $0x70] sm:$0xff]   ;;  %v10024_v62 = vld [vmem:[#allocation35 + $0x68] sm:$0xff]  }
 0xe99   : > { %v5281_v16 = vpop.f32.mrf.mxu0 }
 0xe9a   : > { %v5310_v49 = vpack.c.bf16 %v5281_v16, %v5278_v35  ;;  %v10023_v35 = vld [vmem:[#allocation35 + $0x30] sm:$0xff]  }
 0xe9b   : > { %v9265_v60 = vpop.f32.mrf.mxu0 }
 0xe9c   : > { %5498 = vmatprep.mubr.bf16.mxu0 %v5310_v49 }
 0xe9d   : > { %5499 = vmatmul.mubr.bf16.vlgmr.msra.gmra.mxu0 %v5309_v34  ;;  %v5294_v54 = vpop.f32.mrf.mxu0  ;;  %v10025_v34 = vld [vmem:[#allocation35 + $0x28] sm:$0xff]  }
 0xe9e   : > { %5506 = vmatprep.mubr.bf16.mxu0 %v5313_v19  ;;  %8891 = vmatpush3.bf16.msra.mxu0 %v10021_v26  ;;  %v10027_v19 = vld [vmem:[#allocation35 + $0x60] sm:$0xff]  }
 0xe9f   : > { %v9266_v25 = vpop.f32.mrf.mxu0  ;;  %8892 = vmatprep.subr.bf16.mxu0 %v10022_v48 }
 0xea0   : > { %v5314_v10 = vpack.c.bf16 %v9266_v25, %v9265_v60 }
 0xea1   : > { %v5297_v42 = vpop.f32.mrf.mxu0 }
 0xea2   : > { %v5311_v63 = vpack.c.bf16 %v5297_v42, %v5294_v54  ;;  %8893 = vmatpush3.bf16.msra.mxu0 %v10023_v35 }
 0xea3   : > { %8894 = vmatprep.subr.bf16.mxu0 %v10024_v62 }
 0xea4   : > { %9283 = vmatprep.mubr.bf16.mxu1 %v5311_v63 }
 0xea5   : > { %5507 = vmatmul.mubr.bf16.gmra.mxu0 %v5312_v2  ;;  %9284 = vmatmul.mubr.bf16.vlgmr.msra.gmra.mxu1 %v5314_v10  ;;  %v10028_v2 = vld [vmem:[#allocation35 + $0x20] sm:$0xff]  }
 0xea6   : > { %9291 = vmatprep.mubr.msk.bf16.mxu1 %vm5206_vm5, %v10014_v40  ;;  %8895 = vmatpush3.bf16.msra.mxu0 %v10025_v34  ;;  %v10026_v34 = vld [vmem:[#allocation35 + $0xb8] sm:$0xff]  }
 0xea7   : > { %8896 = vmatprep.subr.bf16.mxu0 %v10027_v19  ;;  %v10016_v19 = vld [vmem:[#allocation34 + $0x10] sm:$0xff]  }
 0xeaa   : > { %8897 = vmatpush3.bf16.msra.mxu0 %v10028_v2  ;;  %v10030_v2 = vld [vmem:[#allocation35 + $0x58] sm:$0xff]  }
 0xeab   : > { %8898 = vmatprep.subr.bf16.mxu0 %v10030_v2 }
 0xf5d   : > { %v8860_v11 = vpop.f32.mrf.mxu0 }
 0xf5f   : > { %v8861_v12 = vpop.f32.mrf.mxu0 }
 0xf60   : > { %v8862_v24 = vadd.f32 %v8861_v12, %v8860_v11 }
 0xf61   : > { %v8863_v13 = vpop.f32.mrf.mxu0 }
 0xf62   : > { %v5501_v44 = vadd.f32 %v8862_v24, %v8353_v29 }
 0xf63   : > { %v8864_v17 = vpop.f32.mrf.mxu0 }
 0xf64   : > { %v8865_v23 = vadd.f32 %v8864_v17, %v8863_v13 }
 0xf65   : > { %v8866_v20 = vpop.f32.mrf.mxu0  ;;  %v9285_v22 = vpop.f32.mrf.mxu1 }
 0xf66   : > { %v5504_v47 = vadd.f32 %v8865_v23, %v8353_v29 }
 0xf67   : > { %v8867_v30 = vpop.f32.mrf.mxu0  ;;  %v5549_v36 = vpop.f32.mrf.mxu1 }
 0xf68   : > { %v8868_v0 = vadd.f32 %v8867_v30, %v8866_v20  ;;  %v12231_v46 = vadd.f32 %v5549_v36, %v5501_v44 }
 0xf69   : > { %v8869_v45 = vpop.f32.mrf.mxu0  ;;  %v9286_v50 = vpop.f32.mrf.mxu1 }
 0xf6a   : > { %v5509_v51 = vadd.f32 %v8868_v0, %v8353_v29  ;;  %v5586_v1 = vmul.f32 %v12231_v46, %v12231_v46 }
 0xf6b   : > { %v8870_v57 = vpop.f32.mrf.mxu0  ;;  %v5552_v58 = vpop.f32.mrf.mxu1 }
 0xf6c   : > { %v12233_v53 = vadd.f32 %v9285_v22, %v5509_v51  ;;  %v8871_v3 = vadd.f32 %v8870_v57, %v8869_v45  ;;  %v12235_v59 = vadd.f32 %v5552_v58, %v5504_v47  ;;  %v5566_v51 = vld [vmem:[#allocation31 + $0x10] sm:$0xff] }
 0xf6e   : > { %v5512_v5 = vadd.f32 %v8871_v3, %v8353_v29  ;;  %v5572_v6 = vadd.f32 %v12235_v59, %v12231_v46  ;;  %v5587_v8 = vmul.f32 %v12235_v59, %v12235_v59  ;;  %v5588_v14 = vmul.f32 %v12233_v53, %v12233_v53  ;;  %v5567_v3 = vld [vmem:[#allocation31 + $0x18] sm:$0x7f] }
 0xf70   : > { %v12243_v9 = vadd.f32 %v9286_v50, %v5512_v5  ;;  %v5573_v31 = vadd.f32 %v5572_v6, %v12233_v53  ;;  %v5590_v37 = vadd.f32 %v5587_v8, %v5586_v1  ;;  %v5564_v1 = vld [vmem:[#allocation31] sm:$0xff]  ;;  %v5565_v5 = vld [vmem:[#allocation31 + $0x8] sm:$0xff]  ;;  %v5570_v6 = vld [vmem:[#allocation32 + $0x10] sm:$0xff] }
 0xf72   : > { %v5574_v39 = vsel %vm2848_vm2, %v12243_v9, 0.0  ;;  %v5589_v32 = vmul.f32 %v12243_v9, %v12243_v9  ;;  %v5591_v7 = vadd.f32 %v5590_v37, %v5588_v14 }
 0xf73   : > { %v5575_v33 = vadd.f32 %v5574_v39, %v5573_v31  ;;  %v5571_v39 = vld [vmem:[#allocation32 + $0x18] sm:$0x7f] }
 0xf74   : > { %v5592_v4 = vsel %vm2848_vm2, %v5589_v32, 0.0  ;;  %v5568_v32 = vld [vmem:[#allocation32] sm:$0xff] }
 0xf75   : > { %5576 = vadd.xlane.f32.xlu0 %v5575_v33  ;;  %v5593_v15 = vadd.f32 %v5592_v4, %v5591_v7  ;;  %v5569_v7 = vld [vmem:[#allocation32 + $0x8] sm:$0xff] }
 0xf77   : > { %5594 = vadd.xlane.f32.xlu1 %v5593_v15 }
 0xffe   : > { %v5577_v16 = vpop.xlane.xlu0 %5576 }
 0xfff   : > { %v5578_v49 = vrot.slane %v5577_v16, 4 }
0x1000   : > { %v5595_v60 = vpop.xlane.xlu1 %5594 }
0x1001   : > { %v5579_v54 = vadd.f32 %v5578_v49, %v5577_v16  ;;  %v5596_v25 = vrot.slane %v5595_v60, 4 }
0x1003   : > { %v5580_v42 = vrot.slane %v5579_v54, 2  ;;  %v5597_v63 = vadd.f32 %v5596_v25, %v5595_v60  ;;  %v10015_v60 = vld [vmem:[#allocation34 + $0x8] sm:$0xff]   ;;  %v10017_v25 = vld [vmem:[#allocation34 + $0x18] sm:$0xff]  }
0x1005   : > { %v5598_v10 = vrot.slane %v5597_v63, 2  ;;  %v5581_v11 = vadd.f32 %v5580_v42, %v5579_v54  ;;  %v10029_v54 = vld [vmem:[#allocation35 + $0xb0] sm:$0xff]  }
0x1006   : > { %v10018_v42 = vld [vmem:[#allocation34 + $0x20] sm:$0xff]  }
0x1007   : > { %v5582_v12 = vrot.slane %v5581_v11, 1  ;;  %v5599_v13 = vadd.f32 %v5598_v10, %v5597_v63  ;;  %v10019_v63 = vld [vmem:[#allocation34 + $0x28] sm:$0xff]   ;;  %v10032_v10 = vld [vmem:[#allocation35 + $0xa8] sm:$0xff]  }
0x1009   : > { %v5583_v17 = vadd.f32 %v5582_v12, %v5581_v11  ;;  %v5600_v24 = vrot.slane %v5599_v13, 1  ;;  %v10031_v11 = vld [vmem:[#allocation35 + $0x18] sm:$0xff]   ;;  %v10033_v12 = vld [vmem:[#allocation35 + $0x50] sm:$0xff]  }
0x100a   : > { %8899 = vmatpush3.bf16.msra.mxu0 %v10031_v11 }
0x100b   : > { %9409 = vpush %v5583_v17  ;;  %v5601_v20 = vadd.f32 %v5600_v24, %v5599_v13  ;;  %v10035_v13 = vld [vmem:[#allocation35 + $0xa0] sm:$0xff]   ;;  %v10034_v17 = vld [vmem:[#allocation35 + $0x10] sm:$0xff]   ;;  %8900 = vmatprep.subr.bf16.mxu0 %v10033_v12  ;;  %v10036_v24 = vld [vmem:[#allocation35 + $0x48] sm:$0xff]  }
0x100d   : > { %9411 = vpush %v5601_v20  ;;  %v10038_v20 = vld [vmem:[#allocation35 + $0x98] sm:$0xff]  }
0x100e   : > { %8901 = vmatpush3.bf16.msra.mxu0 %v10034_v17 }
0x100f   : > { %8902 = vmatprep.subr.bf16.mxu0 %v10036_v24 }
0x103c   : > { %s9410_s23 = spop %9409 }
0x103d   : > { %v5585_v22 = vstv %s9410_s23  ;;  %s1777_s23 = sand.u32 1, %s11127_s22  }
0x103e   : > { %v5604_v29 = vmul.f32 0.0008064516, %v5585_v22  ;;  %s9412_s1 = spop %9411  ;;  %v10037_v22 = vld [vmem:[#allocation35 + $0x8] sm:$0xff]  }
0x103f   : > { %v5603_v23 = vstv %s9412_s1  ;;  %8903 = vmatpush3.bf16.msra.mxu0 %v10037_v22  ;;  %s8525_s1 = sshll.u32 %s11470_s28, 4 }
0x1040   : > { %v5605_v30 = vmul.f32 0.0008064516, %v5603_v23  ;;  %v5606_v36 = vmul.f32 %v5604_v29, %v5604_v29  ;;  %v5610_v45 = vsub.f32 %v12233_v53, %v5604_v29  ;;  %v5611_v50 = vsub.f32 %v12243_v9, %v5604_v29  ;;  %v10041_v23 = vld [vmem:[#allocation35 + $0x90] sm:$0xff]  }
0x1041   : > { %v5608_v47 = vsub.f32 %v12231_v46, %v5604_v29  ;;  %v5609_v57 = vsub.f32 %v12235_v59, %v5604_v29  ;;  %v10039_v29 = vld [vmem:[#allocation35 + $0x40] sm:$0xff]  }
0x1042   : > { %v5607_v0 = vsub.f32 %v5605_v30, %v5606_v36  ;;  %v10040_v30 = vld [vmem:[#allocation35] sm:$0xff]   ;;  %8904 = vmatprep.subr.bf16.mxu0 %v10039_v29  ;;  %v10042_v36 = vld [vmem:[#allocation35 + $0x88] sm:$0xff]  }
0x1043   : > { %8905 = vmatpush3.bf16.msra.mxu0 %v10040_v30 }
0x1044   : > { %v5612_v44 = vadd.f32 1e-05, %v5607_v0  ;;  %v10043_v0 = vld [vmem:[#allocation35 + $0x80] sm:$0xff]  }
0x1046   : > { %10155 = vrsqrt.f32 %v5612_v44 }
0x1053   : > { %v10156_v58 = vpop.eup %10155 }
0x1054   : > { %v5616_v8 = vmul.f32 %v10156_v58, %v5610_v45  ;;  %v5617_v31 = vmul.f32 %v10156_v58, %v5611_v50  ;;  %v5614_v14 = vmul.f32 %v10156_v58, %v5608_v47  ;;  %v5615_v37 = vmul.f32 %v10156_v58, %v5609_v57 }
0x1056   : > { %v5620_v53 = vmul.f32 %v5616_v8, %v5566_v51  ;;  %v5621_v33 = vmul.f32 %v5617_v31, %v5567_v3  ;;  %v5618_v9 = vmul.f32 %v5614_v14, %v5564_v1  ;;  %v5619_v4 = vmul.f32 %v5615_v37, %v5565_v5 }
0x1058   : > { %v5624_v15 = vadd.f32 %v5620_v53, %v5570_v6  ;;  %v5625_v46 = vadd.f32 %v5621_v33, %v5571_v39  ;;  %v5622_v40 = vadd.f32 %v5618_v9, %v5568_v32  ;;  %v5623_v59 = vadd.f32 %v5619_v4, %v5569_v7 }
0x105a   : > { %v5628_v41 = vmax.f32 %v5624_v15, 0.0  ;;  %v5629_v26 = vmax.f32 %v5625_v46, 0.0  ;;  %v5626_v35 = vmax.f32 %v5622_v40, 0.0  ;;  %v5627_v62 = vmax.f32 %v5623_v59, 0.0  ;;  %v8390_v59 = vld [vmem:[#allocation37] ss:$0 sm:$0xff] }
0x105c   : > { %v5691_v48 = vpack.c.bf16 %v5629_v26, %v5628_v41  ;;  %v5690_v49 = vpack.c.bf16 %v5627_v62, %v5626_v35 }
0x105e   : > { %v5741_v16 = vand.u32 %v5691_v48, %v11937_v52 }
0x1060   : > { %9287 = vmatprep.subr.bf16.mxu1 %v5741_v16 }
0x1061   : > { %9288 = vmatpush3.bf16.msra.mxu1 %v5741_v16 }
0x1062   : > { %9289 = vmatprep.subr.bf16.mxu1 %v5690_v49 }
0x1065   : > { %9290 = vmatpush3.bf16.msra.mxu1 %v5690_v49 }
0x1066   : > { %9303 = vmatprep.subr.bf16.mxu1 %v10026_v34 }
0x1068   : > { %9292 = vmatmul.mubr.msk.bf16.vlgmr.msra.gmra.mxu1 %vm5206_vm5, %v10015_v60 }
0x1069   : > { %9295 = vmatprep.mubr.msk.bf16.mxu1 %vm5206_vm5, %v10016_v19  ;;  %9304 = vmatpush3.bf16.msra.mxu1 %v10026_v34 }
0x106a   : > { %9305 = vmatprep.subr.bf16.mxu1 %v10029_v54 }
0x106d   : > { %9306 = vmatpush3.bf16.msra.mxu1 %v10029_v54 }
0x106e   : > { %9307 = vmatprep.subr.bf16.mxu1 %v10032_v10 }
0x1070   : > { %9296 = vmatmul.mubr.msk.bf16.gmra.mxu1 %vm5206_vm5, %v10017_v25 }
0x1071   : > { %9299 = vmatprep.mubr.msk.bf16.mxu1 %vm5206_vm5, %v10018_v42  ;;  %9308 = vmatpush3.bf16.msra.mxu1 %v10032_v10 }
0x1072   : > { %9309 = vmatprep.subr.bf16.mxu1 %v10035_v13 }
0x1075   : > { %9310 = vmatpush3.bf16.msra.mxu1 %v10035_v13 }
0x1076   : > { %9311 = vmatprep.subr.bf16.mxu1 %v10038_v20 }
0x1078   : > { %9300 = vmatmul.mubr.msk.bf16.gmra.mxu1 %vm5206_vm5, %v10019_v63 }
0x1079   : > { %9312 = vmatpush3.bf16.msra.mxu1 %v10038_v20 }
0x107a   : > { %9313 = vmatprep.subr.bf16.mxu1 %v10041_v23 }
0x107d   : > { %9314 = vmatpush3.bf16.msra.mxu1 %v10041_v23 }
0x107e   : > { %9315 = vmatprep.subr.bf16.mxu1 %v10042_v36 }
0x1081   : > { %9316 = vmatpush3.bf16.msra.mxu1 %v10042_v36 }
0x1082   : > { %9317 = vmatprep.subr.bf16.mxu1 %v10043_v0 }
0x1085   : > { %9318 = vmatpush3.bf16.msra.mxu1 %v10043_v0 }
0x1128   : > { %v9293_v44 = vpop.f32.mrf.mxu1 }
0x112a   : > { %v5777_v45 = vpop.f32.mrf.mxu1 }
0x112c   : > { %v9294_v50 = vpop.f32.mrf.mxu1 }
0x112d   : > { %v5827_v32 = vpack.c.bf16 %v9294_v50, %v9293_v44 }
0x112e   : > { %v5780_v51 = vpop.f32.mrf.mxu1 }
0x112f   : > { %v5824_v5 = vpack.c.bf16 %v5780_v51, %v5777_v45  ;;  %v11221_v45 = vmov 0.0  }
0x1130   : > { %v9297_v47 = vpop.f32.mrf.mxu1  ;;  %9323 = vmatprep.subr.bf16.mxu1 %v11221_v45 }
0x1132   : > { %v5793_v57 = vpop.f32.mrf.mxu1 }
0x1134   : > { %v9298_v58 = vpop.f32.mrf.mxu1 }
0x1135   : > { %v5828_v8 = vpack.c.bf16 %v9298_v58, %v9297_v47 }
0x1136   : > { %v5796_v3 = vpop.f32.mrf.mxu1 }
0x1137   : > { %v5825_v1 = vpack.c.bf16 %v5796_v3, %v5793_v57 }
0x1138   : > { %v9301_v6 = vpop.f32.mrf.mxu1 }
0x1139   : > { %6013 = vmatprep.mubr.bf16.mxu0 %v5825_v1 }
0x113a   : > { %6014 = vmatmul.mubr.bf16.vlgmr.msra.gmra.mxu0 %v5824_v5  ;;  %v5809_v31 = vpop.f32.mrf.mxu1 }
0x113b   : > { %6021 = vmatprep.mubr.bf16.mxu0 %v5828_v8 }
0x113c   : > { %v9302_v14 = vpop.f32.mrf.mxu1 }
0x113d   : > { %v5829_v7 = vpack.c.bf16 %v9302_v14, %v9301_v6 }
0x113e   : > { %v5812_v37 = vpop.f32.mrf.mxu1 }
0x113f   : > { %v5826_v39 = vpack.c.bf16 %v5812_v37, %v5809_v31 }
0x1141   : > { %9319 = vmatprep.mubr.bf16.mxu1 %v5826_v39 }
0x1142   : > { %6022 = vmatmul.mubr.bf16.gmra.mxu0 %v5827_v32  ;;  %9320 = vmatmul.mubr.bf16.vlgmr.msra.gmra.mxu1 %v5829_v7 }
0x1143   : > { %9327 = vmatprep.mubr.msk.bf16.mxu1 %vm11222_vm6, %v11221_v45 }
0x11fa   : > { %v8906_v53 = vpop.f32.mrf.mxu0 }
0x11fc   : > { %v8907_v33 = vpop.f32.mrf.mxu0 }
0x11fd   : > { %v8908_v15 = vadd.f32 %v8907_v33, %v8906_v53 }
0x11fe   : > { %v8909_v9 = vpop.f32.mrf.mxu0 }
0x11ff   : > { %v6016_v62 = vadd.f32 %v8908_v15, %v8390_v59 }
0x1200   : > { %v8910_v4 = vpop.f32.mrf.mxu0 }
0x1201   : > { %v8911_v41 = vadd.f32 %v8910_v4, %v8909_v9 }
0x1202   : > { %v8912_v46 = vpop.f32.mrf.mxu0  ;;  %v9321_v40 = vpop.f32.mrf.mxu1 }
0x1203   : > { %v6019_v19 = vadd.f32 %v8911_v41, %v8390_v59 }
0x1204   : > { %v8913_v26 = vpop.f32.mrf.mxu0  ;;  %v6064_v48 = vpop.f32.mrf.mxu1 }
0x1205   : > { %v8914_v35 = vadd.f32 %v8913_v26, %v8912_v46  ;;  %v12264_v60 = vadd.f32 %v6064_v48, %v6016_v62  ;;  %v6081_v26 = vld [vmem:[#allocation38 + $0x10] sm:$0xff]  ;;  %v6079_v62 = vld [vmem:[#allocation38] sm:$0xff] }
0x1206   : > { %v8915_v16 = vpop.f32.mrf.mxu0  ;;  %v9322_v49 = vpop.f32.mrf.mxu1 }
0x1207   : > { %v6024_v34 = vadd.f32 %v8914_v35, %v8390_v59  ;;  %v6101_v10 = vmul.f32 %v12264_v60, %v12264_v60  ;;  %v6082_v35 = vld [vmem:[#allocation38 + $0x18] sm:$0x7f] }
0x1208   : > { %v8916_v54 = vpop.f32.mrf.mxu0  ;;  %v6067_v25 = vpop.f32.mrf.mxu1 }
0x1209   : > { %v6073_v42 = vadd.f32 %v9321_v40, %v6024_v34  ;;  %v8917_v63 = vadd.f32 %v8916_v54, %v8915_v16  ;;  %v6068_v2 = vadd.f32 %v6067_v25, %v6019_v19  ;;  %v6080_v16 = vld [vmem:[#allocation38 + $0x8] sm:$0xff] }
0x120b   : > { %v6027_v11 = vadd.f32 %v8917_v63, %v8390_v59  ;;  %v6087_v12 = vadd.f32 %v6068_v2, %v12264_v60  ;;  %v6102_v13 = vmul.f32 %v6068_v2, %v6068_v2  ;;  %v6103_v20 = vmul.f32 %v6073_v42, %v6073_v42  ;;  %v6086_v63 = vld [vmem:[#allocation40 + $0x18] sm:$0x7f] }
0x120d   : > { %v6076_v17 = vadd.f32 %v9322_v49, %v6027_v11  ;;  %v6088_v24 = vadd.f32 %v6087_v12, %v6073_v42  ;;  %v6105_v22 = vadd.f32 %v6102_v13, %v6101_v10  ;;  %v6085_v49 = vld [vmem:[#allocation40 + $0x10] sm:$0xff]  ;;  %v6083_v10 = vld [vmem:[#allocation40] sm:$0xff]  ;;  %v6084_v11 = vld [vmem:[#allocation40 + $0x8] sm:$0xff] }
0x120f   : > { %v6089_v29 = vsel %vm2848_vm2, %v6076_v17, 0.0  ;;  %v6104_v23 = vmul.f32 %v6076_v17, %v6076_v17  ;;  %v6106_v30 = vadd.f32 %v6105_v22, %v6103_v20 }
0x1210   : > { %v6090_v36 = vadd.f32 %v6089_v29, %v6088_v24 }
0x1211   : > { %v6107_v0 = vsel %vm2848_vm2, %v6104_v23, 0.0 }
0x1212   : > { %6091 = vadd.xlane.f32.xlu0 %v6090_v36  ;;  %v6108_v44 = vadd.f32 %v6107_v0, %v6106_v30 }
0x1214   : > { %6109 = vadd.xlane.f32.xlu1 %v6108_v44 }
0x129b   : > { %v6092_v50 = vpop.xlane.xlu0 %6091 }
0x129c   : > { %v6093_v51 = vrot.slane %v6092_v50, 4 }
0x129d   : > { %v6110_v47 = vpop.xlane.xlu1 %6109 }
0x129e   : > { %v6094_v57 = vadd.f32 %v6093_v51, %v6092_v50  ;;  %v6111_v58 = vrot.slane %v6110_v47, 4 }
0x12a0   : > { %v6095_v3 = vrot.slane %v6094_v57, 2  ;;  %v6112_v1 = vadd.f32 %v6111_v58, %v6110_v47  ;;  %v10054_v58 = vld [vmem:[%s12516_s2 + $0x20] sm:$0xff]  }
0x12a2   : > { %v6113_v5 = vrot.slane %v6112_v1, 2  ;;  %v6096_v6 = vadd.f32 %v6095_v3, %v6094_v57  ;;  %v10053_v57 = vld [vmem:[%s12516_s2 + $0x60] sm:$0xff]   ;;  %v10055_v3 = vld [vmem:[%s12516_s2 + $0x58] sm:$0xff]  }
0x12a4   : > { %v6097_v8 = vrot.slane %v6096_v6, 1  ;;  %v6114_v31 = vadd.f32 %v6113_v5, %v6112_v1  ;;  %v10046_v1 = vld [vmem:[#allocation41 + $0x10] ss:$0 sps:$4 sm:$0xff]   ;;  %v10056_v5 = vld [vmem:[%s12516_s2 + $0x18] sm:$0xff]  }
0x12a6   : > { %v6098_v14 = vadd.f32 %v6097_v8, %v6096_v6  ;;  %v6115_v37 = vrot.slane %v6114_v31, 1  ;;  %v10057_v6 = vld [vmem:[%s12516_s2 + $0x50] sm:$0xff]  }
0x12a7   : > { %v10058_v8 = vld [vmem:[%s12516_s2 + $0x10] sm:$0xff]  }
0x12a8   : > { %9413 = vpush %v6098_v14  ;;  %v6116_v39 = vadd.f32 %v6115_v37, %v6114_v31  ;;  %v10059_v31 = vld [vmem:[%s12516_s2 + $0x48] sm:$0xff]   ;;  %v10061_v14 = vld [vmem:[%s12516_s2 + $0xf8] sm:$0xff]  }
0x12a9   : > { %v10062_v37 = vld [vmem:[%s12516_s2 + $0xb8] sm:$0xff]   ;;  %8955 = vmatprep.subr.bf16.mxu0 %v10061_v14  ;;  %v10090_v14 = vld [vmem:[#allocation47 + $0xf8] sm:$0xff]  }
0x12aa   : > { %9415 = vpush %v6116_v39  ;;  %8956 = vmatpush3.bf16.msra.mxu0 %v10062_v37  ;;  %v10065_v39 = vld [vmem:[%s12516_s2 + $0xf0] sm:$0xff]   ;;  %v10092_v37 = vld [vmem:[#allocation47 + $0xb8] sm:$0xff]  }
0x12ab   : > { %8957 = vmatprep.subr.bf16.mxu0 %v10065_v39  ;;  %v10094_v39 = vld [vmem:[#allocation47 + $0xf0] sm:$0xff]  }
0x12d9   : > { %s9414_s3 = spop %9413 }
0x12da   : > { %v6100_v32 = vstv %s9414_s3  ;;  %s1778_s3 = scalar_lea.vmem [#allocation56], %s1777_s23 }
0x12db   : > { %v6119_v7 = vmul.f32 0.0008064516, %v6100_v32  ;;  %s9416_s5 = spop %9415  ;;  %v10066_v32 = vld [vmem:[%s12516_s2 + $0xb0] sm:$0xff]  }
0x12dc   : > { %v6118_v53 = vstv %s9416_s5  ;;  %8958 = vmatpush3.bf16.msra.mxu0 %v10066_v32  ;;  %v10096_v32 = vld [vmem:[#allocation47 + $0xb0] sm:$0xff]   ;;  %s7575_s5 = sshll.u32 %s1778_s3, 4  ;;  %s7576_s5 = int_to_ptr.vmem [resolvable:$true] %s7575_s5 }
0x12dd   : > { %v6120_v33 = vmul.f32 0.0008064516, %v6118_v53  ;;  %v6121_v9 = vmul.f32 %v6119_v7, %v6119_v7  ;;  %v6123_v46 = vsub.f32 %v12264_v60, %v6119_v7  ;;  %v6124_v40 = vsub.f32 %v6068_v2, %v6119_v7  ;;  %v10069_v53 = vld [vmem:[%s12516_s2 + $0xa8] sm:$0xff]  }
0x12de   : > { %v6125_v59 = vsub.f32 %v6073_v42, %v6119_v7  ;;  %v6126_v41 = vsub.f32 %v6076_v17, %v6119_v7  ;;  %v10068_v7 = vld [vmem:[%s12516_s2 + $0xe8] sm:$0xff]  }
0x12df   : > { %v6122_v4 = vsub.f32 %v6120_v33, %v6121_v9  ;;  %8959 = vmatprep.subr.bf16.mxu0 %v10068_v7  ;;  %v10071_v33 = vld [vmem:[%s12516_s2 + $0xe0] sm:$0xff]   ;;  %v10098_v7 = vld [vmem:[#allocation47 + $0xe8] sm:$0xff]  }
0x12e0   : > { %8960 = vmatpush3.bf16.msra.mxu0 %v10069_v53  ;;  %v10072_v9 = vld [vmem:[%s12516_s2 + $0xa0] sm:$0xff]   ;;  %v10100_v53 = vld [vmem:[#allocation47 + $0xa8] sm:$0xff]  }
0x12e1   : > { %v6127_v15 = vadd.f32 1e-05, %v6122_v4  ;;  %8961 = vmatprep.subr.bf16.mxu0 %v10071_v33  ;;  %v10060_v4 = vld [vmem:[%s12516_s2 + $0x8] sm:$0xff]  }
0x12e2   : > { %v10102_v33 = vld [vmem:[#allocation47 + $0xe0] sm:$0xff]  }
0x12e3   : > { %10157 = vrsqrt.f32 %v6127_v15  ;;  %v10074_v15 = vld [vmem:[%s12516_s2 + $0xd8] sm:$0xff]  }
0x12e4   : > { %8962 = vmatpush3.bf16.msra.mxu0 %v10072_v9  ;;  %v10104_v9 = vld [vmem:[#allocation47 + $0xa0] sm:$0xff]  }
0x12e5   : > { %8963 = vmatprep.subr.bf16.mxu0 %v10074_v15  ;;  %v10108_v15 = vld [vmem:[#allocation47 + $0x98] sm:$0xff]  }
0x12f0   : > { %v10158_v48 = vpop.eup %10157 }
0x12f1   : > { %v6131_v34 = vmul.f32 %v10158_v48, %v6125_v59  ;;  %v6132_v19 = vmul.f32 %v10158_v48, %v6126_v41  ;;  %v6129_v54 = vmul.f32 %v10158_v48, %v6123_v46  ;;  %v6130_v25 = vmul.f32 %v10158_v48, %v6124_v40  ;;  %v10075_v46 = vld [vmem:[%s12516_s2 + $0x98] sm:$0xff]   ;;  %v10063_v40 = vld [vmem:[%s12516_s2 + $0x40] sm:$0xff]   ;;  %v10077_v41 = vld [vmem:[%s12516_s2 + $0xd0] sm:$0xff]  }
0x12f2   : > { %v10064_v59 = vld [vmem:[%s12516_s2] sm:$0xff]   ;;  %8964 = vmatpush3.bf16.msra.mxu0 %v10075_v46  ;;  %v10080_v48 = vld [vmem:[%s12516_s2 + $0xc8] sm:$0xff]  }
0x12f3   : > { %v6135_v12 = vmul.f32 %v6131_v34, %v6081_v26  ;;  %v6136_v13 = vmul.f32 %v6132_v19, %v6082_v35  ;;  %v6133_v24 = vmul.f32 %v6129_v54, %v6079_v62  ;;  %v6134_v60 = vmul.f32 %v6130_v25, %v6080_v16  ;;  %v10078_v26 = vld [vmem:[%s12516_s2 + $0x90] sm:$0xff]   ;;  %8965 = vmatprep.subr.bf16.mxu0 %v10077_v41  ;;  %v10081_v35 = vld [vmem:[%s12516_s2 + $0x88] sm:$0xff]   ;;  %v10083_v62 = vld [vmem:[%s12516_s2 + $0xc0] sm:$0xff]  }
0x12f4   : > { %v10084_v16 = vld [vmem:[%s12516_s2 + $0x80] sm:$0xff]   ;;  %v10067_v25 = vld [vmem:[%s12516_s2 + $0x138] sm:$0xff]  }
0x12f5   : > { %v6139_v2 = vadd.f32 %v6135_v12, %v6085_v49  ;;  %v6140_v42 = vadd.f32 %v6136_v13, %v6086_v63  ;;  %v6137_v17 = vadd.f32 %v6133_v24, %v6083_v10  ;;  %v6138_v20 = vadd.f32 %v6134_v60, %v6084_v11  ;;  %v10070_v12 = vld [vmem:[%s12516_s2 + $0x130] sm:$0xff]   ;;  %v10110_v46 = vld [vmem:[#allocation47 + $0xd0] sm:$0xff]  }
0x12f6   : > { %8966 = vmatpush3.bf16.msra.mxu0 %v10078_v26 }
0x12f7   : > { %v6143_v22 = vmax.f32 %v6139_v2, 0.0  ;;  %v6144_v29 = vmax.f32 %v6140_v42, 0.0  ;;  %v6141_v36 = vmax.f32 %v6137_v17, 0.0  ;;  %v6142_v0 = vmax.f32 %v6138_v20, 0.0  ;;  %8967 = vmatprep.subr.bf16.mxu0 %v10080_v48  ;;  %v10073_v2 = vld [vmem:[%s12516_s2 + $0x128] sm:$0xff]  }
0x12f9   : > { %v6147_v23 = vadd.f32 %v6143_v22, %v5112_v56  ;;  %v6148_v30 = vadd.f32 %v6144_v29, %v5113_v38  ;;  %v6145_v51 = vadd.f32 %v6141_v36, %v5110_v55  ;;  %v6146_v47 = vadd.f32 %v6142_v0, %v5111_v28  ;;  %v10044_v56 = vld [vmem:[#allocation41] sm:$0xff]   ;;  %v10045_v55 = vld [vmem:[#allocation41 + $0x8] sm:$0xff]   ;;  %v10052_v28 = vld [vmem:[%s12516_s2 + $0x28] sm:$0xff]  }
0x12fa   : > { %v10048_v38 = vld [vmem:[%s12516_s2 + $0x38] sm:$0xff]   ;;  %8968 = vmatpush3.bf16.msra.mxu0 %v10081_v35  ;;  %v10076_v22 = vld [vmem:[%s12516_s2 + $0x120] sm:$0xff]   ;;  %v10082_v0 = vld [vmem:[%s12516_s2 + $0x110] sm:$0xff]  }
0x12fb   : > { %v6235_v44 = vpack.c.bf16 %v6148_v30, %v6147_v23  ;;  %v6234_v43 = vpack.c.bf16 %v6146_v47, %v6145_v51  ;;  %8969 = vmatprep.subr.bf16.mxu0 %v10083_v62  ;;  %v10079_v30 = vld [vmem:[%s12516_s2 + $0x118] sm:$0xff]  }
0x12fd   : > { %v6259_v50 = vand.u32 %v6235_v44, %v11937_v52  ;;  %v10049_v52 = vld [vmem:[%s12516_s2 + $0x70] sm:$0xff]   ;;  %v10085_v44 = vld [vmem:[%s12516_s2 + $0x108] sm:$0xff]  }
0x12fe   : > { %8970 = vmatpush3.bf16.msra.mxu0 %v10084_v16 }
0x12ff   : > { %9324 = vmatpush3.bf16.msra.mxu1 %v6259_v50  ;;  %v10086_v50 = vld [vmem:[%s12516_s2 + $0x100] sm:$0xff]  }
0x1300   : > { %9325 = vmatprep.subr.bf16.mxu1 %v11221_v45 }
0x1303   : > { %9326 = vmatpush3.bf16.msra.mxu1 %v6234_v43 }
0x1304   : > { %8933 = vmatprep.subr.bf16.mxu1 %v10047_v21 }
0x1306   : > { %9328 = vmatmul.mubr.msk.bf16.vlgmr.msra.gmra.mxu1 %vm5206_vm5, %v10044_v56 }
0x1307   : > { %9331 = vmatprep.mubr.msk.bf16.mxu1 %vm11222_vm6, %v11221_v45  ;;  %8934 = vmatpush3.bf16.msra.mxu1 %v10048_v38 }
0x1308   : > { %8935 = vmatprep.subr.bf16.mxu1 %v10049_v52 }
0x130b   : > { %8936 = vmatpush3.bf16.msra.mxu1 %v10050_v61 }
0x130c   : > { %8937 = vmatprep.subr.bf16.mxu1 %v10051_v27 }
0x130e   : > { %9332 = vmatmul.mubr.msk.bf16.gmra.mxu1 %vm5206_vm5, %v10045_v55 }
0x130f   : > { %9335 = vmatprep.mubr.msk.bf16.mxu1 %vm11222_vm6, %v11221_v45  ;;  %8938 = vmatpush3.bf16.msra.mxu1 %v10052_v28 }
0x1310   : > { %8939 = vmatprep.subr.bf16.mxu1 %v10053_v57 }
0x1313   : > { %8940 = vmatpush3.bf16.msra.mxu1 %v10054_v58 }
0x1314   : > { %8941 = vmatprep.subr.bf16.mxu1 %v10055_v3 }
0x1316   : > { %9336 = vmatmul.mubr.msk.bf16.gmra.mxu1 %vm5206_vm5, %v10046_v1 }
0x1317   : > { %8942 = vmatpush3.bf16.msra.mxu1 %v10056_v5 }
0x1318   : > { %8943 = vmatprep.subr.bf16.mxu1 %v10057_v6 }
0x131b   : > { %8944 = vmatpush3.bf16.msra.mxu1 %v10058_v8 }
0x131c   : > { %8945 = vmatprep.subr.bf16.mxu1 %v10059_v31  ;;  %v10087_v31 = vld [vmem:[#allocation46] sm:$0xff]  }
0x131f   : > { %8946 = vmatpush3.bf16.msra.mxu1 %v10060_v4  ;;  %v10106_v4 = vld [vmem:[#allocation47 + $0xd8] sm:$0xff]  }
0x1320   : > { %8947 = vmatprep.subr.bf16.mxu1 %v10063_v40  ;;  %v10112_v40 = vld [vmem:[#allocation47 + $0x90] sm:$0xff]  }
0x1323   : > { %8948 = vmatpush3.bf16.msra.mxu1 %v10064_v59 }
0x1324   : > { %9339 = vmatprep.subr.bf16.mxu1 %v11221_v45 }
0x13c6   : > { %v6295_v49 = vpop.f32.mrf.mxu1 }
0x13c7   : > { %v6317_v63 = vpack.c.bf16 %v6295_v49, %v6295_v49 }
0x13c8   : > { %v9329_v34 = vpop.f32.mrf.mxu1 }
0x13ca   : > { %v6298_v19 = vpop.f32.mrf.mxu1 }
0x13cb   : > { %v6318_v54 = vpack.c.bf16 %v6298_v19, %v6298_v19 }
0x13cc   : > { %v9330_v10 = vpop.f32.mrf.mxu1 }
0x13cd   : > { %6594 = vmatprep.mubr.bf16.mxu1 %v6318_v54 }
0x13ce   : > { %6595 = vmatmul.mubr.bf16.vlgmr.msra.gmra.mxu1 %v6317_v63  ;;  %v6303_v11 = vpop.f32.mrf.mxu1 }
0x13cf   : > { %9340 = vmatpush3.bf16.msra.mxu1 %v10067_v25  ;;  %9355 = vmatprep.mubr.msk.bf16.mxu1 %vm11222_vm6, %v11221_v45  ;;  %v6319_v24 = vpack.c.bf16 %v6303_v11, %v6303_v11 }
0x13d0   : > { %9341 = vmatprep.subr.bf16.mxu1 %v11221_v45  ;;  %v9333_v13 = vpop.f32.mrf.mxu1 }
0x13d2   : > { %v6306_v60 = vpop.f32.mrf.mxu1 }
0x13d3   : > { %9342 = vmatpush3.bf16.msra.mxu1 %v10070_v12  ;;  %v6320_v42 = vpack.c.bf16 %v6306_v60, %v6306_v60 }
0x13d4   : > { %9343 = vmatprep.subr.bf16.mxu1 %v11221_v45  ;;  %v9334_v17 = vpop.f32.mrf.mxu1 }
0x13d5   : > { %6634 = vmatprep.mubr.bf16.mxu0 %v6320_v42 }
0x13d6   : > { %6635 = vmatmul.mubr.bf16.vlgmr.msra.gmra.mxu0 %v6319_v24  ;;  %v6311_v20 = vpop.f32.mrf.mxu1 }
0x13d7   : > { %9344 = vmatpush3.bf16.msra.mxu1 %v10073_v2  ;;  %v6321_v51 = vpack.c.bf16 %v6311_v20, %v6311_v20  ;;  %9361 = vmatprep.mubr.msk.bf16.mxu0 %vm6795_vm7, %v10087_v31  ;;  %v10120_v31 = vld [vmem:[#allocation47 + $0x80] sm:$0xff]  }
0x13d8   : > { %9345 = vmatprep.subr.bf16.mxu1 %v11221_v45  ;;  %v9337_v29 = vpop.f32.mrf.mxu1 }
0x13da   : > { %v6314_v23 = vpop.f32.mrf.mxu1 }
0x13db   : > { %9346 = vmatpush3.bf16.msra.mxu1 %v10076_v22  ;;  %v6682_v22 = vld [vmem:[#allocation43] sm:$0xff]  ;;  %v6683_v23 = vld [vmem:[#allocation44] sm:$0xff] }
0x13dc   : > { %9347 = vmatprep.subr.bf16.mxu1 %v11221_v45  ;;  %v9338_v36 = vpop.f32.mrf.mxu1 }
0x13df   : > { %9348 = vmatpush3.bf16.msra.mxu1 %v10079_v30 }
0x13e0   : > { %9349 = vmatprep.subr.bf16.mxu1 %v11221_v45 }
0x13e3   : > { %9350 = vmatpush3.bf16.msra.mxu1 %v10082_v0 }
0x13e4   : > { %9351 = vmatprep.subr.bf16.mxu1 %v11221_v45 }
0x13e7   : > { %9352 = vmatpush3.bf16.msra.mxu1 %v10085_v44 }
0x13e8   : > { %9353 = vmatprep.subr.bf16.mxu1 %v11221_v45 }
0x13eb   : > { %9354 = vmatpush3.bf16.msra.mxu1 %v10086_v50  ;;  %v10089_v50 = vld [vmem:[#allocation47 + $0x78] sm:$0xff]  }
0x13ec   : > { %9011 = vmatprep.subr.bf16.mxu1 %v10090_v14  ;;  %v10117_v14 = vld [vmem:[#allocation47 + $0x40] sm:$0xff]  }
0x13ee   : > { %9356 = vmatmul.mubr.bf16.vlgmr.msra.gmra.mxu1 %v6321_v51 }
0x13ef   : > { %9012 = vmatpush3.bf16.msra.mxu1 %v10092_v37  ;;  %v10119_v37 = vld [vmem:[#allocation47] sm:$0xff]  }
0x13f0   : > { %9013 = vmatprep.subr.bf16.mxu1 %v10094_v39 }
0x13f3   : > { %9014 = vmatpush3.bf16.msra.mxu1 %v10096_v32 }
0x13f4   : > { %9015 = vmatprep.subr.bf16.mxu1 %v10098_v7 }
0x13f7   : > { %9016 = vmatpush3.bf16.msra.mxu1 %v10100_v53 }
0x13f8   : > { %9017 = vmatprep.subr.bf16.mxu1 %v10102_v33 }
0x13fb   : > { %9018 = vmatpush3.bf16.msra.mxu1 %v10104_v9 }
0x13fc   : > { %9019 = vmatprep.subr.bf16.mxu1 %v10106_v4 }
0x13ff   : > { %9020 = vmatpush3.bf16.msra.mxu1 %v10108_v15 }
0x1400   : > { %9021 = vmatprep.subr.bf16.mxu1 %v10110_v46 }
0x1403   : > { %9022 = vmatpush3.bf16.msra.mxu1 %v10112_v40 }
0x148e   : > { %v8949_v47 = vpop.f32.mrf.mxu1 }
0x1490   : > { %v8950_v21 = vpop.f32.mrf.mxu1 }
0x1491   : > { %v8951_v28 = vadd.f32 %v8950_v21, %v8949_v47  ;;  %v10088_v47 = vld [vmem:[#allocation46 + $0x8] sm:$0xff]  }
0x1492   : > { %v8952_v43 = vpop.f32.mrf.mxu1  ;;  %v10091_v21 = vld [vmem:[#allocation47 + $0x38] sm:$0xff]  }
0x1493   : > { %v10093_v43 = vld [vmem:[#allocation47 + $0x70] sm:$0xff]  }
0x1494   : > { %v8953_v56 = vpop.f32.mrf.mxu1 }
0x1495   : > { %v10095_v56 = vld [vmem:[#allocation47 + $0x30] sm:$0xff]  }
0x1496   : > { %v8971_v38 = vpop.f32.mrf.mxu0 }
0x1498   : > { %v8972_v52 = vpop.f32.mrf.mxu0 }
0x1499   : > { %v8973_v55 = vadd.f32 %v8972_v52, %v8971_v38  ;;  %v10097_v38 = vld [vmem:[#allocation47 + $0x68] sm:$0xff]  }
0x149a   : > { %v8974_v61 = vpop.f32.mrf.mxu0  ;;  %v10099_v52 = vld [vmem:[#allocation47 + $0x28] sm:$0xff]  }
0x149b   : > { %v6637_v57 = vadd.f32 %v8973_v55, %v8951_v28  ;;  %v10101_v61 = vld [vmem:[#allocation47 + $0x60] sm:$0xff]   ;;  %v10105_v55 = vld [vmem:[#allocation47 + $0x58] sm:$0xff]  }
0x149c   : > { %v8975_v27 = vpop.f32.mrf.mxu0  ;;  %v10107_v28 = vld [vmem:[#allocation47 + $0x18] sm:$0xff]  }
0x149d   : > { %v10103_v27 = vld [vmem:[#allocation47 + $0x20] sm:$0xff]  }
0x14ae   : > { %v6676_v58 = vpop.f32.mrf.mxu1 }
0x14af   : > { %v12342_v3 = vadd.f32 %v6676_v58, %v6637_v57  ;;  %v10109_v57 = vld [vmem:[#allocation47 + $0x50] sm:$0xff]  }
0x14b0   : > { %v9357_v1 = vpop.f32.mrf.mxu1  ;;  %v10111_v58 = vld [vmem:[#allocation47 + $0x10] sm:$0xff]  }
0x14b1   : > { %6684 = vadd.xlane.f32.xlu0 %v12342_v3  ;;  %v6694_v5 = vmul.f32 %v12342_v3, %v12342_v3  ;;  %v10116_v1 = vld [vmem:[#allocation47 + $0x88] sm:$0xff]  }
0x14b2   : > { %v6679_v6 = vpop.f32.mrf.mxu1 }
0x14b3   : > { %6695 = vadd.xlane.f32.xlu1 %v6694_v5  ;;  %v10113_v5 = vld [vmem:[#allocation47 + $0x48] sm:$0xff]  }
0x14b4   : > { %v9358_v8 = vpop.f32.mrf.mxu1  ;;  %v10115_v6 = vld [vmem:[#allocation47 + $0x8] sm:$0xff]  }
0x14b5   : > { %v10118_v8 = vld [vmem:[#allocation47 + $0xc0] sm:$0xff]  }
0x153a   : > { %v6685_v59 = vpop.xlane.xlu0 %6684 }
0x153b   : > { %v6686_v41 = vrot.slane %v6685_v59, 4 }
0x153c   : > { %v6696_v26 = vpop.xlane.xlu1 %6695 }
0x153d   : > { %v6687_v48 = vadd.f32 %v6686_v41, %v6685_v59  ;;  %v6697_v35 = vrot.slane %v6696_v26, 4 }
0x153f   : > { %v6688_v62 = vrot.slane %v6687_v48, 2  ;;  %v6698_v16 = vadd.f32 %v6697_v35, %v6696_v26 }
0x1541   : > { %v6699_v49 = vrot.slane %v6698_v16, 2  ;;  %v6689_v34 = vadd.f32 %v6688_v62, %v6687_v48 }
0x1543   : > { %v6690_v19 = vrot.slane %v6689_v34, 1  ;;  %v6700_v54 = vadd.f32 %v6699_v49, %v6698_v16 }
0x1545   : > { %v6691_v25 = vadd.f32 %v6690_v19, %v6689_v34  ;;  %v6701_v63 = vrot.slane %v6700_v54, 1 }
0x1547   : > { %9417 = vpush %v6691_v25  ;;  %v6702_v10 = vadd.f32 %v6701_v63, %v6700_v54  ;;  %v10121_v63 = vld [vmem:[#allocation50] sm:$0xff]  }
0x1549   : > { %9419 = vpush %v6702_v10  ;;  %v10127_v10 = vld [vmem:[%s12517_s4 + $0xb8] sm:$0xff]  }
0x1578   : > { %s9418_s11 = spop %9417 }
0x1579   : > { %v6693_v11 = vstv %s9418_s11  ;;  %s7573_s11 = scalar_lea.hbm %s11447_s29, %s8525_s1 }
0x157a   : > { %v6705_v12 = vmul.f32 0.001953125, %v6693_v11  ;;  %s9420_s26 = spop %9419  ;;  %v10130_v11 = vld [vmem:[%s12517_s4 + $0xb0] sm:$0xff]  }
0x157b   : > { %v6704_v13 = vstv %s9420_s26  ;;  %s7563_s26 = scalar_lea.sflag [#allocation4], %s1777_s23 }
0x157c   : > { %v6707_v24 = vmul.f32 %v6705_v12, %v6705_v12  ;;  %v6706_v60 = vmul.f32 0.001953125, %v6704_v13  ;;  %v6709_v17 = vsub.f32 %v12342_v3, %v6705_v12  ;;  %v10114_v3 = vld [vmem:[#allocation47 + $0xc8] sm:$0xff]   ;;  %v10133_v12 = vld [vmem:[%s12517_s4 + $0xa8] sm:$0xff]   ;;  %v10136_v13 = vld [vmem:[%s12517_s4 + $0xa0] sm:$0xff]  }
0x157d   : > { %9023 = vmatprep.subr.bf16.mxu1 %v10114_v3 }
0x157e   : > { %v6708_v2 = vsub.f32 %v6706_v60, %v6707_v24  ;;  %9024 = vmatpush3.bf16.msra.mxu1 %v10116_v1  ;;  %v10139_v24 = vld [vmem:[%s12517_s4 + $0x98] sm:$0xff]  }
0x157f   : > { %9025 = vmatprep.subr.bf16.mxu1 %v10118_v8 }
0x1580   : > { %v6710_v42 = vadd.f32 1e-05, %v6708_v2 }
0x1582   : > { %10159 = vrsqrt.f32 %v6710_v42  ;;  %9026 = vmatpush3.bf16.msra.mxu1 %v10120_v31 }
0x1583   : > { %9371 = vmatprep.subr.bf16.mxu1 %v11221_v45 }
0x158f   : > { %v10160_v20 = vpop.eup %10159 }
0x1590   : > { %v6712_v29 = vmul.f32 %v10160_v20, %v6709_v17 }
0x1592   : > { %v6713_v30 = vmul.f32 %v6712_v29, %v6682_v22 }
0x1594   : > { %v6714_v36 = vadd.f32 %v6713_v30, %v6683_v23 }
0x1596   : > { %v6715_v0 = vmax.f32 %v6714_v36, 0.0 }
0x1598   : > { %v6784_v44 = vpack.c.bf16 %v6715_v0, %v6715_v0 }
0x159a   : > { %9391 = vmatprep.subr.msk.bf16.mxu0 %vm6802_vm8, %v6784_v44  ;;  %v6804_v51 = vsel %vm6802_vm8, %v6784_v44, 0 }
0x159b   : > { %9360 = vmatpush3.bf16.msra.mxu0 %v6804_v51 }
0x159c   : > { %8989 = vmatprep.subr.bf16.mxu0 %v10089_v50 }
0x159e   : > { %9362 = vmatmul.mubr.msk.bf16.vlgmr.msra.gmra.mxu0 %vm6795_vm7, %v10088_v47 }
0x159f   : > { %8990 = vmatpush3.bf16.msra.mxu0 %v10091_v21 }
0x15a0   : > { %8991 = vmatprep.subr.bf16.mxu0 %v10093_v43 }
0x15a3   : > { %8992 = vmatpush3.bf16.msra.mxu0 %v10095_v56 }
0x15a4   : > { %8993 = vmatprep.subr.bf16.mxu0 %v10097_v38 }
0x15a7   : > { %8994 = vmatpush3.bf16.msra.mxu0 %v10099_v52 }
0x15a8   : > { %8995 = vmatprep.subr.bf16.mxu0 %v10101_v61 }
0x15ab   : > { %8996 = vmatpush3.bf16.msra.mxu0 %v10103_v27 }
0x15ac   : > { %8997 = vmatprep.subr.bf16.mxu0 %v10105_v55 }
0x15af   : > { %8998 = vmatpush3.bf16.msra.mxu0 %v10107_v28  ;;  %v7131_v28 = vld [vmem:[#allocation49] sm:$0x7] }
0x15b0   : > { %8999 = vmatprep.subr.bf16.mxu0 %v10109_v57 }
0x15b3   : > { %9000 = vmatpush3.bf16.msra.mxu0 %v10111_v58  ;;  %v7132_v58 = vld [vmem:[%s12518_s10] sm:$0x7]  ;;  %s11003_s10 = scalar_lea.vmem %s7576_s5, 16 }
0x15b4   : > { %9001 = vmatprep.subr.bf16.mxu0 %v10113_v5  ;;  %v7236_v5 = vsel %vm2172_vm1, 4294967295, %v11220_v18  ;;  %v10126_v18 = vld [vmem:[%s12517_s4 + $0x30] sm:$0xff]   ;;  %p11004_p11 = scmp.ne.s32.totalorder %s7576_s5, %s11003_s10 }
0x15b5   : > { %v7237_v8 = vsel %vm7235_vm11, %v7236_v5, 0 }
0x15b6   : > { %p11005_p13 = pnand %p11004_p11, %p12519_p12 }
0x15b7   : > { %9002 = vmatpush3.bf16.msra.mxu0 %v10115_v6 }
0x15b8   : > { %9003 = vmatprep.subr.bf16.mxu0 %v10117_v14  ;;  %p11006_p9 = pneg %p11005_p13 }
0x15bb   : > { %9004 = vmatpush3.bf16.msra.mxu0 %v10119_v37  ;;  %v10123_v37 = vld [vmem:[%s12517_s4 + $0x78] sm:$0xff]  }
0x165e   : > { %v9363_v39 = vpop.f32.mrf.mxu0 }
0x165f   : > { %v6857_v33 = vpack.c.bf16 %v9363_v39, %v9363_v39  ;;  %v10122_v39 = vld [vmem:[#allocation50 + $0x8] ss:$0 sps:$4 sm:$0xff]  }
0x1660   : > { %v6840_v32 = vpop.f32.mrf.mxu0 }
0x1661   : > { %v6855_v15 = vpack.c.bf16 %v6840_v32, %v6840_v32  ;;  %v10124_v32 = vld [vmem:[%s12517_s4 + $0x38] sm:$0xff]  }
0x1662   : > { %v9364_v7 = vpop.f32.mrf.mxu0 }
0x1663   : > { %v6858_v53 = vpack.c.bf16 %v9364_v7, %v9364_v7  ;;  %v10125_v7 = vld [vmem:[%s12517_s4 + $0x70] sm:$0xff]  }
0x1664   : > { %v6843_v9 = vpop.f32.mrf.mxu0 }
0x1665   : > { %v6856_v4 = vpack.c.bf16 %v6843_v9, %v6843_v9  ;;  %7123 = vmatprep.mubr.bf16.mxu1 %v6858_v53  ;;  %v10128_v53 = vld [vmem:[%s12517_s4 + $0x68] sm:$0xff]   ;;  %v10131_v9 = vld [vmem:[%s12517_s4 + $0x60] sm:$0xff]  }
0x1666   : > { %7124 = vmatmul.mubr.bf16.vlgmr.msra.gmra.mxu1 %v6857_v33  ;;  %v10129_v33 = vld [vmem:[%s12517_s4 + $0x28] sm:$0xff]  }
0x1667   : > { %7083 = vmatprep.mubr.bf16.mxu0 %v6856_v4  ;;  %9387 = vmatprep.mubr.msk.bf16.mxu1 %vm11222_vm6, %v11221_v45  ;;  %v10132_v4 = vld [vmem:[%s12517_s4 + $0x20] sm:$0xff]  }
0x1668   : > { %7084 = vmatmul.mubr.bf16.vlgmr.msra.gmra.mxu0 %v6855_v15  ;;  %9372 = vmatpush3.bf16.msra.mxu1 %v10127_v10  ;;  %v10134_v15 = vld [vmem:[%s12517_s4 + $0x58] sm:$0xff]  }
0x1669   : > { %9367 = vmatprep.mubr.msk.bf16.mxu0 %vm7228_vm10, %v10121_v63  ;;  %9373 = vmatprep.subr.bf16.mxu1 %v11221_v45 }
0x166c   : > { %9374 = vmatpush3.bf16.msra.mxu1 %v10130_v11 }
0x166d   : > { %9375 = vmatprep.subr.bf16.mxu1 %v11221_v45 }
0x1670   : > { %9376 = vmatpush3.bf16.msra.mxu1 %v10133_v12 }
0x1671   : > { %9377 = vmatprep.subr.bf16.mxu1 %v11221_v45 }
0x1674   : > { %9378 = vmatpush3.bf16.msra.mxu1 %v10136_v13  ;;  %v7524_v13 = vlaneseq }
0x1675   : > { %9379 = vmatprep.subr.bf16.mxu1 %v11221_v45 }
0x1678   : > { %9380 = vmatpush3.bf16.msra.mxu1 %v10139_v24 }
0x1679   : > { %9381 = vmatprep.subr.bf16.mxu1 %v11221_v45 }
0x1726   : > { %v9027_v46 = vpop.f32.mrf.mxu1 }
0x1728   : > { %v9005_v40 = vpop.f32.mrf.mxu0  ;;  %v9028_v59 = vpop.f32.mrf.mxu1 }
0x1729   : > { %v9029_v35 = vadd.f32 %v9028_v59, %v9027_v46  ;;  %v10135_v46 = vld [vmem:[%s12517_s4 + $0x18] sm:$0xff]   ;;  %v10138_v59 = vld [vmem:[%s12517_s4 + $0x10] sm:$0xff]  }
0x172a   : > { %v9006_v41 = vpop.f32.mrf.mxu0  ;;  %v9030_v26 = vpop.f32.mrf.mxu1 }
0x172b   : > { %v9007_v48 = vadd.f32 %v9006_v41, %v9005_v40  ;;  %v10137_v40 = vld [vmem:[%s12517_s4 + $0x50] sm:$0xff]   ;;  %v10145_v26 = vld [vmem:[%s12517_s4 + $0x88] sm:$0xff]  }
0x172c   : > { %v9008_v62 = vpop.f32.mrf.mxu0  ;;  %v9031_v16 = vpop.f32.mrf.mxu1  ;;  %v10142_v41 = vld [vmem:[%s12517_s4 + $0x90] sm:$0xff]  }
0x172d   : > { %v7126_v49 = vadd.f32 %v9029_v35, %v9007_v48  ;;  %9382 = vmatpush3.bf16.msra.mxu1 %v10142_v41  ;;  %v10146_v48 = vld [vmem:[%s12517_s4 + $0x80] sm:$0xff]   ;;  %v10140_v35 = vld [vmem:[%s12517_s4 + $0x48] sm:$0xff]  }
0x172e   : > { %v9009_v34 = vpop.f32.mrf.mxu0  ;;  %9383 = vmatprep.subr.bf16.mxu1 %v11221_v45  ;;  %v10141_v62 = vld [vmem:[%s12517_s4 + $0x8] sm:$0xff]   ;;  %v10143_v16 = vld [vmem:[%s12517_s4 + $0x40] sm:$0xff]  }
0x172f   : > { %v7134_v19 = vsel %vm7133_vm9, %v7126_v49, 0.0  ;;  %v7145_v54 = vmul.f32 %v7126_v49, %v7126_v49 }
0x1730   : > { %7135 = vadd.xlane.f32.xlu0 %v7134_v19 }
0x1731   : > { %v7146_v25 = vsel %vm7133_vm9, %v7145_v54, 0.0  ;;  %9384 = vmatpush3.bf16.msra.mxu1 %v10145_v26 }
0x1732   : > { %7147 = vadd.xlane.f32.xlu1 %v7146_v25  ;;  %9385 = vmatprep.subr.bf16.mxu1 %v11221_v45 }
0x1735   : > { %9386 = vmatpush3.bf16.msra.mxu1 %v10146_v48 }
0x17b9   : > { %v7136_v60 = vpop.xlane.xlu0 %7135 }
0x17ba   : > { %v7137_v2 = vrot.slane %v7136_v60, 4 }
0x17bb   : > { %v7148_v42 = vpop.xlane.xlu1 %7147 }
0x17bc   : > { %v7138_v17 = vadd.f32 %v7137_v2, %v7136_v60  ;;  %v7149_v20 = vrot.slane %v7148_v42, 4 }
0x17be   : > { %v7139_v22 = vrot.slane %v7138_v17, 2  ;;  %v7150_v29 = vadd.f32 %v7149_v20, %v7148_v42  ;;  %v7525_v42 = vshrl.u32 %v7524_v13, 7 }
0x17c0   : > { %v7151_v23 = vrot.slane %v7150_v29, 2  ;;  %v7140_v30 = vadd.f32 %v7139_v22, %v7138_v17 }
0x17c2   : > { %v7141_v36 = vrot.slane %v7140_v30, 1  ;;  %v7152_v0 = vadd.f32 %v7151_v23, %v7150_v29  ;;  %v7526_v23 = vsub.s32 0, %v7525_v42 }
0x17c4   : > { %v7142_v44 = vadd.f32 %v7141_v36, %v7140_v30  ;;  %v7153_v50 = vrot.slane %v7152_v0, 1 }
0x17c6   : > { %9421 = vpush %v7142_v44  ;;  %v7154_v51 = vadd.f32 %v7153_v50, %v7152_v0  ;;  %v7518_v0 = vld [vmem:[#allocation52 + $0x8] sm:$0xff]  ;;  %v7517_v44 = vld [vmem:[#allocation52] sm:$0xff] }
0x17c8   : > { %9423 = vpush %v7154_v51 }
0x17f7   : > { %s9422_s18 = spop %9421 }
0x17f8   : > { %v7144_v47 = vstv %s9422_s18  ;;  %s11223_s18 = smov [#allocation56]  }
0x17f9   : > { %v7157_v21 = vmul.f32 0.0034722222, %v7144_v47  ;;  %s9424_s0 = spop %9423 }
0x17fa   : > { %v7156_v43 = vstv %s9424_s0  ;;  %s11007_s0 = sshll.u32 %s11223_s18, 4  ;;  %s11008_s0 = int_to_ptr.vmem [resolvable:$false] %s11007_s0 }
0x17fb   : > { %v7159_v56 = vmul.f32 %v7157_v21, %v7157_v21  ;;  %v7158_v38 = vmul.f32 0.0034722222, %v7156_v43  ;;  %v7161_v27 = vsub.f32 %v7126_v49, %v7157_v21  ;;  %v10144_v49 = vld [vmem:[%s12517_s4] sm:$0xff]   ;;  %v7520_v21 = vld [vmem:[#allocation53 + $0x8] sm:$0xff]  ;;  %v7519_v43 = vld [vmem:[#allocation53] sm:$0xff]  ;;  %s11009_s2 = scalar_lea.vmem %s11008_s0, 32  ;;  %p11010_p1 = scmp.lt.s32.totalorder %s7576_s5, %s11008_s0 }
0x17fc   : > { %p11011_p0 = scmp.lt.s32.totalorder %s11009_s2, %s11003_s10 }
0x17fd   : > { %v7160_v52 = vsub.f32 %v7158_v38, %v7159_v56 }
0x17fe   : > { %p11012_p2 = por %p11011_p0, %p11010_p1 }
0x17ff   : > { %v7162_v61 = vadd.f32 1e-05, %v7160_v52 }
0x1800   : > { %p11013_p3 = pnand %p11012_p2, %p11006_p9 }
0x1801   : > { %10161 = vrsqrt.f32 %v7162_v61 }
0x180e   : > { %v10162_v55 = vpop.eup %10161 }
0x180f   : > { %v7164_v57 = vmul.f32 %v10162_v55, %v7161_v27 }
0x1811   : > { %v7165_v3 = vmul.f32 %v7164_v57, %v7131_v28  ;;  %v7522_v28 = vld [vmem:[%s11437_s17 + $0x8] sm:$0xff]  ;;  %v7521_v57 = vld [vmem:[%s11437_s17] sm:$0xff] }
0x1813   : > { %v7166_v1 = vadd.f32 %v7165_v3, %v7132_v58 }
0x1815   : > { %v7167_v6 = vmax.f32 %v7166_v1, 0.0 }
0x1817   : > { %v7219_v31 = vpack.c.bf16 %v7167_v6, %v7167_v6 }
0x1819   : > { %v7239_v14 = vand.u32 %v7237_v8, %v7219_v31 }
0x181b   : > { %9365 = vmatprep.subr.bf16.mxu0 %v7239_v14 }
0x181c   : > { %9366 = vmatpush3.bf16.msra.mxu0 %v7239_v14 }
0x181d   : > { %9036 = vmatprep.subr.bf16.mxu0 %v10123_v37 }
0x181f   : > { %9368 = vmatmul.mubr.msk.bf16.vlgmr.msra.gmra.mxu0 %vm7228_vm10, %v10122_v39 }
0x1820   : > { %9037 = vmatpush3.bf16.msra.mxu0 %v10124_v32 }
0x1821   : > { %9038 = vmatprep.subr.bf16.mxu0 %v10125_v7 }
0x1824   : > { %9039 = vmatpush3.bf16.msra.mxu0 %v10126_v18  ;;  %v7523_v18 = vld [vmem:[#allocation55] sm:$0x1] }
0x1825   : > { %9040 = vmatprep.subr.bf16.mxu0 %v10128_v53 }
0x1828   : > { %9041 = vmatpush3.bf16.msra.mxu0 %v10129_v33 }
0x1829   : > { %9042 = vmatprep.subr.bf16.mxu0 %v10131_v9 }
0x182c   : > { %9043 = vmatpush3.bf16.msra.mxu0 %v10132_v4 }
0x182d   : > { %9044 = vmatprep.subr.bf16.mxu0 %v10134_v15 }
0x1830   : > { %9045 = vmatpush3.bf16.msra.mxu0 %v10135_v46 }
0x1831   : > { %9046 = vmatprep.subr.bf16.mxu0 %v10137_v40 }
0x1834   : > { %9047 = vmatpush3.bf16.msra.mxu0 %v10138_v59 }
0x1835   : > { %9048 = vmatprep.subr.bf16.mxu0 %v10140_v35 }
0x1838   : > { %9049 = vmatpush3.bf16.msra.mxu0 %v10141_v62 }
0x1839   : > { %9050 = vmatprep.subr.bf16.mxu0 %v10143_v16 }
0x183c   : > { %9051 = vmatpush3.bf16.msra.mxu0 %v10144_v49 }
0x18df   : > { %v9369_v34 = vpop.f32.mrf.mxu0 }
0x18e0   : > { %v7291_v19 = vpack.c.bf16 %v9369_v34, %v9369_v34 }
0x18e1   : > { %v7275_v54 = vpop.f32.mrf.mxu0 }
0x18e2   : > { %9388 = vmatmul.mubr.bf16.vlgmr.msra.gmra.mxu1 %v7291_v19  ;;  %v7289_v11 = vpack.c.bf16 %v7275_v54, %v7275_v54 }
0x18e3   : > { %v9370_v25 = vpop.f32.mrf.mxu0 }
0x18e5   : > { %v7278_v63 = vpop.f32.mrf.mxu0 }
0x18e6   : > { %v7290_v10 = vpack.c.bf16 %v7278_v63, %v7278_v63 }
0x18e8   : > { %7468 = vmatprep.mubr.bf16.mxu0 %v7290_v10 }
0x18e9   : > { %7469 = vmatmul.mubr.bf16.vlgmr.msra.gmra.mxu0 %v7289_v11 }
0x19a2   : > { %v7510_v45 = vpop.f32.mrf.mxu1 }
0x19a4   : > { %v9389_v12 = vpop.f32.mrf.mxu1 }
0x19a6   : > { %v7513_v24 = vpop.f32.mrf.mxu1 }
0x19a8   : > { %v9390_v60 = vpop.f32.mrf.mxu1 }
0x19a9   : > { %v9052_v2 = vpop.f32.mrf.mxu0 }
0x19ab   : > { %v9053_v17 = vpop.f32.mrf.mxu0 }
0x19ac   : > { %v9054_v20 = vadd.f32 %v9053_v17, %v9052_v2 }
0x19ad   : > { %v9055_v22 = vpop.f32.mrf.mxu0 }
0x19ae   : > { %v7511_v29 = vadd.f32 %v9054_v20, %v7510_v45 }
0x19af   : > { %v9056_v30 = vpop.f32.mrf.mxu0 }
0x19b0   : > { %v7516_v36 = vmax.f32 %v7511_v29, 0.0 }
0x19b2   : > { %v7527_v50 = vrot.slane %v7516_v36, %v7526_v23 }
0x19b4   : > { %v7529_v51 = vmul.f32 %v7527_v50, %v7518_v0  ;;  %v7528_v47 = vmul.f32 %v7527_v50, %v7517_v44 }
0x19b6   : > { %7532 = vadd.xlane.f32.xlu1 %v7529_v51  ;;  %7530 = vadd.xlane.f32.xlu0 %v7528_v47 }
0x1a3f   : > { %v7533_v56 = vpop.xlane.xlu1 %7532  ;;  %v7531_v38 = vpop.xlane.xlu0 %7530 }
0x1a40   : > { %v7535_v52 = vadd.f32 %v7533_v56, %v7520_v21  ;;  %v7534_v61 = vadd.f32 %v7531_v38, %v7519_v43 }
0x1a42   : > { %v7537_v27 = vmax.f32 %v7535_v52, 0.0  ;;  %v7536_v55 = vmax.f32 %v7534_v61, 0.0 }
0x1a44   : > { %7545 = vperm.xlu1 %9761, %v7537_v27   ;;  %7540 = vperm.xlu0 %9760, %v7536_v55  }
0x1abf   : > { %v7546_v58 = vpop.permute.xlu1 %7545  ;;  %v7541_v3 = vpop.permute.xlu0 %7540 }
0x1ac0   : > { %v7549_v1 = vmul.f32 %v7546_v58, %v7522_v28  ;;  %v7548_v5 = vmul.f32 %v7541_v3, %v7521_v57 }
0x1ac2   : > { %v7551_v6 = vsel %vm6795_vm7, %v7549_v1, 0.0  ;;  %v7550_v8 = vsel %vm6795_vm7, %v7548_v5, 0.0 }
0x1ac3   : > { %v7552_v31 = vadd.f32 %v7551_v6, %v7550_v8 }
0x1ac5   : > { %v7553_v14 = vrot.slane %v7552_v31, 4 }
0x1ac7   : > { %v7554_v37 = vadd.f32 %v7553_v14, %v7552_v31 }
0x1ac9   : > { %v7555_v39 = vrot.slane %v7554_v37, 2 }
0x1acb   : > { %v7556_v32 = vadd.f32 %v7555_v39, %v7554_v37 }
0x1acd   : > { %v7557_v7 = vrot.slane %v7556_v32, 1 }
0x1acf   : > { %v7558_v53 = vadd.f32 %v7557_v7, %v7556_v32 }
0x1ad1   : > { %v7559_v33 = vadd.f32 %v7558_v53, %v7523_v18 }
0x1ad3   : > { %7561 = vst.msk [vmem:[%s1778_s3] sm:$0x1] %vm7560_vm12, %v7559_v33 }
0x1ad4   : > { %11016 = shalt.err (!%p11013_p3)
}
0x1ad5   : > { %s11017_s28 = scalar_lea.hbm %s7573_s11, 16  ;;  %s11021_s23 = scalar_lea.hbm %s11447_s29, 32 }
0x1ad6   : > { %p11018_p4 = scmp.ne.s32.totalorder %s7573_s11, %s11017_s28  ;;  %p11022_p6 = scmp.lt.s32.totalorder %s7573_s11, %s11447_s29 }
0x1ad7   : > { %p11023_p8 = scmp.lt.s32.totalorder %s11021_s23, %s11017_s28 }
0x1ad8   : > { %p11019_p7 = pnand %p11018_p4, %p12519_p12 }
0x1ad9   : > { %p11024_p10 = por %p11023_p8, %p11022_p6 }
0x1ada   : > { %p11020_p5 = pneg %p11019_p7 }
0x1adc   : > { %p11025_p11 = pnand %p11024_p10, %p11020_p5 }
0x1ade   : > { %11028 = shalt.err (!%p11025_p11)
}
0x1adf   : > { %9565 = dma.vmem_to_hbm [thread:$0]  (%p12519_p12), %s7576_s5, 16, %s7573_s11, %s7563_s26  }
0x1ae0 PF: > { %s12520_s2 = sld [smem:[#allocation108_spill]] }
0x1ae1   : > { %s12521_s1 = sld [smem:[#allocation106_spill]] }
0x1ae2   : > { %s12522_s3 = sld [smem:[#allocation111_spill]] }
0x1ae6   : > { %p9641_p13 = scmp.ge.s32.totalorder %s12520_s2, 2 }
0x1ae7   : > { %s7587_s10 = sand.u32 1, %s12521_s1  }
0x1ae8   : > { %p12523_p9 = scmp.ne.s32.totalorder %s12522_s3, 0  ;;  %s7588_s18 = scalar_lea.sflag [#allocation4], %s7587_s10 }
0x1aea   : > { %p9568_p1 = pnand %p9641_p13, %p12523_p9 }
0x1aec   : > { %p9569_p0 = pneg %p9568_p1 }
0x1aee   : > { %11118 = dma.done.wait (%p9569_p0), %s7588_s18, 16  }
0x1aef   : > { %11120 = vsyncadd (%p9569_p0), %s7588_s18, 4294967280  ;;  %s12524_s26 = sld [smem:[#allocation109_spill]]  ;;  %s12527_s0 = smov %s11127_s22 }
0x1af0   : > { %s12525_s28 = sld [smem:[#allocation107_spill]] }
0x1af1   : > { %s12526_s23 = sld [smem:[#allocation110_spill]] }
0x1af5   : > { %p115_p2 = scmp.ge.s32.totalorder %s12524_s26, 4  }
0x1af6   : > { %s12528_s22 = smov %s12525_s28 }
0x1af7   :  { %117 = sbr.rel (!%p115_p2) target bundleno = 101 (0x65), region = 411 }
0x1afc   :  { %7592 = vsyncpa [#allocation3], 1 }
0x1afd   :  { %7594 = vsyncpa [#allocation3 + $0x1], 1 }
0x1afe   :  { %7595 = vsyncpa [#allocation6], 1 }
0x1aff   :  { %7596 = vsyncpa [#allocation9], 1 }
0x1b00   :  { %7597 = vsyncpa [#allocation12], 1 }
0x1b01   :  { %7598 = vsyncpa [#allocation15], 1 }
0x1b02   :  { %7599 = vsyncpa [#allocation18], 1 }
0x1b03   :  { %7600 = vsyncpa [#allocation21], 1 }
0x1b04   :  { %7601 = vsyncpa [#allocation24], 1 }
0x1b05   :  { %7602 = vsyncpa [#allocation27], 1 }
0x1b06   :  { %7603 = vsyncpa [#allocation30], 1 }
0x1b07   :  { %7604 = vsyncpa [#allocation33], 1 }
0x1b08   :  { %7605 = vsyncpa [#allocation36], 1 }
0x1b09   :  { %7606 = vsyncpa [#allocation39], 1 }
0x1b0a   :  { %7607 = vsyncpa [#allocation42], 1 }
0x1b0b   :  { %7608 = vsyncpa [#allocation45], 1 }
0x1b0c   :  { %7609 = vsyncpa [#allocation48], 1 }
0x1b0d   :  { %7610 = vsyncpa [#allocation51], 1 }
0x1b0e   :  { %7611 = vsyncpa [#allocation54], 1 }
0x1b0f   :  { %7612 = vsyncpa [#allocation4], 1 }
0x1b10   :  { %7614 = vsyncpa [#allocation4 + $0x1], 1 }

</bundles_post_ra>
